<compile_context>
chip_gen: v7x
topology: tpu7x:2x2x1
jax: 0.10.0
libtpu: 0.0.40
codegen_flags: <defaults>
</compile_context>

<pallas_src>
import jax
import jax.numpy as jnp
from jax.experimental import pallas as pl
from jax.experimental.pallas import tpu as pltpu

NHIDDEN = 128                  # matches nn.Conv3d(norm_nc, 128, kernel_size=1)
_ACT_VMEM_BUDGET = 20 << 20    # target per-step activation VMEM footprint
_VMEM_LIMIT_CAP = 48 << 20     # stay well under v7x's 64 MiB physical VMEM


def _make_mlp_kernel(C, use_vpu_first):
    def kernel(x_ref, w1_ref, b1_ref, w2_ref, b2_ref, o_ref):
        # x_ref:  (C, tm)   voxel tile, voxels on the lane dim
        # w1_ref: (128, C)  b1_ref: (128, 1)
        # w2_ref: (C, 128)  b2_ref: (C, 1)
        x = x_ref[...]
        if use_vpu_first:
            # Tiny contraction dim: a C-term broadcast-FMA on the VPU beats a
            # K=C matmul that uses <2% of the MXU's contraction width.
            xf = x.astype(jnp.float32)
            w1 = w1_ref[...].astype(jnp.float32)
            h = b1_ref[...].astype(jnp.float32)          # (128, 1) -> broadcast
            for c in range(C):                            # C is small & static
                h = h + w1[:, c:c + 1] * xf[c:c + 1, :]   # (128,1)*(1,tm)
            h = jnp.maximum(h, 0.0)
        else:
            h = jnp.dot(w1_ref[...], x, preferred_element_type=jnp.float32)
            h = jnp.maximum(h + b1_ref[...].astype(jnp.float32), 0.0)
        h = h.astype(x.dtype)                             # no-op for f32 inputs
        y = jnp.dot(w2_ref[...], h, preferred_element_type=jnp.float32)
        y = y + b2_ref[...].astype(jnp.float32)
        o_ref[...] = y.astype(o_ref.dtype)

    return kernel


def _per_voxel_vmem_bytes(C, db):
    # Per voxel column: double-buffered input + output (C, tm) tiles, the
    # (128, tm) f32 hidden, and its cast copy.
    return 2 * C * db + 2 * C * db + NHIDDEN * 4 + NHIDDEN * db


def _choose_tile(N, M, C, db, *, act_budget=_ACT_VMEM_BUDGET, min_steps=8):
    """Pick the voxel tile from a VMEM byte budget (not a fixed voxel count)."""
    per_vox = _per_voxel_vmem_bytes(C, db)
    budget_tm = max(128, (act_budget // per_vox) // 128 * 128)

    if M <= budget_tm:
        tm = M                                   # full voxel axis: always legal
    elif M % 128 == 0:
        # Prefer the largest 128-multiple divisor of M inside the budget
        # (full-width vst, uniform pipeline); fall back to the raw budget tile
        # (masked ragged tail) if the best divisor would more than halve it.
        base, k = M // 128, budget_tm // 128
        kk = k
        while kk > 1 and base % kk != 0:
            kk -= 1
        tm = 128 * (kk if 2 * kk >= k else k)
    else:
        tm = max(128, min(budget_tm, (M // 128) * 128))

    # v7x megacore: keep enough grid steps for both TensorCores, but never
    # shrink tiles below 512 voxels (per-step overhead would dominate again).
    while N * pl.cdiv(M, tm) < min_steps and tm % 256 == 0 and tm // 2 >= 512:
        tm //= 2
    return tm


def _pointwise_mlp(x_ncm, w1, b1, w2, b2):
    """x_ncm: (N, C, M) -> (N, C, M) via the fused 1x1x1-conv MLP."""
    N, C, M = x_ncm.shape
    db = x_ncm.dtype.itemsize
    tm = _choose_tile(N, M, C, db)
    grid = (N, pl.cdiv(M, tm))

    # Explicit VMEM budget, derived from the actual per-step footprint so the
    # same code fits v5e (16 MiB scoped default) / v6e / v7x (64 MiB physical).
    weight_bytes = sum(int(a.size) * a.dtype.itemsize for a in (w1, b1, w2, b2))
    act_bytes = _per_voxel_vmem_bytes(C, db) * tm
    vmem_limit = int(min(_VMEM_LIMIT_CAP,
                         max(32 << 20,
                             act_bytes * 5 // 4 + 2 * weight_bytes + (4 << 20))))

    # Advisory cost hint for XLA scheduling around the custom call.
    flops = 4 * N * M * C * NHIDDEN + 3 * N * M * NHIDDEN + 2 * N * M * C
    bytes_accessed = 2 * N * C * M * db + weight_bytes
    cost = pl.CostEstimate(flops=flops, transcendentals=0,
                           bytes_accessed=bytes_accessed)

    kernel = _make_mlp_kernel(C, use_vpu_first=(C <= 8))

    return pl.pallas_call(
        kernel,
        out_shape=jax.ShapeDtypeStruct((N, C, M), x_ncm.dtype),
        grid_spec=pltpu.PrefetchScalarGridSpec(
            num_scalar_prefetch=0,
            grid=grid,
            in_specs=[
                # Batch dim squeezed out of the kernel view -> (C, tm) tile.
                pl.BlockSpec((None, C, tm), lambda n, i: (n, 0, i)),
                # Weights/biases: constant index map -> stay VMEM-resident.
                pl.BlockSpec((NHIDDEN, C), lambda n, i: (0, 0)),
                pl.BlockSpec((NHIDDEN, 1), lambda n, i: (0, 0)),
                pl.BlockSpec((C, NHIDDEN), lambda n, i: (0, 0)),
                pl.BlockSpec((C, 1), lambda n, i: (0, 0)),
            ],
            out_specs=pl.BlockSpec((None, C, tm), lambda n, i: (n, 0, i)),
        ),
        compiler_params=pltpu.CompilerParams(
            dimension_semantics=("parallel", "parallel"),
            vmem_limit_bytes=vmem_limit),
        cost_estimate=cost,
    )(x_ncm, w1, b1, w2, b2)


def make_params(key, norm_nc, dtype=jnp.float32):
    """Deterministic synthetic params for the four branches.

    PyTorch Conv3d weight shape is (out_c, in_c, 1, 1, 1); we store the
    squeezed (out_c, in_c) form directly (no transpose needed for the
    voxels-on-lane layout) plus column biases (out_c, 1).  Pass dtype=bf16 to
    halve HBM traffic; accumulation stays f32 inside the kernel."""
    params = {}
    for name in ("t1", "t1ce", "t2", "flair"):
        key, k1, k2, k3, k4 = jax.random.split(key, 5)
        w1 = (jax.random.normal(k1, (NHIDDEN, norm_nc), jnp.float32) * 0.05).astype(dtype)
        b1 = (jax.random.normal(k2, (NHIDDEN, 1), jnp.float32) * 0.05).astype(dtype)
        w2 = (jax.random.normal(k3, (norm_nc, NHIDDEN), jnp.float32) * 0.05).astype(dtype)
        b2 = (jax.random.normal(k4, (norm_nc, 1), jnp.float32) * 0.05).astype(dtype)
        params[name] = (w1, b1, w2, b2)
    return params


def source_norm_forward(x_ncdhw, source, params):
    """Forward pass of SourceNorm.

    x_ncdhw: (N, C, D, H, W), matching the PyTorch NCDHW convention.
    source:  one of 't1', 't1ce', 't2', 'flair'.  Branch selection is Python
             glue, exactly like the string dispatch in the PyTorch forward;
             an unknown source returns x unchanged.
    """
    if source not in params:
        return x_ncdhw
    w1, b1, w2, b2 = params[source]
    N, C, D, H, W = x_ncdhw.shape
    x_ncm = x_ncdhw.reshape(N, C, D * H * W)   # pure reshape, no data movement
    y = _pointwise_mlp(x_ncm, w1, b1, w2, b2)
    return y.reshape(N, C, D, H, W)


def _reference_forward(x_ncdhw, source, params):
    """Plain-JAX reference (same math) for correctness checking."""
    w1, b1, w2, b2 = params[source]
    N, C, D, H, W = x_ncdhw.shape
    x = x_ncdhw.reshape(N, C, -1).astype(jnp.float32)
    h = jnp.maximum(
        jnp.einsum("hc,ncm->nhm", w1.astype(jnp.float32), x) + b1[None], 0.0)
    y = jnp.einsum("ch,nhm->ncm", w2.astype(jnp.float32), h) + b2[None]
    return y.reshape(N, C, D, H, W)


if __name__ == "__main__":
    key = jax.random.PRNGKey(0)
    norm_nc = 4
    params = make_params(key, norm_nc)

    kx = jax.random.fold_in(key, 123)
    # Small 3D volume: (N=2, C=4, D=16, H=16, W=16) -> M = 4096 voxels/sample.
    # Byte-budgeted tile would take the whole axis; the >=8-grid-step rule
    # (v7x megacore) shrinks it to tm=1024 -> grid (2, 4), all full-width.
    x = jax.random.normal(kx, (2, norm_nc, 16, 16, 16), jnp.float32)

    out = source_norm_forward(x, "t1ce", params)
    out = jax.block_until_ready(out)

    ref = _reference_forward(x, "t1ce", params)
    assert out.shape == x.shape
    assert jnp.allclose(out, ref, atol=1e-4, rtol=1e-4)

    # A second branch exercises different weights through the same kernel.
    out2 = jax.block_until_ready(source_norm_forward(x, "flair", params))
    ref2 = _reference_forward(x, "flair", params)
    assert jnp.allclose(out2, ref2, atol=1e-4, rtol=1e-4)

    # Unknown source passes through unchanged, like the PyTorch forward.
    assert jnp.array_equal(source_norm_forward(x, "unknown", params), x)

    print("KERNEL_OK")
</pallas_src>

<mosaic_0001>
module attributes {stable_mosaic.version = 11 : i64} {
  func.func @kernel(%arg0: i32, %arg1: i32, %arg2: memref<1x4x1024xf32, #tpu.memory_space<vmem>>, %arg3: memref<128x4xf32, #tpu.memory_space<vmem>>, %arg4: memref<128x1xf32, #tpu.memory_space<vmem>>, %arg5: memref<4x128xf32, #tpu.memory_space<vmem>>, %arg6: memref<4x1xf32, #tpu.memory_space<vmem>>, %arg7: memref<1x4x1024xf32, #tpu.memory_space<vmem>>) attributes {dimension_semantics = [#tpu.dimension_semantics<parallel>, #tpu.dimension_semantics<parallel>], iteration_bounds = array<i64: 2, 4>, scalar_prefetch = 0 : i64, scratch_operands = 0 : i64, tpu.core_type = #tpu.core_type<tc>, window_params = [{transform_indices = @transform_0, window_bounds = array<i64: 1, 4, 1024>}, {pipeline_mode = #tpu.pipeline_mode<synchronous>, transform_indices = @transform_1, window_bounds = array<i64: 128, 4>}, {pipeline_mode = #tpu.pipeline_mode<synchronous>, transform_indices = @transform_2, window_bounds = array<i64: 128, 1>}, {pipeline_mode = #tpu.pipeline_mode<synchronous>, transform_indices = @transform_3, window_bounds = array<i64: 4, 128>}, {pipeline_mode = #tpu.pipeline_mode<synchronous>, transform_indices = @transform_4, window_bounds = array<i64: 4, 1>}, {transform_indices = @transform_5, window_bounds = array<i64: 1, 4, 1024>}]} {
    %c0 = arith.constant 0 : index
    %c0_0 = arith.constant 0 : index
    %c0_1 = arith.constant 0 : index
    %0 = vector.load %arg2[%c0, %c0_0, %c0_1] : memref<1x4x1024xf32, #tpu.memory_space<vmem>>, vector<1x4x1024xf32>
    %1 = vector.shape_cast %0 : vector<1x4x1024xf32> to vector<4x1024xf32>
    %c0_2 = arith.constant 0 : index
    %c0_3 = arith.constant 0 : index
    %2 = vector.load %arg3[%c0_2, %c0_3] : memref<128x4xf32, #tpu.memory_space<vmem>>, vector<128x4xf32>
    %c0_4 = arith.constant 0 : index
    %c0_5 = arith.constant 0 : index
    %3 = vector.load %arg4[%c0_4, %c0_5] : memref<128x1xf32, #tpu.memory_space<vmem>>, vector<128x1xf32>
    %4 = vector.extract_strided_slice %2 {offsets = [0, 0], sizes = [128, 1], strides = [1, 1]} : vector<128x4xf32> to vector<128x1xf32>
    %5 = vector.extract_strided_slice %1 {offsets = [0, 0], sizes = [1, 1024], strides = [1, 1]} : vector<4x1024xf32> to vector<1x1024xf32>
    %6 = vector.broadcast %4 : vector<128x1xf32> to vector<128x1024xf32>
    %7 = vector.broadcast %5 : vector<1x1024xf32> to vector<128x1024xf32>
    %8 = arith.mulf %6, %7 : vector<128x1024xf32>
    %9 = vector.broadcast %3 : vector<128x1xf32> to vector<128x1024xf32>
    %10 = arith.addf %9, %8 : vector<128x1024xf32>
    %11 = vector.extract_strided_slice %2 {offsets = [0, 1], sizes = [128, 1], strides = [1, 1]} : vector<128x4xf32> to vector<128x1xf32>
    %12 = vector.extract_strided_slice %1 {offsets = [1, 0], sizes = [1, 1024], strides = [1, 1]} : vector<4x1024xf32> to vector<1x1024xf32>
    %13 = vector.broadcast %11 : vector<128x1xf32> to vector<128x1024xf32>
    %14 = vector.broadcast %12 : vector<1x1024xf32> to vector<128x1024xf32>
    %15 = arith.mulf %13, %14 : vector<128x1024xf32>
    %16 = arith.addf %10, %15 : vector<128x1024xf32>
    %17 = vector.extract_strided_slice %2 {offsets = [0, 2], sizes = [128, 1], strides = [1, 1]} : vector<128x4xf32> to vector<128x1xf32>
    %18 = vector.extract_strided_slice %1 {offsets = [2, 0], sizes = [1, 1024], strides = [1, 1]} : vector<4x1024xf32> to vector<1x1024xf32>
    %19 = vector.broadcast %17 : vector<128x1xf32> to vector<128x1024xf32>
    %20 = vector.broadcast %18 : vector<1x1024xf32> to vector<128x1024xf32>
    %21 = arith.mulf %19, %20 : vector<128x1024xf32>
    %22 = arith.addf %16, %21 : vector<128x1024xf32>
    %23 = vector.extract_strided_slice %2 {offsets = [0, 3], sizes = [128, 1], strides = [1, 1]} : vector<128x4xf32> to vector<128x1xf32>
    %24 = vector.extract_strided_slice %1 {offsets = [3, 0], sizes = [1, 1024], strides = [1, 1]} : vector<4x1024xf32> to vector<1x1024xf32>
    %25 = vector.broadcast %23 : vector<128x1xf32> to vector<128x1024xf32>
    %26 = vector.broadcast %24 : vector<1x1024xf32> to vector<128x1024xf32>
    %27 = arith.mulf %25, %26 : vector<128x1024xf32>
    %28 = arith.addf %22, %27 : vector<128x1024xf32>
    %cst = arith.constant 0.000000e+00 : f32
    %29 = vector.broadcast %cst : f32 to vector<128x1024xf32>
    %30 = arith.maximumf %28, %29 : vector<128x1024xf32>
    %c0_6 = arith.constant 0 : index
    %c0_7 = arith.constant 0 : index
    %31 = vector.load %arg5[%c0_6, %c0_7] : memref<4x128xf32, #tpu.memory_space<vmem>>, vector<4x128xf32>
    %cst_8 = arith.constant dense<0.000000e+00> : vector<4x1024xf32>
    %32 = tpu.matmul %31, %30, %cst_8 {dimension_numbers = #tpu.dot_dimension_numbers<[1], [0], [0], [1], [0, 0, 1, 1], [], []>} : vector<4x128xf32>, vector<128x1024xf32>, vector<4x1024xf32> -> vector<4x1024xf32>
    %c0_9 = arith.constant 0 : index
    %c0_10 = arith.constant 0 : index
    %33 = vector.load %arg6[%c0_9, %c0_10] : memref<4x1xf32, #tpu.memory_space<vmem>>, vector<4x1xf32>
    %34 = vector.broadcast %33 : vector<4x1xf32> to vector<4x1024xf32>
    %35 = arith.addf %32, %34 : vector<4x1024xf32>
    %c0_11 = arith.constant 0 : index
    %c0_12 = arith.constant 0 : index
    %c0_13 = arith.constant 0 : index
    %36 = vector.load %arg7[%c0_11, %c0_12, %c0_13] : memref<1x4x1024xf32, #tpu.memory_space<vmem>>, vector<1x4x1024xf32>
    %37 = vector.shape_cast %36 : vector<1x4x1024xf32> to vector<4x1024xf32>
    %38 = vector.shape_cast %35 : vector<4x1024xf32> to vector<1x4x1024xf32>
    tpu.vector_store %arg7[%c0_11, %c0_12, %c0_13], %38 {strides = array<i32>} : memref<1x4x1024xf32, #tpu.memory_space<vmem>>, vector<1x4x1024xf32>,
    return
  }
  func.func @transform_0(%arg0: i32, %arg1: i32) -> (i32, i32, i32) {
    %c0_i32 = arith.constant 0 : i32
    %c0_i32_0 = arith.constant 0 : i32
    return %arg0, %c0_i32, %arg1 : i32, i32, i32
  }
  func.func @transform_1(%arg0: i32, %arg1: i32) -> (i32, i32) {
    %c0_i32 = arith.constant 0 : i32
    %c0_i32_0 = arith.constant 0 : i32
    %c0_i32_1 = arith.constant 0 : i32
    return %c0_i32, %c0_i32_0 : i32, i32
  }
  func.func @transform_2(%arg0: i32, %arg1: i32) -> (i32, i32) {
    %c0_i32 = arith.constant 0 : i32
    %c0_i32_0 = arith.constant 0 : i32
    %c0_i32_1 = arith.constant 0 : i32
    return %c0_i32, %c0_i32_0 : i32, i32
  }
  func.func @transform_3(%arg0: i32, %arg1: i32) -> (i32, i32) {
    %c0_i32 = arith.constant 0 : i32
    %c0_i32_0 = arith.constant 0 : i32
    %c0_i32_1 = arith.constant 0 : i32
    return %c0_i32, %c0_i32_0 : i32, i32
  }
  func.func @transform_4(%arg0: i32, %arg1: i32) -> (i32, i32) {
    %c0_i32 = arith.constant 0 : i32
    %c0_i32_0 = arith.constant 0 : i32
    %c0_i32_1 = arith.constant 0 : i32
    return %c0_i32, %c0_i32_0 : i32, i32
  }
  func.func @transform_5(%arg0: i32, %arg1: i32) -> (i32, i32, i32) {
    %c0_i32 = arith.constant 0 : i32
    %c0_i32_0 = arith.constant 0 : i32
    return %arg0, %c0_i32, %arg1 : i32, i32, i32
  }
}

</mosaic_0001>

<bundles_post_ra>
// kernel: tpu_custom_call.1
= control target key start
LH: loop header
LB: loop body
LE: loop exit
PB: predicated region body
PF: predicated region fallthrough
CT: control target
= control target key end

     0   :  { %10 = vsyncpa [#allocation3], 0  ;;  %s5463_s0 = inlined_call_operand.vmem [shape: f32[2,4,4096], index: 0, kind: input, shape index: {}]   ;;  %s5464_s1 = inlined_call_operand.vmem [shape: f32[128,4], index: 1, kind: input, shape index: {}]   ;;  %s5465_s2 = inlined_call_operand.vmem [shape: f32[128,1], index: 2, kind: input, shape index: {}]   ;;  %s5466_s3 = inlined_call_operand.vmem [shape: f32[4,128], index: 3, kind: input, shape index: {}]   ;;  %s5467_s4 = inlined_call_operand.vmem [shape: f32[4,1], index: 4, kind: input, shape index: {}]   ;;  %s5468_s5 = inlined_call_operand.hbm [shape: f32[2,4,4096], index: 5, kind: output, shape index: {}]  }
   0x1   :  { %12 = vsyncpa [#allocation3 + $0x1], 0  ;;  %s2890_s18 = smov 0   ;;  %s2892_s19 = smov 0  }
   0x2   :  { %s2894_s20 = smov 0   ;;  %s2896_s21 = smov 0  }
   0x3   :  { %s2898_s22 = smov 0   ;;  %s2900_s23 = smov 0  }
   0x4   :  { %s2902_s24 = smov 0   ;;  %s2904_s25 = smov 0  }
   0x5 LB: > { %s2493_s26 = sadd.s32 4294967295, %s2852_s25   ;;  %s2494_s27 = sadd.s32 4294967294, %s2852_s25   ;;  %s2852_s25 = sphi %s2904_s25, %s18_s25   ;;  %s2848_s24 = sphi %s2902_s24, %s6174_s24   ;;  %s2844_s23 = sphi %s2900_s23, %s6173_s23   ;;  %s2840_s22 = sphi %s2898_s22, %s6172_s22   ;;  %s2836_s21 = sphi %s2896_s21, %s6171_s21   ;;  %s2832_s20 = sphi %s2894_s20, %s6170_s20   ;;  %s2828_s19 = sphi %s2892_s19, %s6169_s19   ;;  %s2824_s18 = sphi %s2890_s18, %s6168_s18  }
   0x6   : > { %s27_s28 = sadd.s32 1, %s2844_s23  ;;  %s30_s29 = sadd.s32 1, %s2848_s24 }
   0x7   : > { %p28_p0 = scmp.ge.s32.totalorder %s27_s28, 4  ;;  %p161_p1 = scmp.ne.s32.totalorder %s2832_s20, %s2828_s19 }
   0x8   : > { %p162_p2 = scmp.eq.s32.totalorder %s2493_s26, 7  ;;  %p167_p5 = scmp.ne.s32.totalorder %s2828_s19, %s2824_s18 }
   0x9   : > { %s6176_s28 = smov (%p28_p0, %s27_s28), 0  ;;  %s6178_s29 = smov (!%p28_p0, %s30_s29), %s2848_s24 }
   0xa   : > { %s147_s30 = ssub.s32 %s2844_s23, %s6176_s28  ;;  %p2941_p3 = por %p162_p2, %p161_p1 }
   0xb   : > { %p32_p4 = scmp.ge.s32.totalorder %s6178_s29, 2  ;;  %p168_p6 = scmp.eq.s32.totalorder %s2494_s27, 7 }
   0xc   : > { %p2497_p7 = scmp.ge.s32.totalorder %s2852_s25, 1  ;;  %p211_p9 = scmp.lt.s32.totalorder %s2852_s25, 9 }
   0xd   : > { %s6180_s29 = smov (%p32_p4, %s6178_s29), 0  ;;  %p2950_p8 = por %p168_p6, %p167_p5 }
   0xe   : > { %s146_s8 = ssub.s32 %s2848_s24, %s6180_s29  ;;  %s151_s9 = sadd.s32 1, %s2832_s20 }
   0xf   : > { %s148_s10 = sor.u32 %s147_s30, %s146_s8  ;;  %p212_p10 = pnand %p2497_p7, %p211_p9 }
  0x10   : > { %p149_p11 = scmp.eq.s32.totalorder %s148_s10, 0 }
  0x11   : > { %215 = sbr.rel (%p212_p10) target bundleno = 723 (0x2d3), region = 40 }
  0x12   : > { %s2959_s11 = scalar_select %p149_p11, %s2832_s20, %s151_s9  }
  0x18   : > { %v274_v0 = vld [vmem:[%s5465_s2] sm:$0xff]  ;;  %v2967_v1 = vld [vmem:[%s5464_s1 + $0x10] sm:$0xff]  ;;  %v5469_v2 = vmov 2   ;;  %v5475_v3 = vmov 0   ;;  %v275_v4 = vld [vmem:[%s5465_s2 + $0x8] sm:$0xff]  ;;  %v5473_v8 = vmov 1   ;;  %v374_v11 = vlaneseq }
  0x19   : > { %2720 = vset.pattern.permute.xlu0 %v5469_v2  ;;  %2712 = vset.pattern.permute.xlu1 %v5475_v3  ;;  %v2978_v5 = vld [vmem:[%s5464_s1 + $0x30] sm:$0xff]  ;;  %v2989_v7 = vld [vmem:[%s5464_s1 + $0x8] sm:$0xff]  ;;  %v2997_v9 = vld [vmem:[%s5464_s1] sm:$0xff]  ;;  %s3001_s14 = sshll.u32 %s2836_s21, 3  ;;  %p244_p12 = scmp.lt.s32.totalorder %s2840_s22, 1  ;;  %v5471_v24 = vmov 3  }
  0x1a   : > { %576 = vperm.xlu1 %2712, %v274_v0   ;;  %1183 = vperm.xlu0 %2720, %v2967_v1   ;;  %v2984_v6 = vld [vmem:[%s5464_s1 + $0x50] sm:$0xff]  ;;  %p246_p13 = scmp.lt.s32.totalorder %s3001_s14, 31  ;;  %v3014_v10 = vld [vmem:[%s5464_s1 + $0x18] sm:$0xff]  ;;  %v3026_v14 = vshrl.u32 %v374_v11, 7  ;;  %v279_v15 = vld [vmem:[%s5465_s2 + $0x28] sm:$0xff]  ;;  %s240_s9 = sand.u32 1, %s2828_s19  }
  0x1b   : > { %s245_s15 = scalar_select %p244_p12, %s2840_s22, 1  ;;  %v276_v12 = vld [vmem:[%s5465_s2 + $0x10] sm:$0xff]  ;;  %v277_v13 = vld [vmem:[%s5465_s2 + $0x18] sm:$0xff]  ;;  %v283_v27 = vld [vmem:[%s5465_s2 + $0x48] sm:$0xff] }
  0x1c   : > { %s247_s21 = scalar_select %p246_p13, %s3001_s14, 31  ;;  %v3038_v16 = vsub.s32 5, %v3026_v14  ;;  %v3043_v17 = vld [vmem:[%s5464_s1 + $0x38] sm:$0xff]  ;;  %v3052_v19 = vsub.s32 4, %v3026_v14  ;;  %v3055_v20 = vsub.s32 1, %v3026_v14  ;;  %v280_v22 = vld [vmem:[%s5465_s2 + $0x30] sm:$0xff] }
  0x1d   : > { %s2500_s26 = sshll.u32 %s245_s15, 5  ;;  %v3067_v25 = vsub.s32 0, %v3026_v14  ;;  %v3081_v29 = vld [vmem:[%s5464_s1 + $0x20] sm:$0xff]  ;;  %v3087_v30 = vld [vmem:[%s5464_s1 + $0x58] sm:$0xff]  ;;  %v263_v31 = vld [vmem:[%s5464_s1 + $0x28] sm:$0xff]  ;;  %v3136_v45 = vsub.s32 6, %v3026_v14 }
  0x1e   : > { %581 = vperm.xlu1 %2712, %v275_v4   ;;  %1199 = vperm.xlu0 %2720, %v2978_v5   ;;  %s249_s8 = sadd.s32 %s2500_s26, %s247_s21  ;;  %v284_v32 = vld [vmem:[%s5465_s2 + $0x50] sm:$0xff]  ;;  %v287_v33 = vld [vmem:[%s5465_s2 + $0x68] sm:$0xff]  ;;  %v273_v34 = vld [vmem:[%s5464_s1 + $0x78] sm:$0xff]  ;;  %v3177_v55 = vsub.s32 7, %v3026_v14  ;;  %v1632_v11 = vsub.s32 3, %v3026_v14  ;;  %s2498_s10 = sshll.u32 %s240_s9, 5 }
  0x1f   : > { %s2501_s15 = sshll.u32 %s249_s8, 2  ;;  %v278_v35 = vld [vmem:[%s5465_s2 + $0x20] sm:$0xff]  ;;  %v288_v36 = vld [vmem:[%s5465_s2 + $0x70] sm:$0xff]  ;;  %v281_v54 = vld [vmem:[%s5465_s2 + $0x38] sm:$0xff]  ;;  %s242_s12 = scalar_lea.vmem [#allocation2], %s2498_s10 }
  0x20   : > { %s3035_s21 = scalar_lea.vmem %s5463_s0, %s2501_s15  ;;  %v3166_v53 = vld [vmem:[%s5464_s1 + $0x70] sm:$0xff]  ;;  %v3193_v58 = vld [vmem:[%s5464_s1 + $0x40] sm:$0xff]  ;;  %v3198_v59 = vld [vmem:[%s5464_s1 + $0x48] sm:$0xff]  ;;  %s2504_s13 = sshll.u32 %s2840_s22, 5 }
  0x21   : > { %v3047_v18 = vld [vmem:[%s3035_s21 + $0x10] sm:$0xff]  ;;  %v3114_v37 = vld [vmem:[%s3035_s21 + $0x18] sm:$0xff]  ;;  %5686 = vst [vmem:[#allocation13_spill] sm:$0xff] %v3166_v53  ;;  %v3208_v60 = vld [vmem:[%s5464_s1 + $0x68] sm:$0xff]  ;;  %s2410_s15 = sadd.s32 %s2504_s13, %s3001_s14  ;;  %s2414_s17 = sshll.u32 %s242_s12, 4  ;;  %s5410_s17 = int_to_ptr.vmem [resolvable:$true] %s2414_s17 }
  0x22   : > { %2713 = vset.pattern.permute.xlu1 %v5473_v8  ;;  %1215 = vperm.xlu0 %2720, %v2984_v6   ;;  %v869_v21 = vrot.slane %v3047_v18, %v3038_v16  ;;  %v397_v26 = vrot.slane %v3047_v18, %v3052_v19  ;;  %v877_v38 = vrot.slane %v3114_v37, %v3038_v16  ;;  %v282_v61 = vld [vmem:[%s5465_s2 + $0x40] sm:$0xff]  ;;  %v255_v63 = vld [vmem:[%s3035_s21 + $0x8] sm:$0xff]  ;;  %s2505_s16 = sshll.u32 %s2410_s15, 6  ;;  %s2398_s22 = scalar_lea.sflag [#allocation3], %s240_s9 }
  0x23   : > { %787 = vperm.xlu1 %2713, %v2989_v7   ;;  %v865_v39 = vrot.slane %v3047_v18, %v3055_v20  ;;  %v405_v42 = vrot.slane %v3114_v37, %v3052_v19  ;;  %v393_v43 = vrot.slane %v3047_v18, %v3067_v25  ;;  %v873_v44 = vrot.slane %v3114_v37, %v3055_v20  ;;  %v254_v62 = vld [vmem:[%s3035_s21] sm:$0xff]  ;;  %s5408_s27 = scalar_lea.hbm %s5468_s5, %s2505_s16  ;;  %s2758_s14 = scalar_lea.vmem %s5410_s17, 512 }
  0x24   : > { %v3063_v23 = vrot.slane %v869_v21, %v3055_v20  ;;  %v3076_v28 = vrot.slane %v397_v26, %v3067_v25  ;;  %v3122_v40 = vrot.slane %v877_v38, %v3055_v20  ;;  %v401_v49 = vrot.slane %v3114_v37, %v3067_v25  ;;  %5687 = vst [vmem:[#allocation14_spill] sm:$0xff] %v3208_v60  ;;  %p2759_p0 = scmp.ne.s32.totalorder %s5410_s17, %s2758_s14  ;;  %s2859_s30 = smov [#allocation2]  }
  0x25   : > { %v3125_v41 = vrot.slane %v865_v39, %v3055_v20  ;;  %v3139_v46 = vrot.slane %v405_v42, %v3067_v25  ;;  %v3142_v47 = vrot.slane %v393_v43, %v3067_v25  ;;  %v3145_v48 = vrot.slane %v873_v44, %v3055_v20  ;;  %s2762_s8 = sshll.u32 %s2859_s30, 4  ;;  %s2763_s8 = int_to_ptr.vmem [resolvable:$false] %s2762_s8 }
  0x26   : > { %2741 = vset.pattern.permute.xlu0 %v5475_v3  ;;  %5678 = vst [vmem:[#allocation5_spill] sm:$0xff] %v3063_v23  ;;  %5679 = vst [vmem:[#allocation6_spill] sm:$0xff] %v3076_v28  ;;  %v1261_v50 = vrot.slane %v3047_v18, %v3136_v45  ;;  %v1269_v51 = vrot.slane %v3114_v37, %v3136_v45  ;;  %v3157_v52 = vrot.slane %v401_v49, %v3067_v25  ;;  %p2760_p1 = pnand %p2759_p0, %p2941_p3  ;;  %s2764_s10 = scalar_lea.vmem %s2763_s8, 1024 }
  0x27   : > { %2714 = vset.pattern.permute.xlu1 %v5475_v3  ;;  %292 = vperm.xlu0 %2741, %v2997_v9   ;;  %5680 = vst [vmem:[#allocation7_spill] sm:$0xff] %v3122_v40  ;;  %5681 = vst [vmem:[#allocation8_spill] sm:$0xff] %v3125_v41  ;;  %v1653_v56 = vrot.slane %v3047_v18, %v3177_v55  ;;  %v1661_v57 = vrot.slane %v3114_v37, %v3177_v55  ;;  %p2765_p4 = scmp.lt.s32.totalorder %s5410_s17, %s2763_s8  ;;  %p2766_p5 = scmp.lt.s32.totalorder %s2764_s10, %s2758_s14 }
  0x28   : > { %302 = vperm.xlu1 %2714, %v2967_v1   ;;  %5682 = vst [vmem:[#allocation9_spill] sm:$0xff] %v3139_v46  ;;  %5683 = vst [vmem:[#allocation10_spill] sm:$0xff] %v3142_v47  ;;  %v853_v0 = vrot.slane %v254_v62, %v3038_v16  ;;  %v857_v21 = vrot.slane %v255_v63, %v3055_v20  ;;  %v1245_v26 = vrot.slane %v254_v62, %v3136_v45  ;;  %p2761_p2 = pneg %p2760_p1 }
  0x29   : > { %5684 = vst [vmem:[#allocation11_spill] sm:$0xff] %v3145_v48  ;;  %5685 = vst [vmem:[#allocation12_spill] sm:$0xff] %v3157_v52  ;;  %v1641_v38 = vrot.slane %v255_v63, %v1632_v11  ;;  %p2767_p6 = por %p2766_p5, %p2765_p4 }
  0x2a   : > { %v3267_v43 = vrot.slane %v857_v21, %v3055_v20 }
  0x2b   : > { %297 = vperm.xlu0 %2741, %v2989_v7   ;;  %p2768_p7 = pnand %p2767_p6, %p2761_p2 }
  0x2c   : > { %2715 = vset.pattern.permute.xlu1 %v5469_v2  ;;  %5692 = vst [vmem:[#allocation19_spill] sm:$0xff] %v3267_v43 }
  0x2d   : > { %1175 = vperm.xlu1 %2715, %v2997_v9  }
  0x2f   : > { %307 = vperm.xlu0 %2741, %v3014_v10  }
  0x31   : > { %1179 = vperm.xlu1 %2715, %v2989_v7  }
  0x33   : > { %586 = vperm.xlu0 %2741, %v276_v12   ;;  %v3235_v12 = vrot.slane %v853_v0, %v3055_v20 }
  0x35   : > { %2716 = vset.pattern.permute.xlu1 %v5475_v3 }
  0x36   : > { %591 = vperm.xlu1 %2716, %v277_v13   ;;  %v389_v13 = vrot.slane %v255_v63, %v3052_v19 }
  0x37   : > { %601 = vperm.xlu0 %2741, %v279_v15   ;;  %v377_v15 = vrot.slane %v254_v62, %v3067_v25 }
  0x38   : > { %v3261_v39 = vrot.slane %v389_v13, %v3067_v25 }
  0x39   : > { %v3264_v42 = vrot.slane %v377_v15, %v3067_v25  ;;  %v3293_v15 = vrot.slane %v1641_v38, %v1632_v11 }
  0x3a   : > { %2717 = vset.pattern.permute.xlu1 %v5473_v8  ;;  %5690 = vst [vmem:[#allocation17_spill] sm:$0xff] %v3261_v39 }
  0x3b   : > { %327 = vperm.xlu0 %2741, %v3043_v17   ;;  %795 = vperm.xlu1 %2717, %v3014_v10   ;;  %5691 = vst [vmem:[#allocation18_spill] sm:$0xff] %v3264_v42  ;;  %5701 = vst [vmem:[#allocation28_spill] sm:$0xff] %v3293_v15 }
  0x3f   : > { %606 = vperm.xlu0 %2741, %v280_v22   ;;  %2718 = vset.pattern.permute.xlu1 %v5471_v24 }
  0x40   : > { %1567 = vperm.xlu1 %2718, %v2997_v9  }
  0x43   : > { %621 = vperm.xlu0 %2741, %v283_v27  }
  0x44   : > { %2719 = vset.pattern.permute.xlu1 %v5475_v3 }
  0x45   : > { %312 = vperm.xlu1 %2719, %v3081_v29  }
  0x47   : > { %347 = vperm.xlu0 %2741, %v3087_v30  }
  0x49   : > { %317 = vperm.xlu1 %2719, %v263_v31  }
  0x4b   : > { %626 = vperm.xlu0 %2741, %v284_v32  }
  0x4d   : > { %2721 = vset.pattern.permute.xlu1 %v5469_v2 }
  0x4e   : > { %1187 = vperm.xlu1 %2721, %v3014_v10  }
  0x4f   : > { %641 = vperm.xlu0 %2741, %v287_v33  }
  0x52   : > { %2722 = vset.pattern.permute.xlu1 %v5475_v3 }
  0x53   : > { %367 = vperm.xlu0 %2741, %v273_v34   ;;  %596 = vperm.xlu1 %2722, %v278_v35   ;;  %v1637_v34 = vrot.slane %v254_v62, %v3177_v55  ;;  %v1645_v35 = vrot.slane %v255_v63, %v3177_v55 }
  0x55   : > { %v3289_v13 = vrot.slane %v1645_v35, %v1632_v11 }
  0x57   : > { %646 = vperm.xlu0 %2741, %v288_v36   ;;  %2723 = vset.pattern.permute.xlu1 %v5473_v8  ;;  %v1633_v36 = vrot.slane %v254_v62, %v1632_v11  ;;  %5699 = vst [vmem:[#allocation26_spill] sm:$0xff] %v3289_v13 }
  0x58   : > { %799 = vperm.xlu1 %2723, %v3081_v29  }
  0x5b   : > { %2748 = vset.pattern.permute.xlu0 %v5473_v8 }
  0x5c   : > { %783 = vperm.xlu0 %2748, %v2997_v9   ;;  %803 = vperm.xlu1 %2723, %v263_v31   ;;  %v381_v9 = vrot.slane %v254_v62, %v3052_v19 }
  0x5e   : > { %v3254_v19 = vrot.slane %v381_v9, %v3067_v25  ;;  %v3287_v9 = vrot.slane %v1637_v34, %v1632_v11 }
  0x60   : > { %791 = vperm.xlu0 %2748, %v2967_v1   ;;  %2724 = vset.pattern.permute.xlu1 %v5471_v24  ;;  %5689 = vst [vmem:[#allocation16_spill] sm:$0xff] %v3254_v19  ;;  %5698 = vst [vmem:[#allocation25_spill] sm:$0xff] %v3287_v9 }
  0x61   : > { %1579 = vperm.xlu1 %2724, %v3014_v10   ;;  %v1240_v10 = vsub.s32 2, %v3026_v14 }
  0x63   : > { %v1241_v32 = vrot.slane %v254_v62, %v1240_v10  ;;  %v1249_v33 = vrot.slane %v255_v63, %v1240_v10  ;;  %v1257_v44 = vrot.slane %v3047_v18, %v1240_v10 }
  0x64   : > { %807 = vperm.xlu0 %2748, %v2978_v5  }
  0x65   : > { %2725 = vset.pattern.permute.xlu1 %v5475_v3 }
  0x66   : > { %322 = vperm.xlu1 %2725, %v2978_v5  }
  0x68   : > { %823 = vperm.xlu0 %2748, %v2984_v6  }
  0x6a   : > { %2726 = vset.pattern.permute.xlu1 %v5469_v2 }
  0x6b   : > { %1191 = vperm.xlu1 %2726, %v3081_v29  }
  0x6c   : > { %839 = vperm.xlu0 %2748, %v3166_v53  }
  0x6f   : > { %1195 = vperm.xlu1 %2726, %v263_v31  }
  0x70   : > { %2750 = vset.pattern.permute.xlu0 %v5471_v24 }
  0x71   : > { %1571 = vperm.xlu0 %2750, %v2989_v7   ;;  %v849_v7 = vrot.slane %v254_v62, %v3055_v20  ;;  %v1265_v62 = vrot.slane %v3114_v37, %v1240_v10 }
  0x73   : > { %2727 = vset.pattern.permute.xlu1 %v5475_v3  ;;  %v3249_v14 = vrot.slane %v849_v7, %v3055_v20  ;;  %v1657_v7 = vrot.slane %v3114_v37, %v1632_v11 }
  0x74   : > { %611 = vperm.xlu1 %2727, %v281_v54  }
  0x75   : > { %1575 = vperm.xlu0 %2750, %v2967_v1   ;;  %v3337_v37 = vrot.slane %v1657_v7, %v1632_v11 }
  0x77   : > { %5712 = vst [vmem:[#allocation39_spill] sm:$0xff] %v3337_v37 }
  0x78   : > { %2728 = vset.pattern.permute.xlu1 %v5473_v8 }
  0x79   : > { %1587 = vperm.xlu0 %2750, %v263_v31   ;;  %811 = vperm.xlu1 %2728, %v3043_v17   ;;  %v1253_v31 = vrot.slane %v255_v63, %v3136_v45 }
  0x7b   : > { %v3279_v0 = vrot.slane %v1253_v31, %v1240_v10  ;;  %v3309_v31 = vrot.slane %v1257_v44, %v1240_v10 }
  0x7d   : > { %1591 = vperm.xlu0 %2750, %v2978_v5   ;;  %2729 = vset.pattern.permute.xlu1 %v5471_v24  ;;  %v861_v5 = vrot.slane %v255_v63, %v3038_v16  ;;  %5695 = vst [vmem:[#allocation22_spill] sm:$0xff] %v3279_v0  ;;  %5704 = vst [vmem:[#allocation31_spill] sm:$0xff] %v3309_v31 }
  0x7e   : > { %1583 = vperm.xlu1 %2729, %v3081_v29   ;;  %v385_v29 = vrot.slane %v255_v63, %v3067_v25 }
  0x7f   : > { %v3246_v27 = vrot.slane %v861_v5, %v3055_v20  ;;  %v3281_v5 = vrot.slane %v1241_v32, %v1240_v10  ;;  %v3283_v20 = vrot.slane %v1249_v33, %v1240_v10  ;;  %v3314_v32 = vrot.slane %v1653_v56, %v1632_v11 }
  0x80   : > { %v3275_v54 = vrot.slane %v385_v29, %v3067_v25  ;;  %v3291_v25 = vrot.slane %v1633_v36, %v1632_v11  ;;  %v3307_v29 = vrot.slane %v1269_v51, %v1240_v10 }
  0x81   : > { %1603 = vperm.xlu0 %2750, %v3198_v59   ;;  %5696 = vst [vmem:[#allocation23_spill] sm:$0xff] %v3281_v5  ;;  %5697 = vst [vmem:[#allocation24_spill] sm:$0xff] %v3283_v20 }
  0x82   : > { %2730 = vset.pattern.permute.xlu1 %v5475_v3  ;;  %5694 = vst [vmem:[#allocation21_spill] sm:$0xff] %v3275_v54  ;;  %5700 = vst [vmem:[#allocation27_spill] sm:$0xff] %v3291_v25 }
  0x83   : > { %332 = vperm.xlu1 %2730, %v3193_v58   ;;  %5703 = vst [vmem:[#allocation30_spill] sm:$0xff] %v3307_v29  ;;  %5705 = vst [vmem:[#allocation32_spill] sm:$0xff] %v3314_v32 }
  0x85   : > { %1607 = vperm.xlu0 %2750, %v2984_v6  }
  0x87   : > { %337 = vperm.xlu1 %2730, %v3198_v59  }
  0x89   : > { %1619 = vperm.xlu0 %2750, %v3208_v60  }
  0x8b   : > { %2731 = vset.pattern.permute.xlu1 %v5469_v2 }
  0x8c   : > { %1203 = vperm.xlu1 %2731, %v3043_v17  }
  0x8d   : > { %1623 = vperm.xlu0 %2750, %v3166_v53  }
  0x90   : > { %2732 = vset.pattern.permute.xlu1 %v5475_v3 }
  0x91   : > { %616 = vperm.xlu1 %2732, %v282_v61   ;;  %2755 = vset.pattern.permute.xlu0 %v5475_v3  ;;  %v1649_v61 = vrot.slane %v3047_v18, %v1632_v11 }
  0x93   : > { %v3321_v33 = vrot.slane %v1649_v61, %v1632_v11 }
  0x95   : > { %2733 = vset.pattern.permute.xlu1 %v5473_v8  ;;  %5707 = vst [vmem:[#allocation34_spill] sm:$0xff] %v3321_v33 }
  0x96   : > { %815 = vperm.xlu1 %2733, %v3193_v58  }
  0x99   : > { %v3224_v1 = vpop.permute.xlu1 %576  ;;  %v3226_v4 = vpop.permute.xlu0 %1183 }
  0x9a   : > { %819 = vperm.xlu1 %2733, %v3198_v59   ;;  %v3331_v51 = vmul.f32 %v3279_v0, %v3226_v4  ;;  %v3335_v18 = vmul.f32 %v3281_v5, %v3226_v4  ;;  %v3343_v56 = vmul.f32 %v3283_v20, %v3226_v4 }
  0x9c   : > { %5710 = vst [vmem:[#allocation37_spill] sm:$0xff] %v3331_v51  ;;  %5711 = vst [vmem:[#allocation38_spill] sm:$0xff] %v3335_v18 }
  0x9d   : > { %v3240_v16 = vpop.permute.xlu1 %581  ;;  %v3242_v22 = vpop.permute.xlu0 %1199  ;;  %5713 = vst [vmem:[#allocation40_spill] sm:$0xff] %v3343_v56 }
  0x9e   : > { %5688 = vst [vmem:[#allocation15_spill] sm:$0xff] %v3242_v22  ;;  %2734 = vset.pattern.permute.xlu1 %v5471_v24  ;;  %v3355_v35 = vmul.f32 %v3281_v5, %v3242_v22  ;;  %v3363_v44 = vmul.f32 %v3283_v20, %v3242_v22 }
  0x9f   : > { %1595 = vperm.xlu1 %2734, %v3043_v17   ;;  %v3272_v17 = vrot.slane %v1245_v26, %v1240_v10  ;;  %v3302_v26 = vrot.slane %v1261_v50, %v1240_v10  ;;  %v3323_v50 = vrot.slane %v1265_v62, %v1240_v10  ;;  %v3351_v10 = vmul.f32 %v3279_v0, %v3242_v22 }
  0xa0   : > { %5716 = vst [vmem:[#allocation43_spill] sm:$0xff] %v3355_v35  ;;  %5717 = vst [vmem:[#allocation44_spill] sm:$0xff] %v3363_v44 }
  0xa1   : > { %v3270_v49 = vpop.permute.xlu0 %1215  ;;  %5702 = vst [vmem:[#allocation29_spill] sm:$0xff] %v3302_v26  ;;  %5708 = vst [vmem:[#allocation35_spill] sm:$0xff] %v3323_v50  ;;  %v3327_v45 = vmul.f32 %v3272_v17, %v3226_v4 }
  0xa2   : > { %5693 = vst [vmem:[#allocation20_spill] sm:$0xff] %v3270_v49  ;;  %v788_v63 = vpop.permute.xlu1 %787  ;;  %5715 = vst [vmem:[#allocation42_spill] sm:$0xff] %v3351_v10  ;;  %v3506_v32 = vmul.f32 %v3283_v20, %v3270_v49 }
  0xa3   : > { %2735 = vset.pattern.permute.xlu1 %v5475_v3  ;;  %v3297_v21 = vmul.f32 %v3063_v23, %v788_v63  ;;  %5709 = vst [vmem:[#allocation36_spill] sm:$0xff] %v3327_v45  ;;  %v929_v36 = vmul.f32 %v3246_v27, %v788_v63  ;;  %v926_v38 = vmul.f32 %v3249_v14, %v788_v63 }
  0xa4   : > { %342 = vperm.xlu1 %2735, %v2984_v6   ;;  %v3319_v6 = vrot.slane %v1661_v57, %v1632_v11  ;;  %v3347_v57 = vmul.f32 %v3272_v17, %v3242_v22  ;;  %v927_v11 = vmul.f32 %v3235_v12, %v788_v63  ;;  %v928_v62 = vmul.f32 %v3267_v43, %v788_v63 }
  0xa5   : > { %v3369_v7 = vmul.f32 %v3122_v40, %v788_v63  ;;  %v3398_v37 = vmul.f32 %v3145_v48, %v788_v63  ;;  %5736 = vst [vmem:[#allocation61_spill] sm:$0xff] %v3506_v32  ;;  %v3599_v32 = vmul.f32 %v3302_v26, %v3226_v4 }
  0xa6   : > { %5706 = vst [vmem:[#allocation33_spill] sm:$0xff] %v3319_v6  ;;  %v293_v34 = vpop.permute.xlu0 %292  ;;  %5714 = vst [vmem:[#allocation41_spill] sm:$0xff] %v3347_v57 }
  0xa7   : > { %v3339_v55 = vpop.permute.xlu1 %302  ;;  %v447_v61 = vmul.f32 %v3254_v19, %v293_v34  ;;  %v449_v8 = vmul.f32 %v3261_v39, %v293_v34  ;;  %v446_v3 = vmul.f32 %v3264_v42, %v293_v34  ;;  %v448_v22 = vmul.f32 %v3275_v54, %v293_v34  ;;  %5718 = vst [vmem:[#allocation45_spill] sm:$0xff] %v3398_v37 }
  0xa8   : > { %2736 = vset.pattern.permute.xlu1 %v5469_v2  ;;  %v3372_v2 = vmul.f32 %v3125_v41, %v788_v63  ;;  %v451_v44 = vmul.f32 %v3076_v28, %v293_v34  ;;  %v3392_v51 = vmul.f32 %v3254_v19, %v3339_v55  ;;  %v453_v53 = vmul.f32 %v3139_v46, %v293_v34 }
  0xa9   : > { %1207 = vperm.xlu1 %2736, %v3193_v58   ;;  %v3402_v33 = vadd.f32 %v3224_v1, %v447_v61  ;;  %v465_v6 = vmul.f32 %v3261_v39, %v3339_v55  ;;  %v462_v15 = vmul.f32 %v3264_v42, %v3339_v55  ;;  %v3410_v25 = vmul.f32 %v3275_v54, %v3339_v55 }
  0xaa   : > { %v3374_v24 = vpop.permute.xlu0 %297  ;;  %v3416_v48 = vadd.f32 %v3224_v1, %v449_v8  ;;  %v3420_v61 = vadd.f32 %v3224_v1, %v446_v3  ;;  %v3427_v60 = vadd.f32 %v3224_v1, %v448_v22  ;;  %v5725_v22 = vmov 0   ;;  %5756 = vst [vmem:[#allocation80_spill] sm:$0xff] %v3599_v32 }
  0xab   : > { %v455_v35 = vmul.f32 %v3254_v19, %v3374_v24  ;;  %v457_v10 = vmul.f32 %v3261_v39, %v3374_v24  ;;  %v454_v57 = vmul.f32 %v3264_v42, %v3374_v24  ;;  %v456_v56 = vmul.f32 %v3275_v54, %v3374_v24  ;;  %5719 = vst [vmem:[#allocation46_spill] sm:$0xff] %v3402_v33  ;;  %v285_v33 = vld [vmem:[%s5465_s2 + $0x58] sm:$0xff] }
  0xac   : > { %v3388_v18 = vpop.permute.xlu1 %1175  ;;  %v459_v45 = vmul.f32 %v3076_v28, %v3374_v24  ;;  %5720 = vst [vmem:[#allocation47_spill] sm:$0xff] %v3416_v48  ;;  %5721 = vst [vmem:[#allocation48_spill] sm:$0xff] %v3420_v61  ;;  %v461_v3 = vmul.f32 %v3139_v46, %v3374_v24  ;;  %v3441_v61 = vadd.f32 %v3224_v1, %v453_v53 }
  0xad   : > { %1211 = vperm.xlu1 %2736, %v3198_v59   ;;  %v663_v63 = vadd.f32 %v3240_v16, %v455_v35  ;;  %v665_v59 = vadd.f32 %v3240_v16, %v457_v10  ;;  %v662_v9 = vadd.f32 %v3240_v16, %v454_v57  ;;  %5722 = vst [vmem:[#allocation49_spill] sm:$0xff] %v3427_v60 }
  0xae   : > { %v3412_v13 = vpop.permute.xlu0 %307  ;;  %v664_v41 = vadd.f32 %v3240_v16, %v456_v56  ;;  %v3431_v35 = vmul.f32 %v3142_v47, %v293_v34  ;;  %v3436_v10 = vadd.f32 %v3224_v1, %v451_v44  ;;  %5724 = vst [vmem:[#allocation51_spill] sm:$0xff] %v3441_v61  ;;  %v452_v57 = vmul.f32 %v3157_v52, %v293_v34 }
  0xaf   : > { %v3447_v56 = vmul.f32 %v3272_v17, %v3388_v18  ;;  %v3451_v60 = vmul.f32 %v3279_v0, %v3388_v18  ;;  %v3455_v44 = vmul.f32 %v3281_v5, %v3388_v18  ;;  %v3459_v53 = vmul.f32 %v3283_v20, %v3388_v18 }
  0xb0   : > { %v3433_v8 = vpop.permute.xlu1 %1179  ;;  %5723 = vst [vmem:[#allocation50_spill] sm:$0xff] %v3436_v10  ;;  %v1055_v34 = vadd.f32 %v927_v11, %v663_v63  ;;  %v1057_v10 = vadd.f32 %v929_v36, %v665_v59  ;;  %v473_v48 = vmul.f32 %v3261_v39, %v3412_v13  ;;  %v1054_v40 = vadd.f32 %v926_v38, %v662_v9 }
  0xb1   : > { %2737 = vset.pattern.permute.xlu1 %v5725_v22  ;;  %5726 = vst [vmem:[#allocation52_spill] sm:$0xff] %v3447_v56  ;;  %5727 = vst [vmem:[#allocation53_spill] sm:$0xff] %v3451_v60  ;;  %v471_v56 = vmul.f32 %v3254_v19, %v3412_v13  ;;  %v1319_v60 = vmul.f32 %v3272_v17, %v3433_v8  ;;  %v470_v37 = vmul.f32 %v3264_v42, %v3412_v13  ;;  %v5731_v59 = vmov 1  }
  0xb2   : > { %5728 = vst [vmem:[#allocation54_spill] sm:$0xff] %v3455_v44  ;;  %5729 = vst [vmem:[#allocation55_spill] sm:$0xff] %v3459_v53  ;;  %v3461_v61 = vpop.permute.xlu0 %586  ;;  %631 = vperm.xlu1 %2737, %v285_v33   ;;  %v1056_v44 = vadd.f32 %v928_v62, %v664_v41  ;;  %v1321_v53 = vmul.f32 %v3279_v0, %v3433_v8  ;;  %v1318_v33 = vmul.f32 %v3281_v5, %v3433_v8 }
  0xb3   : > { %v1320_v11 = vmul.f32 %v3283_v20, %v3433_v8  ;;  %v472_v36 = vmul.f32 %v3275_v54, %v3412_v13  ;;  %v667_v9 = vadd.f32 %v3240_v16, %v459_v45  ;;  %v3484_v41 = vmul.f32 %v3302_v26, %v3388_v18 }
  0xb4   : > { %v1323_v38 = vmul.f32 %v3302_v26, %v3433_v8  ;;  %v669_v62 = vadd.f32 %v3240_v16, %v461_v3  ;;  %v3494_v54 = vmul.f32 %v3272_v17, %v3270_v49  ;;  %v3498_v45 = vmul.f32 %v3279_v0, %v3270_v49 }
  0xb5   : > { %v3479_v63 = vpop.permute.xlu1 %591  ;;  %5730 = vst [vmem:[#allocation56_spill] sm:$0xff] %v3484_v41  ;;  %v3502_v41 = vmul.f32 %v3281_v5, %v3270_v49  ;;  %v3509_v3 = vadd.f32 %v1319_v60, %v1055_v34  ;;  %v3517_v0 = vadd.f32 %v1318_v33, %v1054_v40  ;;  %v458_v49 = vmul.f32 %v3142_v47, %v3374_v24 }
  0xb6   : > { %2738 = vset.pattern.permute.xlu1 %v5731_v59  ;;  %v3490_v42 = vpop.permute.xlu0 %601  ;;  %5733 = vst [vmem:[#allocation58_spill] sm:$0xff] %v3494_v54  ;;  %5734 = vst [vmem:[#allocation59_spill] sm:$0xff] %v3498_v45  ;;  %v1059_v59 = vadd.f32 %v3297_v21, %v667_v9  ;;  %v1061_v54 = vadd.f32 %v3369_v7, %v669_v62  ;;  %v3515_v45 = vadd.f32 %v1321_v53, %v1057_v10  ;;  %v5747_v33 = vmov 3  }
  0xb7   : > { %5732 = vst [vmem:[#allocation57_spill] sm:$0xff] %v3490_v42  ;;  %5735 = vst [vmem:[#allocation60_spill] sm:$0xff] %v3502_v41  ;;  %827 = vperm.xlu1 %2738, %v3087_v30   ;;  %v1325_v42 = vmul.f32 %v3307_v29, %v3433_v8  ;;  %v3519_v41 = vadd.f32 %v1320_v11, %v1056_v44  ;;  %v3525_v60 = vadd.f32 %v3461_v61, %v3392_v51 }
  0xb8   : > { %5737 = vst [vmem:[#allocation62_spill] sm:$0xff] %v3509_v3  ;;  %5738 = vst [vmem:[#allocation63_spill] sm:$0xff] %v3515_v45  ;;  %v3528_v21 = vadd.f32 %v3461_v61, %v465_v6  ;;  %v3530_v7 = vadd.f32 %v1323_v38, %v1059_v59  ;;  %v3539_v44 = vadd.f32 %v3461_v61, %v462_v15 }
  0xb9   : > { %5739 = vst [vmem:[#allocation64_spill] sm:$0xff] %v3517_v0  ;;  %5740 = vst [vmem:[#allocation65_spill] sm:$0xff] %v3519_v41  ;;  %v3532_v34 = vadd.f32 %v1325_v42, %v1061_v54  ;;  %v666_v53 = vadd.f32 %v3240_v16, %v458_v49  ;;  %v460_v51 = vmul.f32 %v3157_v52, %v3374_v24 }
  0xba   : > { %5741 = vst [vmem:[#allocation66_spill] sm:$0xff] %v3525_v60  ;;  %5742 = vst [vmem:[#allocation67_spill] sm:$0xff] %v3528_v21  ;;  %v3534_v10 = vpop.permute.xlu1 %795  ;;  %v3536_v40 = vpop.permute.xlu0 %327  ;;  %v467_v6 = vmul.f32 %v3076_v28, %v3339_v55  ;;  %v679_v42 = vadd.f32 %v3479_v63, %v471_v56  ;;  %v681_v54 = vadd.f32 %v3479_v63, %v473_v48 }
  0xbb   : > { %5743 = vst [vmem:[#allocation68_spill] sm:$0xff] %v3530_v7  ;;  %5744 = vst [vmem:[#allocation69_spill] sm:$0xff] %v3532_v34  ;;  %2739 = vset.pattern.permute.xlu1 %v5747_v33  ;;  %v678_v11 = vadd.f32 %v3479_v63, %v470_v37  ;;  %v3552_v15 = vadd.f32 %v3461_v61, %v3410_v25  ;;  %v680_v49 = vadd.f32 %v3479_v63, %v472_v36  ;;  %v5765_v7 = vld [vmem:[#allocation45_spill] sm:$0xff] }
  0xbc   : > { %5745 = vst [vmem:[#allocation70_spill] sm:$0xff] %v3536_v40  ;;  %5746 = vst [vmem:[#allocation71_spill] sm:$0xff] %v3539_v44  ;;  %1599 = vperm.xlu1 %2739, %v3193_v58   ;;  %v3558_v24 = vmul.f32 %v3307_v29, %v3388_v18  ;;  %v3562_v9 = vadd.f32 %v3224_v1, %v3431_v35  ;;  %v3566_v48 = vmul.f32 %v3309_v31, %v3388_v18  ;;  %v3584_v35 = vld [vmem:[%s5464_s1 + $0x60] sm:$0xff] }
  0xbd   : > { %5748 = vst [vmem:[#allocation72_spill] sm:$0xff] %v3552_v15  ;;  %v1322_v25 = vmul.f32 %v3309_v31, %v3433_v8  ;;  %v3571_v37 = vadd.f32 %v3224_v1, %v452_v57  ;;  %v3575_v58 = vmul.f32 %v3323_v50, %v3388_v18  ;;  %v1324_v56 = vmul.f32 %v3323_v50, %v3433_v8 }
  0xbe   : > { %5749 = vst [vmem:[#allocation73_spill] sm:$0xff] %v3558_v24  ;;  %5750 = vst [vmem:[#allocation74_spill] sm:$0xff] %v3562_v9  ;;  %v3579_v36 = vpop.permute.xlu0 %606  ;;  %v1058_v38 = vadd.f32 %v3372_v2, %v666_v53  ;;  %v668_v62 = vadd.f32 %v3240_v16, %v460_v51  ;;  %v475_v1 = vmul.f32 %v3076_v28, %v3412_v13  ;;  %v5763_v24 = vld [vmem:[#allocation18_spill] sm:$0xff] }
  0xbf   : > { %5751 = vst [vmem:[#allocation75_spill] sm:$0xff] %v3566_v48  ;;  %5752 = vst [vmem:[#allocation76_spill] sm:$0xff] %v3571_v37  ;;  %v3591_v18 = vadd.f32 %v3461_v61, %v467_v6  ;;  %v1568_v57 = vpop.permute.xlu1 %1567  ;;  %v943_v8 = vmul.f32 %v3235_v12, %v3534_v10  ;;  %v947_v59 = vmul.f32 %v3063_v23, %v3534_v10 }
  0xc0   : > { %5753 = vst [vmem:[#allocation77_spill] sm:$0xff] %v3575_v58  ;;  %5754 = vst [vmem:[#allocation78_spill] sm:$0xff] %v3579_v36  ;;  %v477_v2 = vmul.f32 %v3139_v46, %v3412_v13  ;;  %2740 = vset.pattern.permute.xlu1 %v5725_v22  ;;  %v945_v16 = vmul.f32 %v3246_v27, %v3534_v10  ;;  %v942_v53 = vmul.f32 %v3249_v14, %v3534_v10  ;;  %v5777_v36 = vld [vmem:[#allocation26_spill] sm:$0xff] }
  0xc1   : > { %5755 = vst [vmem:[#allocation79_spill] sm:$0xff] %v3591_v18  ;;  %v944_v51 = vmul.f32 %v3267_v43, %v3534_v10  ;;  %v469_v6 = vmul.f32 %v3139_v46, %v3339_v55  ;;  %352 = vperm.xlu1 %2740, %v3584_v35   ;;  %v3615_v32 = vmul.f32 %v3254_v19, %v3536_v40  ;;  %v5759_v18 = vld [vmem:[#allocation32_spill] sm:$0xff] }
  0xc2   : > { %v3619_v58 = vmul.f32 %v3261_v39, %v3536_v40  ;;  %v3622_v37 = vmul.f32 %v5759_v18, %v1568_v57  ;;  %v3624_v48 = vadd.f32 %v1322_v25, %v1058_v38  ;;  %v3626_v9 = vpop.permute.xlu0 %621  ;;  %v3630_v34 = vmul.f32 %v5763_v24, %v3536_v40  ;;  %v5769_v38 = vld [vmem:[#allocation7_spill] sm:$0xff] }
  0xc3   : > { %5757 = vst [vmem:[#allocation81_spill] sm:$0xff] %v3615_v32  ;;  %5762 = vst [vmem:[#allocation85_spill] sm:$0xff] %v3626_v9  ;;  %v1060_v41 = vadd.f32 %v5765_v7, %v668_v62  ;;  %v683_v0 = vadd.f32 %v3479_v63, %v475_v1  ;;  %v3635_v32 = vadd.f32 %v3461_v61, %v469_v6  ;;  %v5771_v6 = vld [vmem:[#allocation8_spill] sm:$0xff] }
  0xc4   : > { %5758 = vst [vmem:[#allocation82_spill] sm:$0xff] %v3619_v58  ;;  %5760 = vst [vmem:[#allocation83_spill] sm:$0xff] %v3622_v37  ;;  %v5767_v58 = vld [vmem:[#allocation21_spill] sm:$0xff]  ;;  %v685_v25 = vadd.f32 %v3479_v63, %v477_v2  ;;  %v466_v37 = vmul.f32 %v3142_v47, %v3339_v55  ;;  %v3646_v18 = vpop.permute.xlu1 %312  ;;  %v474_v1 = vmul.f32 %v3142_v47, %v3412_v13 }
  0xc5   : > { %5761 = vst [vmem:[#allocation84_spill] sm:$0xff] %v3624_v48  ;;  %5764 = vst [vmem:[#allocation86_spill] sm:$0xff] %v3630_v34  ;;  %v3639_v45 = vmul.f32 %v5767_v58, %v3536_v40  ;;  %v949_v48 = vmul.f32 %v5769_v38, %v3534_v10  ;;  %v3648_v7 = vadd.f32 %v1324_v56, %v1060_v41  ;;  %v5774_v41 = vld [vmem:[#allocation25_spill] sm:$0xff] }
  0xc6   : > { %5766 = vst [vmem:[#allocation45_spill] sm:$0xff] %v3635_v32  ;;  %v1075_v62 = vadd.f32 %v947_v59, %v683_v0  ;;  %v946_v40 = vmul.f32 %v5771_v6, %v3534_v10  ;;  %v5772_v32 = vld [vmem:[#allocation14_spill] sm:$0xff]  ;;  %v3655_v2 = vadd.f32 %v943_v8, %v679_v42  ;;  %v3657_v9 = vadd.f32 %v945_v16, %v681_v54  ;;  %v3663_v3 = vpop.permute.xlu0 %347  ;;  %v5779_v54 = vld [vmem:[#allocation27_spill] sm:$0xff]  ;;  %v5783_v16 = vld [vmem:[#allocation33_spill] sm:$0xff] }
  0xc7   : > { %5768 = vst [vmem:[#allocation21_spill] sm:$0xff] %v3639_v45  ;;  %5770 = vst [vmem:[#allocation87_spill] sm:$0xff] %v3648_v7  ;;  %357 = vperm.xlu1 %2740, %v5772_v32   ;;  %v3659_v45 = vadd.f32 %v942_v53, %v678_v11  ;;  %v3661_v34 = vadd.f32 %v944_v51, %v680_v49  ;;  %v3666_v0 = vmul.f32 %v5774_v41, %v1568_v57  ;;  %v5781_v11 = vld [vmem:[#allocation28_spill] sm:$0xff]  ;;  %v5806_v41 = vld [vmem:[#allocation57_spill] sm:$0xff] }
  0xc8   : > { %5773 = vst [vmem:[#allocation14_spill] sm:$0xff] %v3663_v3  ;;  %v1077_v56 = vadd.f32 %v949_v48, %v685_v25  ;;  %v3669_v59 = vadd.f32 %v3461_v61, %v466_v37  ;;  %v682_v7 = vadd.f32 %v3479_v63, %v474_v1  ;;  %v3673_v42 = vmul.f32 %v5777_v36, %v1568_v57  ;;  %v318_v51 = vpop.permute.xlu1 %317  ;;  %v5785_v25 = vld [vmem:[#allocation11_spill] sm:$0xff] }
  0xc9   : > { %5775 = vst [vmem:[#allocation88_spill] sm:$0xff] %v3666_v0  ;;  %v3676_v8 = vmul.f32 %v5779_v54, %v1568_v57  ;;  %v3679_v49 = vmul.f32 %v5781_v11, %v1568_v57  ;;  %v3682_v53 = vmul.f32 %v5783_v16, %v1568_v57  ;;  %v468_v48 = vmul.f32 %v3157_v52, %v3339_v55  ;;  %v5787_v11 = vld [vmem:[#allocation34_spill] sm:$0xff] }
  0xca   : > { %5776 = vst [vmem:[#allocation89_spill] sm:$0xff] %v3669_v59  ;;  %5778 = vst [vmem:[#allocation90_spill] sm:$0xff] %v3673_v42  ;;  %v1074_v15 = vadd.f32 %v946_v40, %v682_v7  ;;  %v476_v37 = vmul.f32 %v3157_v52, %v3412_v13  ;;  %v948_v1 = vmul.f32 %v5785_v25, %v3534_v10  ;;  %v5786_v59 = vmov 2   ;;  %v3706_v13 = vpop.permute.xlu0 %626 }
  0xcb   : > { %5780 = vst [vmem:[#allocation91_spill] sm:$0xff] %v3676_v8  ;;  %5782 = vst [vmem:[#allocation92_spill] sm:$0xff] %v3679_v49  ;;  %2742 = vset.pattern.permute.xlu1 %v5786_v59  ;;  %v3693_v44 = vmul.f32 %v3254_v19, %v3646_v18  ;;  %v3696_v16 = vmul.f32 %v5787_v11, %v1568_v57  ;;  %v3703_v55 = vmul.f32 %v3307_v29, %v3226_v4 }
  0xcc   : > { %5784 = vst [vmem:[#allocation93_spill] sm:$0xff] %v3682_v53  ;;  %v5789_v53 = vld [vmem:[#allocation39_spill] sm:$0xff]  ;;  %1219 = vperm.xlu1 %2742, %v3087_v30   ;;  %5792 = vst [vmem:[#allocation97_spill] sm:$0xff] %v3706_v13  ;;  %v3710_v10 = vmul.f32 %v3261_v39, %v3646_v18  ;;  %v3713_v7 = vadd.f32 %v3461_v61, %v468_v48  ;;  %v3724_v13 = vmul.f32 %v3254_v19, %v3663_v3  ;;  %v286_v61 = vld [vmem:[%s5465_s2 + $0x60] sm:$0xff] }
  0xcd   : > { %5788 = vst [vmem:[#allocation94_spill] sm:$0xff] %v3696_v16  ;;  %v3699_v40 = vmul.f32 %v5789_v53, %v1568_v57  ;;  %5791 = vst [vmem:[#allocation96_spill] sm:$0xff] %v3703_v55  ;;  %v684_v16 = vadd.f32 %v3479_v63, %v476_v37  ;;  %v483_v57 = vmul.f32 %v3076_v28, %v3646_v18 }
  0xce   : > { %5793 = vst [vmem:[#allocation98_spill] sm:$0xff] %v3713_v7  ;;  %v480_v55 = vmul.f32 %v5767_v58, %v3646_v18  ;;  %5794 = vst [vmem:[#allocation99_spill] sm:$0xff] %v3724_v13  ;;  %v3728_v53 = vmul.f32 %v3309_v31, %v3226_v4  ;;  %v3735_v63 = vmul.f32 %v3261_v39, %v3663_v3  ;;  %v1188_v13 = vpop.permute.xlu1 %1187 }
  0xcf   : > { %5790 = vst [vmem:[#allocation95_spill] sm:$0xff] %v3699_v40  ;;  %v478_v40 = vmul.f32 %v5763_v24, %v3646_v18  ;;  %v3739_v48 = vmul.f32 %v5763_v24, %v3663_v3  ;;  %v1076_v37 = vadd.f32 %v948_v1, %v684_v16  ;;  %v491_v7 = vmul.f32 %v3076_v28, %v318_v51 }
  0xd0   : > { %5795 = vst [vmem:[#allocation100_spill] sm:$0xff] %v3728_v53  ;;  %5796 = vst [vmem:[#allocation101_spill] sm:$0xff] %v3735_v63  ;;  %v487_v11 = vmul.f32 %v3254_v19, %v318_v51  ;;  %v489_v53 = vmul.f32 %v3261_v39, %v318_v51  ;;  %v486_v54 = vmul.f32 %v5763_v24, %v318_v51  ;;  %2743 = vset.pattern.permute.xlu1 %v5725_v22  ;;  %v3750_v63 = vpop.permute.xlu0 %641 }
  0xd1   : > { %5797 = vst [vmem:[#allocation102_spill] sm:$0xff] %v3739_v48  ;;  %v3747_v59 = vmul.f32 %v5767_v58, %v3663_v3  ;;  %5799 = vst [vmem:[#allocation104_spill] sm:$0xff] %v3750_v63  ;;  %v488_v48 = vmul.f32 %v5767_v58, %v318_v51  ;;  %v493_v16 = vmul.f32 %v3139_v46, %v318_v51  ;;  %636 = vperm.xlu1 %2743, %v286_v61   ;;  %v5800_v63 = vld [vmem:[#allocation22_spill] sm:$0xff] }
  0xd2   : > { %v490_v1 = vmul.f32 %v3142_v47, %v318_v51  ;;  %v492_v28 = vmul.f32 %v3157_v52, %v318_v51  ;;  %v1339_v21 = vmul.f32 %v3302_v26, %v1188_v13  ;;  %v1341_v60 = vmul.f32 %v3307_v29, %v1188_v13  ;;  %v597_v29 = vpop.permute.xlu1 %596 }
  0xd3   : > { %5798 = vst [vmem:[#allocation103_spill] sm:$0xff] %v3747_v59  ;;  %v1338_v3 = vmul.f32 %v3309_v31, %v1188_v13  ;;  %v1340_v59 = vmul.f32 %v3323_v50, %v1188_v13  ;;  %v1335_v49 = vmul.f32 %v3272_v17, %v1188_v13  ;;  %v1337_v8 = vmul.f32 %v5800_v63, %v1188_v13 }
  0xd4   : > { %v1334_v42 = vmul.f32 %v3281_v5, %v1188_v13  ;;  %v1336_v0 = vmul.f32 %v3283_v20, %v1188_v13  ;;  %v3764_v36 = vadd.f32 %v1339_v21, %v1075_v62  ;;  %v3766_v51 = vadd.f32 %v1341_v60, %v1077_v56  ;;  %v3772_v31 = vpop.permute.xlu0 %367 }
  0xd5   : > { %v3768_v61 = vadd.f32 %v1338_v3, %v1074_v15  ;;  %v3770_v26 = vadd.f32 %v1340_v59, %v1076_v37  ;;  %5805 = vst [vmem:[#allocation109_spill] sm:$0xff] %v3772_v31  ;;  %v3775_v22 = vadd.f32 %v5806_v41, %v491_v7  ;;  %v3778_v63 = vadd.f32 %v5806_v41, %v493_v16 }
  0xd6   : > { %5801 = vst [vmem:[#allocation105_spill] sm:$0xff] %v3764_v36  ;;  %5802 = vst [vmem:[#allocation106_spill] sm:$0xff] %v3766_v51  ;;  %v3781_v5 = vadd.f32 %v5806_v41, %v490_v1  ;;  %v3784_v21 = vadd.f32 %v5806_v41, %v492_v28  ;;  %v5811_v60 = vmov 1   ;;  %v3789_v3 = vmul.f32 %v3323_v50, %v3226_v4 }
  0xd7   : > { %5803 = vst [vmem:[#allocation107_spill] sm:$0xff] %v3768_v61  ;;  %5804 = vst [vmem:[#allocation108_spill] sm:$0xff] %v3770_v26  ;;  %2744 = vset.pattern.permute.xlu1 %v5811_v60  ;;  %v485_v15 = vmul.f32 %v3139_v46, %v3646_v18  ;;  %v482_v62 = vmul.f32 %v3142_v47, %v3646_v18  ;;  %v484_v56 = vmul.f32 %v3157_v52, %v3646_v18  ;;  %v5826_v46 = vld [vmem:[#allocation48_spill] sm:$0xff]  ;;  %v5843_v26 = vld [vmem:[#allocation66_spill] sm:$0xff] }
  0xd8   : > { %5807 = vst [vmem:[#allocation57_spill] sm:$0xff] %v3775_v22  ;;  %5808 = vst [vmem:[#allocation110_spill] sm:$0xff] %v3778_v63  ;;  %831 = vperm.xlu1 %2744, %v3584_v35   ;;  %v3799_v28 = vadd.f32 %v5806_v41, %v487_v11  ;;  %v3802_v59 = vadd.f32 %v5806_v41, %v489_v53  ;;  %v3805_v4 = vadd.f32 %v5806_v41, %v486_v54  ;;  %v3810_v47 = vpop.permute.xlu0 %646  ;;  %v5841_v63 = vld [vmem:[#allocation92_spill] sm:$0xff] }
  0xd9   : > { %5809 = vst [vmem:[#allocation111_spill] sm:$0xff] %v3781_v5  ;;  %5810 = vst [vmem:[#allocation112_spill] sm:$0xff] %v3784_v21  ;;  %v3808_v13 = vadd.f32 %v5806_v41, %v488_v48  ;;  %v691_v7 = vadd.f32 %v597_v29, %v483_v57  ;;  %v693_v37 = vadd.f32 %v597_v29, %v485_v15  ;;  %v800_v41 = vpop.permute.xlu1 %799  ;;  %v5827_v21 = vld [vmem:[#allocation49_spill] sm:$0xff] }
  0xda   : > { %5812 = vst [vmem:[#allocation113_spill] sm:$0xff] %v3789_v3  ;;  %v690_v16 = vadd.f32 %v597_v29, %v482_v62  ;;  %v692_v1 = vadd.f32 %v597_v29, %v484_v56  ;;  %5813 = vst [vmem:[#allocation114_spill] sm:$0xff] %v3810_v47  ;;  %v3813_v18 = vadd.f32 %v1335_v49, %v3655_v2 }
  0xdb   : > { %v3816_v11 = vadd.f32 %v1337_v8, %v3657_v9  ;;  %v3819_v53 = vadd.f32 %v1334_v42, %v3659_v45  ;;  %v3822_v54 = vadd.f32 %v1336_v0, %v3661_v34  ;;  %v687_v57 = vadd.f32 %v597_v29, %v3693_v44 }
  0xdc   : > { %v689_v48 = vadd.f32 %v597_v29, %v3710_v10  ;;  %v686_v15 = vadd.f32 %v597_v29, %v478_v40  ;;  %v688_v62 = vadd.f32 %v597_v29, %v480_v55  ;;  %835 = vperm.xlu1 %2744, %v5772_v32   ;;  %v951_v2 = vmul.f32 %v3235_v12, %v800_v41  ;;  %v3851_v10 = vpop.permute.xlu0 %783 }
  0xdd   : > { %v953_v9 = vmul.f32 %v3246_v27, %v800_v41  ;;  %v950_v8 = vmul.f32 %v3249_v14, %v800_v41  ;;  %v952_v45 = vmul.f32 %v3267_v43, %v800_v41  ;;  %v955_v34 = vmul.f32 %v3063_v23, %v800_v41  ;;  %5818 = vst [vmem:[#allocation119_spill] sm:$0xff] %v3851_v10  ;;  %v3853_v56 = vpop.permute.xlu1 %803  ;;  %v5859_v23 = vld [vmem:[#allocation38_spill] sm:$0xff] }
  0xde   : > { %v957_v0 = vmul.f32 %v5769_v38, %v800_v41  ;;  %v954_v44 = vmul.f32 %v5771_v6, %v800_v41  ;;  %v956_v42 = vmul.f32 %v5785_v25, %v800_v41  ;;  %v3837_v29 = vmul.f32 %v3254_v19, %v3772_v31  ;;  %5819 = vst [vmem:[#allocation120_spill] sm:$0xff] %v3853_v56  ;;  %v289_v38 = vld [vmem:[%s5465_s2 + $0x78] sm:$0xff] }
  0xdf   : > { %v3841_v49 = vmul.f32 %v3261_v39, %v3772_v31  ;;  %v3845_v40 = vmul.f32 %v5763_v24, %v3772_v31  ;;  %v3849_v55 = vmul.f32 %v5767_v58, %v3772_v31  ;;  %v3855_v41 = vadd.f32 %v955_v34, %v691_v7 }
  0xe0   : > { %5814 = vst [vmem:[#allocation115_spill] sm:$0xff] %v3837_v29  ;;  %v3857_v52 = vadd.f32 %v957_v0, %v693_v37  ;;  %v3859_v29 = vadd.f32 %v954_v44, %v690_v16  ;;  %v3861_v47 = vadd.f32 %v956_v42, %v692_v1  ;;  %2745 = vset.pattern.permute.xlu1 %v5747_v33  ;;  %v5824_v0 = vld [vmem:[#allocation46_spill] sm:$0xff]  ;;  %v5825_v42 = vld [vmem:[#allocation47_spill] sm:$0xff] }
  0xe1   : > { %5815 = vst [vmem:[#allocation116_spill] sm:$0xff] %v3841_v49  ;;  %5816 = vst [vmem:[#allocation117_spill] sm:$0xff] %v3845_v40  ;;  %v919_v40 = vmul.f32 %v3235_v12, %v3851_v10  ;;  %v921_v31 = vmul.f32 %v3246_v27, %v3851_v10  ;;  %v920_v7 = vmul.f32 %v3267_v43, %v3851_v10  ;;  %1611 = vperm.xlu1 %2745, %v3087_v30  }
  0xe2   : > { %5817 = vst [vmem:[#allocation118_spill] sm:$0xff] %v3849_v55  ;;  %5820 = vst [vmem:[#allocation121_spill] sm:$0xff] %v3855_v41  ;;  %v918_v55 = vmul.f32 %v3249_v14, %v3851_v10  ;;  %v3873_v37 = vadd.f32 %v951_v2, %v687_v57  ;;  %v3875_v16 = vadd.f32 %v953_v9, %v689_v48  ;;  %v5831_v2 = vld [vmem:[#allocation53_spill] sm:$0xff]  ;;  %v5832_v9 = vld [vmem:[#allocation54_spill] sm:$0xff] }
  0xe3   : > { %5821 = vst [vmem:[#allocation122_spill] sm:$0xff] %v3857_v52  ;;  %5822 = vst [vmem:[#allocation123_spill] sm:$0xff] %v3859_v29  ;;  %v3877_v1 = vadd.f32 %v950_v8, %v686_v15  ;;  %v3879_v34 = vadd.f32 %v952_v45, %v688_v62  ;;  %v1047_v44 = vadd.f32 %v919_v40, %v5824_v0  ;;  %v3885_v29 = vpop.permute.xlu0 %791  ;;  %v3895_v62 = vpop.permute.xlu1 %1579  ;;  %v5833_v45 = vld [vmem:[#allocation55_spill] sm:$0xff]  ;;  %v5835_v0 = vld [vmem:[#allocation25_spill] sm:$0xff] }
  0xe4   : > { %5823 = vst [vmem:[#allocation124_spill] sm:$0xff] %v3861_v47  ;;  %v1049_v49 = vadd.f32 %v921_v31, %v5825_v42  ;;  %v1046_v47 = vadd.f32 %v918_v55, %v5826_v46  ;;  %v1048_v50 = vadd.f32 %v920_v7, %v5827_v21  ;;  %5828 = vst [vmem:[#allocation46_spill] sm:$0xff] %v3885_v29  ;;  %v5830_v31 = vld [vmem:[#allocation52_spill] sm:$0xff]  ;;  %v5834_v55 = vmov 0   ;;  %v5836_v52 = vld [vmem:[#allocation26_spill] sm:$0xff] }
  0xe5   : > { %v959_v30 = vmul.f32 %v3235_v12, %v3853_v56  ;;  %v961_v57 = vmul.f32 %v3246_v27, %v3853_v56  ;;  %v958_v48 = vmul.f32 %v3249_v14, %v3853_v56  ;;  %v960_v15 = vmul.f32 %v3267_v43, %v3853_v56  ;;  %5829 = vst [vmem:[#allocation47_spill] sm:$0xff] %v3895_v62 }
  0xe6   : > { %v1439_v46 = vadd.f32 %v5830_v31, %v1047_v44  ;;  %v1441_v21 = vadd.f32 %v5831_v2, %v1049_v49  ;;  %v1438_v8 = vadd.f32 %v5832_v9, %v1046_v47  ;;  %v1440_v40 = vadd.f32 %v5833_v45, %v1048_v50  ;;  %2746 = vset.pattern.permute.xlu1 %v5834_v55  ;;  %v5837_v31 = vld [vmem:[#allocation13_spill] sm:$0xff]  ;;  %v5838_v49 = vld [vmem:[#allocation88_spill] sm:$0xff]  ;;  %v5839_v50 = vld [vmem:[#allocation90_spill] sm:$0xff] }
  0xe7   : > { %v935_v7 = vmul.f32 %v3235_v12, %v3885_v29  ;;  %v1727_v42 = vmul.f32 %v5835_v0, %v3895_v62  ;;  %v937_v5 = vmul.f32 %v3246_v27, %v3885_v29  ;;  %v1729_v44 = vmul.f32 %v5836_v52, %v3895_v62  ;;  %362 = vperm.xlu1 %2746, %v5837_v31   ;;  %v5840_v9 = vld [vmem:[#allocation91_spill] sm:$0xff]  ;;  %v3923_v22 = vpop.permute.xlu0 %807 }
  0xe8   : > { %v3912_v47 = vadd.f32 %v5838_v49, %v1439_v46  ;;  %v3915_v2 = vadd.f32 %v5839_v50, %v1441_v21  ;;  %v3918_v45 = vadd.f32 %v5840_v9, %v1438_v8  ;;  %v3921_v41 = vadd.f32 %v5841_v63, %v1440_v40  ;;  %5842 = vst [vmem:[#allocation48_spill] sm:$0xff] %v3923_v22  ;;  %v5844_v21 = vld [vmem:[#allocation67_spill] sm:$0xff]  ;;  %v5853_v50 = vld [vmem:[#allocation78_spill] sm:$0xff] }
  0xe9   : > { %v1063_v3 = vadd.f32 %v935_v7, %v5843_v26  ;;  %v3927_v56 = vadd.f32 %v1727_v42, %v3813_v18  ;;  %v3930_v31 = vadd.f32 %v959_v30, %v3799_v28  ;;  %v3933_v46 = vadd.f32 %v961_v57, %v3802_v59  ;;  %v3945_v26 = vpop.permute.xlu1 %322  ;;  %v5850_v42 = vld [vmem:[#allocation36_spill] sm:$0xff]  ;;  %v5851_v30 = vld [vmem:[#allocation71_spill] sm:$0xff] }
  0xea   : > { %v1065_v49 = vadd.f32 %v937_v5, %v5844_v21  ;;  %v3937_v8 = vadd.f32 %v1729_v44, %v3816_v11  ;;  %v3940_v63 = vadd.f32 %v958_v48, %v3805_v4  ;;  %v3943_v40 = vadd.f32 %v960_v15, %v3808_v13  ;;  %5845 = vst [vmem:[#allocation49_spill] sm:$0xff] %v3945_v26  ;;  %v5847_v4 = vld [vmem:[#allocation27_spill] sm:$0xff]  ;;  %v5848_v48 = vld [vmem:[#allocation28_spill] sm:$0xff] }
  0xeb   : > { %v5846_v5 = vmov 2   ;;  %v934_v11 = vmul.f32 %v3249_v14, %v3885_v29  ;;  %v1726_v57 = vmul.f32 %v5847_v4, %v3895_v62  ;;  %v936_v13 = vmul.f32 %v3267_v43, %v3885_v29  ;;  %v3961_v7 = vpop.permute.xlu0 %823 }
  0xec   : > { %2747 = vset.pattern.permute.xlu1 %v5846_v5  ;;  %v1728_v15 = vmul.f32 %v5848_v48, %v3895_v62  ;;  %5849 = vst [vmem:[#allocation52_spill] sm:$0xff] %v3961_v7  ;;  %v3964_v44 = vadd.f32 %v5850_v42, %v1063_v3  ;;  %v495_v9 = vmul.f32 %v3254_v19, %v3945_v26  ;;  %v5852_v42 = vld [vmem:[#allocation72_spill] sm:$0xff] }
  0xed   : > { %1223 = vperm.xlu1 %2747, %v3584_v35   ;;  %v497_v21 = vmul.f32 %v3261_v39, %v3945_v26  ;;  %v1062_v59 = vadd.f32 %v934_v11, %v5851_v30  ;;  %v3973_v28 = vadd.f32 %v1726_v57, %v3819_v53  ;;  %v967_v18 = vmul.f32 %v3235_v12, %v3923_v22  ;;  %v3984_v29 = vpop.permute.xlu1 %1191  ;;  %v5855_v30 = vld [vmem:[#allocation37_spill] sm:$0xff] }
  0xee   : > { %v969_v3 = vmul.f32 %v3246_v27, %v3923_v22  ;;  %v1064_v61 = vadd.f32 %v936_v13, %v5852_v42  ;;  %v703_v51 = vadd.f32 %v5853_v50, %v495_v9  ;;  %v494_v62 = vmul.f32 %v5763_v24, %v3945_v26  ;;  %5854 = vst [vmem:[#allocation53_spill] sm:$0xff] %v3984_v29  ;;  %v5857_v42 = vld [vmem:[#allocation22_spill] sm:$0xff]  ;;  %v5860_v24 = vld [vmem:[#allocation40_spill] sm:$0xff] }
  0xef   : > { %v705_v36 = vadd.f32 %v5853_v50, %v497_v21  ;;  %v3987_v53 = vadd.f32 %v5855_v30, %v1065_v49  ;;  %v3991_v57 = vadd.f32 %v1728_v15, %v3822_v54  ;;  %v966_v13 = vmul.f32 %v3249_v14, %v3923_v22  ;;  %v3996_v9 = vpop.permute.xlu0 %839  ;;  %v5858_v49 = vld [vmem:[#allocation23_spill] sm:$0xff] }
  0xf0   : > { %5856 = vst [vmem:[#allocation54_spill] sm:$0xff] %v3996_v9  ;;  %v1343_v21 = vmul.f32 %v3272_v17, %v3984_v29  ;;  %v1345_v25 = vmul.f32 %v5857_v42, %v3984_v29  ;;  %v1342_v30 = vmul.f32 %v5858_v49, %v3984_v29  ;;  %v1344_v54 = vmul.f32 %v3283_v20, %v3984_v29  ;;  %v5870_v9 = vld [vmem:[#allocation63_spill] sm:$0xff] }
  0xf1   : > { %1227 = vperm.xlu1 %2747, %v5772_v32   ;;  %v1095_v15 = vadd.f32 %v967_v18, %v703_v51  ;;  %v1097_v11 = vadd.f32 %v969_v3, %v705_v36  ;;  %v702_v6 = vadd.f32 %v5853_v50, %v494_v62  ;;  %v496_v32 = vmul.f32 %v5767_v58, %v3945_v26  ;;  %v4018_v51 = vpop.permute.xlu1 %1195  ;;  %v5871_v26 = vld [vmem:[#allocation64_spill] sm:$0xff] }
  0xf2   : > { %v1454_v10 = vadd.f32 %v5859_v23, %v1062_v59  ;;  %v1456_v39 = vadd.f32 %v5860_v24, %v1064_v61  ;;  %v4016_v19 = vadd.f32 %v1343_v21, %v3873_v37  ;;  %5861 = vst [vmem:[#allocation55_spill] sm:$0xff] %v4018_v51  ;;  %v4021_v36 = vadd.f32 %v1345_v25, %v3875_v16  ;;  %v5862_v24 = vld [vmem:[#allocation41_spill] sm:$0xff]  ;;  %v5863_v37 = vld [vmem:[#allocation42_spill] sm:$0xff] }
  0xf3   : > { %v4024_v62 = vadd.f32 %v1342_v30, %v3877_v1  ;;  %v4027_v18 = vadd.f32 %v1344_v54, %v3879_v34  ;;  %v1094_v3 = vadd.f32 %v966_v13, %v702_v6  ;;  %v1351_v23 = vmul.f32 %v3272_v17, %v4018_v51  ;;  %v4041_v16 = vpop.permute.xlu0 %1571 }
  0xf4   : > { %v4033_v61 = vadd.f32 %v5862_v24, %v1095_v15  ;;  %v4036_v59 = vadd.f32 %v5863_v37, %v1097_v11  ;;  %v4039_v25 = vadd.f32 %v5853_v50, %v496_v32  ;;  %5864 = vst [vmem:[#allocation13_spill] sm:$0xff] %v4041_v16  ;;  %v1353_v6 = vmul.f32 %v5857_v42, %v4018_v51  ;;  %v5869_v37 = vld [vmem:[#allocation62_spill] sm:$0xff] }
  0xf5   : > { %2749 = vset.pattern.permute.xlu1 %v5834_v55  ;;  %v1350_v1 = vmul.f32 %v5858_v49, %v4018_v51  ;;  %v1352_v34 = vmul.f32 %v3283_v20, %v4018_v51  ;;  %v5865_v55 = vld [vmem:[#allocation43_spill] sm:$0xff]  ;;  %v1711_v11 = vmul.f32 %v5835_v0, %v4041_v16  ;;  %v1713_v21 = vmul.f32 %v5836_v52, %v4041_v16  ;;  %v4073_v24 = vpop.permute.xlu1 %611 }
  0xf6   : > { %651 = vperm.xlu1 %2749, %v289_v38   ;;  %v4050_v13 = vadd.f32 %v5865_v55, %v1094_v3  ;;  %v1710_v38 = vmul.f32 %v5847_v4, %v4041_v16  ;;  %v1712_v30 = vmul.f32 %v5848_v48, %v4041_v16  ;;  %v1479_v54 = vadd.f32 %v1351_v23, %v3930_v31  ;;  %v5872_v23 = vld [vmem:[#allocation65_spill] sm:$0xff] }
  0xf7   : > { %v4063_v15 = vmul.f32 %v3267_v43, %v3923_v22  ;;  %v4067_v32 = vmul.f32 %v3235_v12, %v3961_v7  ;;  %v4071_v3 = vmul.f32 %v3246_v27, %v3961_v7  ;;  %5868 = vst [vmem:[#allocation91_spill] sm:$0xff] %v4073_v24  ;;  %v1839_v55 = vadd.f32 %v1711_v11, %v5869_v37  ;;  %v4079_v22 = vpop.permute.xlu0 %1575  ;;  %v5874_v16 = vld [vmem:[#allocation81_spill] sm:$0xff] }
  0xf8   : > { %v1841_v50 = vadd.f32 %v1713_v21, %v5870_v9  ;;  %v1838_v31 = vadd.f32 %v1710_v38, %v5871_v26  ;;  %v1840_v51 = vadd.f32 %v1712_v30, %v5872_v23  ;;  %5873 = vst [vmem:[#allocation92_spill] sm:$0xff] %v4079_v22  ;;  %v1481_v29 = vadd.f32 %v1353_v6, %v3933_v46  ;;  %v4092_v26 = vld [vmem:[%s5464_s1 + $0x78] sm:$0xff] }
  0xf9   : > { %5866 = vst [vmem:[#allocation88_spill] sm:$0xff] %v4067_v32  ;;  %5867 = vst [vmem:[#allocation90_spill] sm:$0xff] %v4071_v3  ;;  %v1478_v32 = vadd.f32 %v1350_v1, %v3940_v63  ;;  %v1480_v3 = vadd.f32 %v1352_v34, %v3943_v40  ;;  %v4087_v7 = vadd.f32 %v4073_v24, %v5874_v16  ;;  %v1967_v9 = vmax.f32 %v1839_v55, 0.0 }
  0xfa   : > { %2751 = vset.pattern.permute.xlu1 %v5811_v60  ;;  %v1969_v11 = vmax.f32 %v1841_v50, 0.0  ;;  %v1966_v60 = vmax.f32 %v1838_v31, 0.0  ;;  %v1968_v21 = vmax.f32 %v1840_v51, 0.0  ;;  %v1719_v46 = vmul.f32 %v5835_v0, %v4079_v22  ;;  %v4113_v31 = vpop.permute.xlu1 %811 }
  0xfb   : > { %843 = vperm.xlu1 %2751, %v4092_v26   ;;  %v1721_v63 = vmul.f32 %v5836_v52, %v4079_v22  ;;  %v1718_v40 = vmul.f32 %v5847_v4, %v4079_v22  ;;  %v1720_v16 = vmul.f32 %v5848_v48, %v4079_v22  ;;  %v5875_v6 = vmax.f32 %v3912_v47, 0.0  ;;  %v4111_v55 = vpop.permute.xlu0 %1587  ;;  %5880 = vst [vmem:[#allocation67_spill] sm:$0xff] %v4113_v31 }
  0xfc   : > { %v5876_v34 = vmax.f32 %v3915_v2, 0.0  ;;  %v5877_v51 = vmax.f32 %v3918_v45, 0.0  ;;  %v5878_v30 = vmax.f32 %v3921_v41, 0.0  ;;  %5879 = vst [vmem:[#allocation66_spill] sm:$0xff] %v4111_v55  ;;  %v1847_v23 = vadd.f32 %v1719_v46, %v3964_v44 }
  0xfd   : > { %v2508_v1 = vpack.c.bf16 %v1967_v9, %v5875_v6  ;;  %v1849_v22 = vadd.f32 %v1721_v63, %v3987_v53  ;;  %v1846_v20 = vadd.f32 %v1718_v40, %v1454_v10  ;;  %v1848_v47 = vadd.f32 %v1720_v16, %v1456_v39 }
  0xfe   : > { %v2540_v50 = vpack.c.bf16 %v1969_v11, %v5876_v34  ;;  %v2510_v38 = vpack.c.bf16 %v1966_v60, %v5877_v51  ;;  %v2542_v37 = vpack.c.bf16 %v1968_v21, %v5878_v30  ;;  %v1984_v2 = vmax.f32 %v3991_v57, 0.0  ;;  %v5881_v60 = vld [vmem:[#allocation82_spill] sm:$0xff]  ;;  %v5888_v51 = vld [vmem:[#allocation21_spill] sm:$0xff] }
  0xff   : > { %2752 = vset.pattern.permute.xlu1 %v5747_v33  ;;  %2509 = vmatprep.subr.bf16.mxu0 %v2508_v1  ;;  %v1743_v45 = vmul.f32 %v5835_v0, %v4111_v55  ;;  %v1745_v41 = vmul.f32 %v5836_v52, %v4111_v55  ;;  %v1742_v9 = vmul.f32 %v5847_v4, %v4111_v55  ;;  %v1975_v44 = vmax.f32 %v1847_v23, 0.0  ;;  %v4128_v46 = vpop.permute.xlu0 %1591  ;;  %v4136_v1 = vpop.permute.xlu1 %1583 }
 0x100   : > { %2541 = vmatprep.subr.bf16.mxu1 %v2540_v50  ;;  %1615 = vperm.xlu1 %2752, %v3584_v35   ;;  %v1977_v10 = vmax.f32 %v1849_v22, 0.0  ;;  %v1974_v39 = vmax.f32 %v1846_v20, 0.0  ;;  %v1976_v53 = vmax.f32 %v1848_v47, 0.0  ;;  %v713_v21 = vadd.f32 %v4073_v24, %v5881_v60  ;;  %5882 = vst [vmem:[#allocation28_spill] sm:$0xff] %v4128_v46  ;;  %5886 = vst [vmem:[#allocation36_spill] sm:$0xff] %v4136_v1  ;;  %v2757_v47 = vld [vmem:[%s5464_s1 + $0x70] sm:$0xff] }
 0x101   : > { %2511 = vmatpush1.bf16.msra.mxu0 %v2510_v38  ;;  %2543 = vmatpush1.bf16.msra.mxu1 %v2542_v37  ;;  %v1871_v11 = vadd.f32 %v1743_v45, %v1479_v54  ;;  %v1873_v57 = vadd.f32 %v1745_v41, %v1481_v29  ;;  %v5883_v63 = vmax.f32 %v3927_v56, 0.0  ;;  %v5884_v16 = vmax.f32 %v3937_v8, 0.0  ;;  %v5887_v54 = vld [vmem:[#allocation86_spill] sm:$0xff] }
 0x102   : > { %v5885_v35 = vmax.f32 %v3973_v28, 0.0  ;;  %v2546_v20 = vpack.c.bf16 %v1984_v2, %v1976_v53  ;;  %v1870_v34 = vadd.f32 %v1742_v9, %v1478_v32  ;;  %v1744_v29 = vmul.f32 %v5848_v48, %v4111_v55  ;;  %v5932_v55 = vld [vmem:[#allocation68_spill] sm:$0xff] }
 0x103   : > { %v2512_v40 = vpack.c.bf16 %v5883_v63, %v1975_v44  ;;  %v2544_v6 = vpack.c.bf16 %v5884_v16, %v1977_v10  ;;  %v710_v50 = vadd.f32 %v4073_v24, %v5887_v54  ;;  %v712_v56 = vadd.f32 %v4073_v24, %v5888_v51  ;;  %v4161_v9 = vpop.permute.xlu0 %1603  ;;  %v4166_v53 = vpop.permute.xlu1 %332 }
 0x104   : > { %v2514_v22 = vpack.c.bf16 %v5885_v35, %v1974_v39  ;;  %v1735_v8 = vmul.f32 %v5835_v0, %v4136_v1  ;;  %v1737_v28 = vmul.f32 %v5836_v52, %v4136_v1  ;;  %v1734_v32 = vmul.f32 %v5847_v4, %v4136_v1  ;;  %2753 = vset.pattern.permute.xlu1 %v5846_v5 }
 0x105   : > { %2513 = vmatprep.subr.bf16.mxu0 %v2512_v40  ;;  %2545 = vmatprep.subr.bf16.mxu1 %v2544_v6  ;;  %v1999_v38 = vmax.f32 %v1871_v11, 0.0  ;;  %v1736_v30 = vmul.f32 %v5848_v48, %v4136_v1  ;;  %v1872_v37 = vadd.f32 %v1744_v29, %v1480_v3  ;;  %v975_v23 = vmul.f32 %v3235_v12, %v4113_v31 }
 0x106   : > { %2515 = vmatpush1.bf16.msra.mxu0 %v2514_v22  ;;  %2547 = vmatpush1.bf16.msra.mxu1 %v2546_v20  ;;  %v1863_v2 = vadd.f32 %v1735_v8, %v4016_v19  ;;  %v1865_v45 = vadd.f32 %v1737_v28, %v4021_v36  ;;  %v2001_v5 = vmax.f32 %v1873_v57, 0.0  ;;  %v1862_v41 = vadd.f32 %v1734_v32, %v4024_v62  ;;  %v5893_v28 = vld [vmem:[#allocation16_spill] sm:$0xff] }
 0x107   : > { %1231 = vperm.xlu1 %2753, %v2757_v47   ;;  %5889 = vst [vmem:[#allocation71_spill] sm:$0xff] %v4161_v9  ;;  %v1998_v44 = vmax.f32 %v1870_v34, 0.0  ;;  %v1864_v3 = vadd.f32 %v1736_v30, %v4027_v18  ;;  %v2000_v10 = vmax.f32 %v1872_v37, 0.0  ;;  %v1751_v39 = vmul.f32 %v5835_v0, %v4128_v46  ;;  %5890 = vst [vmem:[#allocation72_spill] sm:$0xff] %v4166_v53  ;;  %v4182_v29 = vpop.permute.xlu0 %1607  ;;  %v4184_v54 = vpop.permute.xlu1 %337  ;;  %v5896_v47 = vld [vmem:[#allocation85_spill] sm:$0xff] }
 0x108   : > { %v1991_v11 = vmax.f32 %v1863_v2, 0.0  ;;  %v1993_v60 = vmax.f32 %v1865_v45, 0.0  ;;  %v1990_v63 = vmax.f32 %v1862_v41, 0.0  ;;  %v977_v19 = vmul.f32 %v3246_v27, %v4113_v31  ;;  %5891 = vst [vmem:[#allocation37_spill] sm:$0xff] %v4182_v29  ;;  %5892 = vst [vmem:[#allocation22_spill] sm:$0xff] %v4184_v54  ;;  %v5897_v45 = vld [vmem:[#allocation17_spill] sm:$0xff] }
 0x109   : > { %v1992_v36 = vmax.f32 %v1864_v3, 0.0  ;;  %v4171_v62 = vadd.f32 %v1751_v39, %v4033_v61  ;;  %v1753_v57 = vmul.f32 %v5836_v52, %v4128_v46  ;;  %v974_v18 = vmul.f32 %v3249_v14, %v4113_v31 }
 0x10a   : > { %v2516_v40 = vpack.c.bf16 %v1999_v38, %v1991_v11  ;;  %v2548_v16 = vpack.c.bf16 %v2001_v5, %v1993_v60  ;;  %v2518_v6 = vpack.c.bf16 %v1998_v44, %v1990_v63  ;;  %v1103_v35 = vadd.f32 %v975_v23, %v4087_v7 }
 0x10b   : > { %1235 = vperm.xlu1 %2753, %v4092_v26   ;;  %v2550_v22 = vpack.c.bf16 %v2000_v10, %v1992_v36  ;;  %v1105_v20 = vadd.f32 %v977_v19, %v713_v21  ;;  %v4180_v34 = vadd.f32 %v1753_v57, %v4036_v59  ;;  %v1102_v61 = vadd.f32 %v974_v18, %v710_v50  ;;  %v4230_v39 = vpop.permute.xlu1 %1203 }
 0x10c   : > { %2517 = vmatprep.subr.bf16.mxu0 %v2516_v40  ;;  %2549 = vmatprep.subr.bf16.mxu1 %v2548_v16  ;;  %v1750_v8 = vmul.f32 %v5847_v4, %v4128_v46  ;;  %v976_v7 = vmul.f32 %v3267_v43, %v4113_v31  ;;  %v1096_v21 = vadd.f32 %v4063_v15, %v4039_v25  ;;  %v5894_v25 = vld [vmem:[#allocation44_spill] sm:$0xff]  ;;  %v5931_v31 = vld [vmem:[#allocation50_spill] sm:$0xff] }
 0x10d   : > { %2519 = vmatpush1.bf16.msra.mxu0 %v2518_v6  ;;  %2551 = vmatpush1.bf16.msra.mxu1 %v2550_v22  ;;  %v1752_v50 = vmul.f32 %v5848_v48, %v4128_v46  ;;  %v511_v32 = vmul.f32 %v5893_v28, %v4166_v53  ;;  %v519_v38 = vmul.f32 %v5893_v28, %v4184_v54  ;;  %v5903_v40 = vld [vmem:[#allocation24_spill] sm:$0xff] }
 0x10e   : > { %v4202_v30 = vadd.f32 %v1750_v8, %v4050_v13  ;;  %v1104_v37 = vadd.f32 %v976_v7, %v712_v56  ;;  %v1488_v15 = vadd.f32 %v5894_v25, %v1096_v21  ;;  %v4207_v23 = vmul.f32 %v5835_v0, %v4161_v9  ;;  %v4221_v56 = vpop.permute.xlu0 %1619  ;;  %5901 = vst [vmem:[#allocation41_spill] sm:$0xff] %v4230_v39 }
 0x10f   : > { %2754 = vset.pattern.permute.xlu1 %v5747_v33  ;;  %v4211_v2 = vadd.f32 %v5896_v47, %v519_v38  ;;  %v513_v5 = vmul.f32 %v5897_v45, %v4166_v53  ;;  %v521_v33 = vmul.f32 %v5897_v45, %v4184_v54  ;;  %v4219_v13 = vmul.f32 %v5836_v52, %v4161_v9 }
 0x110   : > { %5895 = vst [vmem:[#allocation23_spill] sm:$0xff] %v4207_v23  ;;  %1627 = vperm.xlu1 %2754, %v4092_v26   ;;  %5899 = vst [vmem:[#allocation40_spill] sm:$0xff] %v4221_v56  ;;  %v4224_v44 = vadd.f32 %v1752_v50, %v1488_v15  ;;  %v5900_v26 = vld [vmem:[#allocation18_spill] sm:$0xff]  ;;  %v4237_v60 = vmul.f32 %v5847_v4, %v4161_v9  ;;  %v512_v63 = vmul.f32 %v5767_v58, %v4166_v53 }
 0x111   : > { %5898 = vst [vmem:[#allocation38_spill] sm:$0xff] %v4219_v13  ;;  %v510_v3 = vmul.f32 %v5900_v26, %v4166_v53  ;;  %v518_v10 = vmul.f32 %v5900_v26, %v4184_v54  ;;  %v4233_v11 = vadd.f32 %v5896_v47, %v521_v33  ;;  %v520_v19 = vmul.f32 %v5767_v58, %v4184_v54  ;;  %v5924_v54 = vld [vmem:[#allocation5_spill] sm:$0xff] }
 0x112   : > { %5902 = vst [vmem:[#allocation42_spill] sm:$0xff] %v4237_v60  ;;  %v1367_v36 = vmul.f32 %v3272_v17, %v4230_v39  ;;  %v1369_v57 = vmul.f32 %v5857_v42, %v4230_v39  ;;  %v1366_v18 = vmul.f32 %v5858_v49, %v4230_v39  ;;  %v1368_v16 = vmul.f32 %v5903_v40, %v4230_v39 }
 0x113   : > { %v4253_v22 = vadd.f32 %v5896_v47, %v518_v10  ;;  %v4256_v8 = vadd.f32 %v5896_v47, %v520_v19  ;;  %v4260_v7 = vmul.f32 %v5848_v48, %v4161_v9  ;;  %v4272_v15 = vmul.f32 %v5835_v0, %v4182_v29  ;;  %v5905_v10 = vld [vmem:[#allocation52_spill] sm:$0xff] }
 0x114   : > { %v4262_v21 = vadd.f32 %v1367_v36, %v1103_v35  ;;  %v4264_v50 = vadd.f32 %v1369_v57, %v1105_v20  ;;  %v4266_v38 = vadd.f32 %v1366_v18, %v1102_v61  ;;  %v4268_v25 = vadd.f32 %v1368_v16, %v1104_v37  ;;  %v4286_v20 = vpop.permute.xlu0 %1623  ;;  %v4288_v61 = vpop.permute.xlu1 %616 }
 0x115   : > { %5904 = vst [vmem:[#allocation43_spill] sm:$0xff] %v4260_v7  ;;  %v4276_v33 = vmul.f32 %v5836_v52, %v4182_v29  ;;  %v4280_v19 = vmul.f32 %v3249_v14, %v5905_v10  ;;  %v4284_v35 = vmul.f32 %v5847_v4, %v4182_v29  ;;  %5907 = vst [vmem:[#allocation63_spill] sm:$0xff] %v4286_v20  ;;  %v5602_v39 = vmov 0.0  }
 0x116   : > { %5908 = vst [vmem:[#allocation64_spill] sm:$0xff] %v4288_v61  ;;  %v4292_v37 = vmul.f32 %v3267_v43, %v5905_v10  ;;  %v4296_v36 = vmul.f32 %v5848_v48, %v4182_v29  ;;  %v4300_v57 = vmul.f32 %v5835_v0, %v4221_v56  ;;  %v4304_v18 = vmul.f32 %v5836_v52, %v4221_v56  ;;  %v5914_v10 = vld [vmem:[#allocation54_spill] sm:$0xff] }
 0x117   : > { %5906 = vst [vmem:[#allocation62_spill] sm:$0xff] %v4284_v35  ;;  %v719_v16 = vadd.f32 %v4288_v61, %v511_v32  ;;  %v721_v6 = vadd.f32 %v4288_v61, %v513_v5  ;;  %v718_v41 = vadd.f32 %v4288_v61, %v510_v3  ;;  %v720_v59 = vadd.f32 %v4288_v61, %v512_v63  ;;  %v5923_v61 = vld [vmem:[#allocation119_spill] sm:$0xff]  ;;  %v5936_v35 = vld [vmem:[#allocation56_spill] sm:$0xff] }
 0x118   : > { %5909 = vst [vmem:[#allocation65_spill] sm:$0xff] %v4296_v36  ;;  %5910 = vst [vmem:[#allocation81_spill] sm:$0xff] %v4300_v57  ;;  %v4312_v51 = vmul.f32 %v5847_v4, %v4221_v56  ;;  %v4316_v29 = vmul.f32 %v5848_v48, %v4221_v56  ;;  %v4320_v9 = vmul.f32 %v3235_v12, %v5914_v10  ;;  %v5928_v57 = vld [vmem:[#allocation7_spill] sm:$0xff]  ;;  %2157 = vmatprep.mubr.f32.mxu0 %v5602_v39 }
 0x119   : > { %5911 = vst [vmem:[#allocation82_spill] sm:$0xff] %v4304_v18  ;;  %v4324_v32 = vmul.f32 %v5835_v0, %v4286_v20  ;;  %v4328_v5 = vmul.f32 %v3246_v27, %v5914_v10  ;;  %v4332_v3 = vmul.f32 %v5836_v52, %v4286_v20  ;;  %v4336_v63 = vmul.f32 %v3249_v14, %v5914_v10  ;;  %v4354_v18 = vpop.permute.xlu1 %815 }
 0x11a   : > { %5912 = vst [vmem:[#allocation86_spill] sm:$0xff] %v4312_v51  ;;  %5913 = vst [vmem:[#allocation21_spill] sm:$0xff] %v4316_v29  ;;  %v4340_v56 = vmul.f32 %v5847_v4, %v4286_v20  ;;  %v4344_v47 = vmul.f32 %v3267_v43, %v5914_v10  ;;  %v923_v53 = vmul.f32 %v5924_v54, %v5923_v61  ;;  %v5926_v29 = vld [vmem:[#allocation32_spill] sm:$0xff]  ;;  %2228 = vmatprep.mubr.f32.mxu1 %v5602_v39  ;;  %v5947_v39 = vld [vmem:[#allocation46_spill] sm:$0xff] }
 0x11b   : > { %5915 = vst [vmem:[#allocation16_spill] sm:$0xff] %v4320_v9  ;;  %5916 = vst [vmem:[#allocation44_spill] sm:$0xff] %v4324_v32  ;;  %v4348_v32 = vmul.f32 %v5848_v48, %v4286_v20  ;;  %v5930_v10 = vld [vmem:[#allocation8_spill] sm:$0xff]  ;;  %v983_v20 = vmul.f32 %v3235_v12, %v4354_v18  ;;  %v982_v9 = vmul.f32 %v3249_v14, %v4354_v18 }
 0x11c   : > { %5917 = vst [vmem:[#allocation17_spill] sm:$0xff] %v4328_v5  ;;  %5918 = vst [vmem:[#allocation18_spill] sm:$0xff] %v4332_v3  ;;  %v5925_v3 = vld [vmem:[#allocation13_spill] sm:$0xff]  ;;  %v984_v46 = vmul.f32 %v3267_v43, %v4354_v18  ;;  %v1051_v24 = vadd.f32 %v923_v53, %v5931_v31 }
 0x11d   : > { %5919 = vst [vmem:[#allocation24_spill] sm:$0xff] %v4336_v63  ;;  %5920 = vst [vmem:[#allocation125_spill] sm:$0xff] %v4340_v56  ;;  %v1715_v51 = vmul.f32 %v5926_v29, %v5925_v3  ;;  %v925_v63 = vmul.f32 %v5928_v57, %v5923_v61  ;;  %v5929_v56 = vld [vmem:[#allocation33_spill] sm:$0xff]  ;;  %v4376_v60 = vadd.f32 %v983_v20, %v719_v16  ;;  %v4384_v36 = vpop.permute.xlu1 %819 }
 0x11e   : > { %5921 = vst [vmem:[#allocation126_spill] sm:$0xff] %v4344_v47  ;;  %5922 = vst [vmem:[#allocation127_spill] sm:$0xff] %v4348_v32  ;;  %v1717_v5 = vmul.f32 %v5929_v56, %v5925_v3  ;;  %v922_v47 = vmul.f32 %v5930_v10, %v5923_v61  ;;  %v985_v32 = vmul.f32 %v3246_v27, %v4354_v18  ;;  %v5933_v10 = vld [vmem:[#allocation51_spill] sm:$0xff]  ;;  %v5934_v57 = vld [vmem:[#allocation69_spill] sm:$0xff] }
 0x11f   : > { %5927 = vst [vmem:[#allocation119_spill] sm:$0xff] %v4354_v18  ;;  %v1843_v1 = vadd.f32 %v1715_v51, %v5932_v55  ;;  %v1053_v56 = vadd.f32 %v925_v63, %v5933_v10  ;;  %v4380_v23 = vadd.f32 %v982_v9, %v718_v41  ;;  %v4382_v18 = vadd.f32 %v984_v46, %v720_v59  ;;  %v5937_v55 = vld [vmem:[#allocation73_spill] sm:$0xff]  ;;  %v5938_v59 = vld [vmem:[#allocation83_spill] sm:$0xff] }
 0x120   : > { %v1845_v7 = vadd.f32 %v1717_v5, %v5934_v57  ;;  %v4378_v13 = vadd.f32 %v985_v32, %v721_v6  ;;  %5935 = vst [vmem:[#allocation13_spill] sm:$0xff] %v4384_v36  ;;  %v1443_v31 = vadd.f32 %v5936_v35, %v1051_v24  ;;  %v991_v57 = vmul.f32 %v3235_v12, %v4384_v36  ;;  %v5939_v6 = vld [vmem:[#allocation93_spill] sm:$0xff] }
 0x121   : > { %v1971_v53 = vmax.f32 %v1843_v1, 0.0  ;;  %v1445_v51 = vadd.f32 %v5937_v55, %v1053_v56  ;;  %v993_v20 = vmul.f32 %v3246_v27, %v4384_v36  ;;  %v990_v9 = vmul.f32 %v3249_v14, %v4384_v36  ;;  %v5940_v1 = vld [vmem:[#allocation74_spill] sm:$0xff] }
 0x122   : > { %v1973_v10 = vmax.f32 %v1845_v7, 0.0  ;;  %v992_v46 = vmul.f32 %v3267_v43, %v4384_v36  ;;  %v1835_v41 = vadd.f32 %v5938_v59, %v1443_v31  ;;  %v1050_v35 = vadd.f32 %v922_v47, %v5940_v1  ;;  %v5941_v56 = vld [vmem:[#allocation34_spill] sm:$0xff]  ;;  %v5943_v47 = vld [vmem:[#allocation84_spill] sm:$0xff]  ;;  %v4415_v1 = vpop.permute.xlu1 %1595  ;;  %v5953_v43 = vld [vmem:[#allocation87_spill] sm:$0xff] }
 0x123   : > { %v1837_v24 = vadd.f32 %v5939_v6, %v1445_v51  ;;  %v1714_v7 = vmul.f32 %v5941_v56, %v5925_v3  ;;  %v4402_v16 = vadd.f32 %v991_v57, %v4211_v2  ;;  %v4405_v32 = vadd.f32 %v993_v20, %v4233_v11  ;;  %v5942_v51 = vld [vmem:[#allocation75_spill] sm:$0xff]  ;;  %5944 = vst [vmem:[#allocation50_spill] sm:$0xff] %v4415_v1 }
 0x124   : > { %v4408_v5 = vadd.f32 %v990_v9, %v4253_v22  ;;  %v4411_v63 = vadd.f32 %v992_v46, %v4256_v8  ;;  %v1963_v31 = vmax.f32 %v1835_v41, 0.0  ;;  %v1442_v59 = vadd.f32 %v5942_v51, %v1050_v35  ;;  %v5945_v2 = vld [vmem:[#allocation11_spill] sm:$0xff]  ;;  %v5948_v9 = vld [vmem:[#allocation92_spill] sm:$0xff] }
 0x125   : > { %v1965_v55 = vmax.f32 %v1837_v24, 0.0  ;;  %v1842_v6 = vadd.f32 %v1714_v7, %v5943_v47  ;;  %v924_v57 = vmul.f32 %v5945_v2, %v5923_v61  ;;  %v5946_v11 = vld [vmem:[#allocation39_spill] sm:$0xff]  ;;  %v939_v22 = vmul.f32 %v5924_v54, %v5947_v39  ;;  %v5951_v7 = vld [vmem:[#allocation94_spill] sm:$0xff] }
 0x126   : > { %v1716_v20 = vmul.f32 %v5946_v11, %v5925_v3  ;;  %v4425_v8 = vmul.f32 %v5926_v29, %v5948_v9  ;;  %v1759_v46 = vmul.f32 %v5835_v0, %v4415_v1  ;;  %v1761_v41 = vmul.f32 %v5836_v52, %v4415_v1 }
 0x127   : > { %v1758_v24 = vmul.f32 %v5847_v4, %v4415_v1  ;;  %v1760_v61 = vmul.f32 %v5848_v48, %v4415_v1  ;;  %v4435_v3 = vpack.c.bf16 %v1971_v53, %v1963_v31  ;;  %v4437_v35 = vpack.c.bf16 %v1973_v10, %v1965_v55  ;;  %v5952_v4 = vld [vmem:[#allocation76_spill] sm:$0xff]  ;;  %v5954_v53 = vld [vmem:[#allocation79_spill] sm:$0xff]  ;;  %v4449_v31 = vpop.permute.xlu1 %342 }
 0x128   : > { %v1834_v51 = vadd.f32 %v5951_v7, %v1442_v59  ;;  %v1970_v47 = vmax.f32 %v1842_v6, 0.0  ;;  %v1887_v36 = vadd.f32 %v1759_v46, %v4262_v21  ;;  %v1889_v54 = vadd.f32 %v1761_v41, %v4264_v50  ;;  %5955 = vst [vmem:[#allocation69_spill] sm:$0xff] %v4449_v31  ;;  %v5960_v46 = vld [vmem:[#allocation97_spill] sm:$0xff] }
 0x129   : > { %5949 = vst [vmem:[#allocation68_spill] sm:$0xff] %v4435_v3  ;;  %5950 = vst [vmem:[#allocation51_spill] sm:$0xff] %v4437_v35  ;;  %v1886_v0 = vadd.f32 %v1758_v24, %v4266_v38  ;;  %v1888_v52 = vadd.f32 %v1760_v61, %v4268_v25  ;;  %v1052_v2 = vadd.f32 %v924_v57, %v5952_v4  ;;  %v5956_v25 = vmax.f32 %v4171_v62, 0.0 }
 0x12a   : > { %v1962_v11 = vmax.f32 %v1834_v51, 0.0  ;;  %v4446_v1 = vadd.f32 %v1716_v20, %v5953_v43  ;;  %v1067_v10 = vadd.f32 %v939_v22, %v5954_v53  ;;  %v2015_v55 = vmax.f32 %v1887_v36, 0.0  ;;  %v5963_v53 = vld [vmem:[#allocation80_spill] sm:$0xff] }
 0x12b   : > { %v2017_v59 = vmax.f32 %v1889_v54, 0.0  ;;  %v2014_v6 = vmax.f32 %v1886_v0, 0.0  ;;  %v2016_v21 = vmax.f32 %v1888_v52, 0.0  ;;  %v527_v50 = vmul.f32 %v5893_v28, %v4449_v31 }
 0x12c   : > { %v529_v38 = vmul.f32 %v5897_v45, %v4449_v31  ;;  %v526_v4 = vmul.f32 %v5900_v26, %v4449_v31  ;;  %v528_v43 = vmul.f32 %v5767_v58, %v4449_v31  ;;  %v2520_v57 = vpack.c.bf16 %v2015_v55, %v5956_v25  ;;  %v4475_v55 = vpop.permute.xlu1 %1207 }
 0x12d   : > { %v5957_v36 = vmax.f32 %v4180_v34, 0.0  ;;  %v5958_v52 = vmax.f32 %v4202_v30, 0.0  ;;  %v5959_v20 = vmax.f32 %v4224_v44, 0.0  ;;  %v735_v41 = vadd.f32 %v5960_v46, %v527_v50  ;;  %v5962_v34 = vld [vmem:[#allocation77_spill] sm:$0xff]  ;;  %5964 = vst [vmem:[#allocation73_spill] sm:$0xff] %v4475_v55  ;;  %v5965_v44 = vld [vmem:[#allocation88_spill] sm:$0xff] }
 0x12e   : > { %v737_v24 = vadd.f32 %v5960_v46, %v529_v38  ;;  %v734_v61 = vadd.f32 %v5960_v46, %v526_v4  ;;  %v736_v7 = vadd.f32 %v5960_v46, %v528_v43  ;;  %2521 = vmatprep.subr.bf16.mxu0 %v2520_v57  ;;  %v4471_v62 = vpack.c.bf16 %v1970_v47, %v1962_v11  ;;  %v5968_v43 = vld [vmem:[#allocation59_spill] sm:$0xff]  ;;  %v5969_v57 = vld [vmem:[#allocation60_spill] sm:$0xff] }
 0x12f   : > { %v2552_v54 = vpack.c.bf16 %v2017_v59, %v5957_v36  ;;  %v2522_v0 = vpack.c.bf16 %v2014_v6, %v5958_v52  ;;  %v2554_v22 = vpack.c.bf16 %v2016_v21, %v5959_v20  ;;  %v1444_v51 = vadd.f32 %v5962_v34, %v1052_v2  ;;  %v5966_v6 = vld [vmem:[#allocation90_spill] sm:$0xff] }
 0x130   : > { %5961 = vst [vmem:[#allocation56_spill] sm:$0xff] %v4471_v62  ;;  %v1459_v30 = vadd.f32 %v5963_v53, %v1067_v10  ;;  %v1127_v59 = vadd.f32 %v5965_v44, %v735_v41  ;;  %v1129_v21 = vadd.f32 %v5966_v6, %v737_v24  ;;  %v1126_v50 = vadd.f32 %v4280_v19, %v734_v61  ;;  %v5967_v10 = vld [vmem:[#allocation58_spill] sm:$0xff]  ;;  %v5976_v44 = vld [vmem:[#allocation65_spill] sm:$0xff] }
 0x131   : > { %2553 = vmatprep.subr.bf16.mxu1 %v2552_v54  ;;  %2523 = vmatpush1.bf16.msra.mxu0 %v2522_v0  ;;  %v1375_v38 = vmul.f32 %v3272_v17, %v4475_v55  ;;  %v1377_v11 = vmul.f32 %v5857_v42, %v4475_v55  ;;  %v1374_v2 = vmul.f32 %v5858_v49, %v4475_v55  ;;  %v1972_v20 = vmax.f32 %v4446_v1, 0.0 }
 0x132   : > { %2555 = vmatpush1.bf16.msra.mxu1 %v2554_v22  ;;  %v1376_v47 = vmul.f32 %v5903_v40, %v4475_v55  ;;  %v1519_v4 = vadd.f32 %v5967_v10, %v1127_v59  ;;  %v1521_v25 = vadd.f32 %v5968_v43, %v1129_v21  ;;  %v1518_v36 = vadd.f32 %v5969_v57, %v1126_v50  ;;  %v4502_v22 = vpop.permute.xlu1 %1211 }
 0x133   : > { %v1128_v19 = vadd.f32 %v4292_v37, %v736_v7  ;;  %v4493_v54 = vadd.f32 %v1375_v38, %v4376_v60  ;;  %v4496_v52 = vadd.f32 %v1377_v11, %v4378_v13  ;;  %v4499_v0 = vadd.f32 %v1374_v2, %v4380_v23  ;;  %5970 = vst [vmem:[#allocation83_spill] sm:$0xff] %v4502_v22  ;;  %v5973_v37 = vld [vmem:[#allocation62_spill] sm:$0xff]  ;;  %v5975_v60 = vld [vmem:[#allocation61_spill] sm:$0xff]  ;;  %v5978_v2 = vld [vmem:[#allocation95_spill] sm:$0xff] }
 0x134   : > { %v4505_v41 = vadd.f32 %v4272_v15, %v1519_v4  ;;  %v4508_v24 = vadd.f32 %v4276_v33, %v1521_v25  ;;  %v4511_v61 = vadd.f32 %v5973_v37, %v1518_v36  ;;  %v1383_v13 = vmul.f32 %v3272_v17, %v4502_v22  ;;  %v5981_v25 = vld [vmem:[#allocation23_spill] sm:$0xff] }
 0x135   : > { %v1520_v7 = vadd.f32 %v5975_v60, %v1128_v19  ;;  %v1385_v23 = vmul.f32 %v5857_v42, %v4502_v22  ;;  %v1382_v1 = vmul.f32 %v5858_v49, %v4502_v22  ;;  %v1384_v15 = vmul.f32 %v5903_v40, %v4502_v22  ;;  %v5986_v60 = vld [vmem:[#allocation101_spill] sm:$0xff] }
 0x136   : > { %5971 = vst [vmem:[#allocation93_spill] sm:$0xff] %v4505_v41  ;;  %5972 = vst [vmem:[#allocation74_spill] sm:$0xff] %v4508_v24  ;;  %v4523_v33 = vadd.f32 %v1376_v47, %v4382_v18  ;;  %v1511_v6 = vadd.f32 %v1383_v13, %v4402_v16  ;;  %v1836_v18 = vadd.f32 %v5978_v2, %v1444_v51  ;;  %v5979_v47 = vld [vmem:[#allocation47_spill] sm:$0xff]  ;;  %v4539_v43 = vpop.permute.xlu1 %631  ;;  %v5982_v16 = vld [vmem:[#allocation38_spill] sm:$0xff] }
 0x137   : > { %5974 = vst [vmem:[#allocation75_spill] sm:$0xff] %v4511_v61  ;;  %v4528_v59 = vadd.f32 %v5976_v44, %v1520_v7  ;;  %v1513_v21 = vadd.f32 %v1385_v23, %v4405_v32  ;;  %v1510_v50 = vadd.f32 %v1382_v1, %v4408_v5  ;;  %v1512_v38 = vadd.f32 %v1384_v15, %v4411_v63  ;;  %v5983_v5 = vld [vmem:[#allocation42_spill] sm:$0xff]  ;;  %v5984_v63 = vld [vmem:[#allocation43_spill] sm:$0xff]  ;;  %v6000_v23 = vld [vmem:[#allocation89_spill] sm:$0xff] }
 0x138   : > { %v1731_v10 = vmul.f32 %v5926_v29, %v5979_v47  ;;  %v1851_v4 = vadd.f32 %v4425_v8, %v1459_v30  ;;  %5980 = vst [vmem:[#allocation46_spill] sm:$0xff] %v4539_v43  ;;  %v4542_v57 = vadd.f32 %v5981_v25, %v1511_v6  ;;  %v5985_v51 = vld [vmem:[#allocation99_spill] sm:$0xff]  ;;  %v745_v8 = vadd.f32 %v4539_v43, %v5986_v60  ;;  %v5987_v30 = vld [vmem:[#allocation102_spill] sm:$0xff]  ;;  %v6013_v61 = vld [vmem:[#allocation113_spill] sm:$0xff] }
 0x139   : > { %5977 = vst [vmem:[#allocation84_spill] sm:$0xff] %v4528_v59  ;;  %v4545_v32 = vadd.f32 %v5982_v16, %v1513_v21  ;;  %v4548_v36 = vadd.f32 %v5983_v5, %v1510_v50  ;;  %v4551_v19 = vadd.f32 %v5984_v63, %v1512_v38  ;;  %v743_v37 = vadd.f32 %v4539_v43, %v5985_v51  ;;  %v5988_v44 = vld [vmem:[#allocation103_spill] sm:$0xff]  ;;  %v5989_v50 = vld [vmem:[#allocation105_spill] sm:$0xff] }
 0x13a   : > { %v742_v7 = vadd.f32 %v4539_v43, %v5987_v30  ;;  %v744_v6 = vadd.f32 %v4539_v43, %v5988_v44  ;;  %v1964_v21 = vmax.f32 %v1836_v18, 0.0  ;;  %v1859_v38 = vadd.f32 %v1731_v10, %v5989_v50  ;;  %v5990_v25 = vld [vmem:[#allocation7_spill] sm:$0xff]  ;;  %v5991_v63 = vld [vmem:[#allocation33_spill] sm:$0xff]  ;;  %v5992_v30 = vld [vmem:[#allocation8_spill] sm:$0xff]  ;;  %v4575_v11 = vpop.permute.xlu1 %827 }
 0x13b   : > { %v1979_v2 = vmax.f32 %v1851_v4, 0.0  ;;  %v941_v16 = vmul.f32 %v5990_v25, %v5947_v39  ;;  %v2032_v5 = vmax.f32 %v4551_v19, 0.0  ;;  %v1725_v51 = vmul.f32 %v5991_v63, %v5948_v9  ;;  %5993 = vst [vmem:[#allocation92_spill] sm:$0xff] %v4575_v11  ;;  %v5995_v4 = vld [vmem:[#allocation45_spill] sm:$0xff]  ;;  %v5996_v15 = vld [vmem:[#allocation19_spill] sm:$0xff] }
 0x13c   : > { %v1733_v60 = vmul.f32 %v5991_v63, %v5979_v47  ;;  %v938_v13 = vmul.f32 %v5992_v30, %v5947_v39  ;;  %v4577_v18 = vpack.c.bf16 %v1972_v20, %v1964_v21  ;;  %v1987_v10 = vmax.f32 %v1859_v38, 0.0  ;;  %v5998_v21 = vld [vmem:[#allocation96_spill] sm:$0xff] }
 0x13d   : > { %v1069_v44 = vadd.f32 %v941_v16, %v5995_v4  ;;  %v1730_v50 = vmul.f32 %v5941_v56, %v5979_v47  ;;  %v1007_v19 = vmul.f32 %v3235_v12, %v4575_v11  ;;  %v1009_v53 = vmul.f32 %v3246_v27, %v4575_v11  ;;  %v5999_v16 = vld [vmem:[#allocation106_spill] sm:$0xff] }
 0x13e   : > { %5994 = vst [vmem:[#allocation94_spill] sm:$0xff] %v4577_v18  ;;  %v1006_v34 = vmul.f32 %v3249_v14, %v4575_v11  ;;  %v1008_v1 = vmul.f32 %v5996_v15, %v4575_v11  ;;  %v4590_v20 = vpack.c.bf16 %v1987_v10, %v1979_v2  ;;  %v1861_v4 = vadd.f32 %v1733_v60, %v5999_v16  ;;  %v6001_v10 = vld [vmem:[#allocation100_spill] sm:$0xff]  ;;  %v6003_v60 = vld [vmem:[#allocation107_spill] sm:$0xff] }
 0x13f   : > { %v1461_v38 = vadd.f32 %v5998_v21, %v1069_v44  ;;  %v1066_v43 = vadd.f32 %v938_v13, %v6000_v23  ;;  %v4595_v46 = vadd.f32 %v1007_v19, %v743_v37  ;;  %v4597_v31 = vadd.f32 %v1009_v53, %v745_v8  ;;  %v4606_v44 = vpop.permute.xlu1 %1599  ;;  %v6004_v37 = vld [vmem:[#allocation11_spill] sm:$0xff] }
 0x140   : > { %5997 = vst [vmem:[#allocation76_spill] sm:$0xff] %v4590_v20  ;;  %v4599_v18 = vadd.f32 %v1006_v34, %v742_v7  ;;  %v1722_v62 = vmul.f32 %v5941_v56, %v5948_v9  ;;  %v4603_v35 = vadd.f32 %v1008_v1, %v744_v6  ;;  %v1989_v2 = vmax.f32 %v1861_v4, 0.0  ;;  %6002 = vst [vmem:[#allocation87_spill] sm:$0xff] %v4606_v44  ;;  %v6005_v53 = vld [vmem:[#allocation39_spill] sm:$0xff]  ;;  %v6006_v7 = vld [vmem:[#allocation25_spill] sm:$0xff] }
 0x141   : > { %v1853_v11 = vadd.f32 %v1725_v51, %v1461_v38  ;;  %v1458_v20 = vadd.f32 %v6001_v10, %v1066_v43  ;;  %v1858_v21 = vadd.f32 %v1730_v50, %v6003_v60  ;;  %v940_v13 = vmul.f32 %v6004_v37, %v5947_v39  ;;  %v6007_v1 = vld [vmem:[#allocation26_spill] sm:$0xff]  ;;  %v6008_v43 = vld [vmem:[#allocation27_spill] sm:$0xff]  ;;  %v6011_v4 = vld [vmem:[#allocation5_spill] sm:$0xff] }
 0x142   : > { %v1724_v34 = vmul.f32 %v6005_v53, %v5948_v9  ;;  %v1732_v8 = vmul.f32 %v6005_v53, %v5979_v47  ;;  %v1767_v23 = vmul.f32 %v6006_v7, %v4606_v44  ;;  %v1769_v6 = vmul.f32 %v6007_v1, %v4606_v44  ;;  %v6009_v38 = vld [vmem:[#allocation98_spill] sm:$0xff]  ;;  %v6010_v9 = vld [vmem:[#allocation120_spill] sm:$0xff] }
 0x143   : > { %v1766_v51 = vmul.f32 %v6008_v43, %v4606_v44  ;;  %v1768_v50 = vmul.f32 %v5848_v48, %v4606_v44  ;;  %v1981_v19 = vmax.f32 %v1853_v11, 0.0  ;;  %v1850_v39 = vadd.f32 %v1722_v62, %v1458_v20  ;;  %v6014_v11 = vld [vmem:[#allocation108_spill] sm:$0xff]  ;;  %v4634_v20 = vpop.permute.xlu1 %352 }
 0x144   : > { %v1068_v16 = vadd.f32 %v940_v13, %v6009_v38  ;;  %v963_v10 = vmul.f32 %v6011_v4, %v6010_v9  ;;  %v1895_v47 = vadd.f32 %v1767_v23, %v4493_v54  ;;  %v1897_v60 = vadd.f32 %v1769_v6, %v4496_v52  ;;  %6015 = vst [vmem:[#allocation77_spill] sm:$0xff] %v4634_v20 }
 0x145   : > { %v1894_v3 = vadd.f32 %v1766_v51, %v4499_v0  ;;  %v1896_v22 = vadd.f32 %v1768_v50, %v4523_v33  ;;  %v4630_v55 = vpack.c.bf16 %v1989_v2, %v1981_v19  ;;  %v1978_v59 = vmax.f32 %v1850_v39, 0.0  ;;  %v6020_v39 = vld [vmem:[#allocation57_spill] sm:$0xff] }
 0x146   : > { %v1460_v44 = vadd.f32 %v6013_v61, %v1068_v16  ;;  %v1860_v62 = vadd.f32 %v1732_v8, %v6014_v11  ;;  %v2023_v13 = vmax.f32 %v1895_v47, 0.0  ;;  %v2025_v38 = vmax.f32 %v1897_v60, 0.0  ;;  %v6024_v11 = vld [vmem:[#allocation55_spill] sm:$0xff] }
 0x147   : > { %6012 = vst [vmem:[#allocation79_spill] sm:$0xff] %v4630_v55  ;;  %v2022_v24 = vmax.f32 %v1894_v3, 0.0  ;;  %v2024_v41 = vmax.f32 %v1896_v22, 0.0  ;;  %v4638_v54 = vmul.f32 %v5893_v28, %v4634_v20  ;;  %v4642_v52 = vmul.f32 %v5897_v45, %v4634_v20  ;;  %v4659_v47 = vpop.permute.xlu1 %357 }
 0x148   : > { %v4646_v0 = vmul.f32 %v5900_v26, %v4634_v20  ;;  %v1986_v61 = vmax.f32 %v1858_v21, 0.0  ;;  %v6016_v33 = vmax.f32 %v4542_v57, 0.0  ;;  %v6017_v8 = vmax.f32 %v4545_v32, 0.0  ;;  %6021 = vst [vmem:[#allocation88_spill] sm:$0xff] %v4659_v47  ;;  %v6022_v21 = vld [vmem:[#allocation53_spill] sm:$0xff] }
 0x149   : > { %v6018_v22 = vmax.f32 %v4548_v36, 0.0  ;;  %v2558_v6 = vpack.c.bf16 %v2032_v5, %v2024_v41  ;;  %v544_v51 = vmul.f32 %v5767_v58, %v4634_v20  ;;  %v1852_v19 = vadd.f32 %v1724_v34, %v1460_v44  ;;  %v6023_v32 = vld [vmem:[#allocation29_spill] sm:$0xff]  ;;  %v6025_v41 = vld [vmem:[#allocation36_spill] sm:$0xff] }
 0x14a   : > { %v2524_v2 = vpack.c.bf16 %v6016_v33, %v2023_v13  ;;  %v2556_v3 = vpack.c.bf16 %v6017_v8, %v2025_v38  ;;  %v4656_v50 = vpack.c.bf16 %v1986_v61, %v1978_v59  ;;  %v1091_v16 = vadd.f32 %v963_v10, %v6020_v39  ;;  %v6027_v61 = vld [vmem:[#allocation66_spill] sm:$0xff] }
 0x14b   : > { %v2526_v23 = vpack.c.bf16 %v6018_v22, %v2022_v24  ;;  %v1988_v57 = vmax.f32 %v1860_v62, 0.0  ;;  %v1347_v60 = vmul.f32 %v6023_v32, %v6022_v21  ;;  %v1355_v24 = vmul.f32 %v6023_v32, %v6024_v11  ;;  %v6026_v62 = vld [vmem:[#allocation121_spill] sm:$0xff] }
 0x14c   : > { %6019 = vst [vmem:[#allocation80_spill] sm:$0xff] %v4656_v50  ;;  %2525 = vmatprep.subr.bf16.mxu0 %v2524_v2  ;;  %2557 = vmatprep.subr.bf16.mxu1 %v2556_v3  ;;  %v1739_v36 = vmul.f32 %v5926_v29, %v6025_v41  ;;  %v551_v59 = vmul.f32 %v5893_v28, %v4659_v47  ;;  %v1980_v34 = vmax.f32 %v1852_v19, 0.0  ;;  %v6028_v2 = vld [vmem:[#allocation104_spill] sm:$0xff] }
 0x14d   : > { %2527 = vmatpush1.bf16.msra.mxu0 %v2526_v23  ;;  %2559 = vmatpush1.bf16.msra.mxu1 %v2558_v6  ;;  %v553_v5 = vmul.f32 %v5897_v45, %v4659_v47  ;;  %v550_v44 = vmul.f32 %v5900_v26, %v4659_v47  ;;  %v552_v10 = vmul.f32 %v5767_v58, %v4659_v47  ;;  %v6033_v47 = vld [vmem:[#allocation122_spill] sm:$0xff] }
 0x14e   : > { %v1475_v13 = vadd.f32 %v1347_v60, %v6026_v62  ;;  %v1483_v38 = vadd.f32 %v1355_v24, %v1091_v16  ;;  %v1747_v33 = vmul.f32 %v5926_v29, %v6027_v61  ;;  %v4679_v8 = vadd.f32 %v6028_v2, %v551_v59  ;;  %v4694_v60 = vpop.permute.xlu1 %1219  ;;  %v6031_v24 = vld [vmem:[#allocation30_spill] sm:$0xff] }
 0x14f   : > { %v4682_v3 = vadd.f32 %v6028_v2, %v553_v5  ;;  %v4685_v22 = vadd.f32 %v6028_v2, %v550_v44  ;;  %v4687_v23 = vpack.c.bf16 %v1988_v57, %v1980_v34  ;;  %v4690_v6 = vadd.f32 %v6028_v2, %v552_v10  ;;  %6030 = vst [vmem:[#allocation58_spill] sm:$0xff] %v4694_v60 }
 0x150   : > { %v1867_v19 = vadd.f32 %v1739_v36, %v1475_v13  ;;  %v1875_v39 = vadd.f32 %v1747_v33, %v1483_v38  ;;  %v965_v16 = vmul.f32 %v5990_v25, %v6010_v9  ;;  %v1349_v59 = vmul.f32 %v6031_v24, %v6022_v21  ;;  %v6032_v33 = vld [vmem:[#allocation110_spill] sm:$0xff] }
 0x151   : > { %6029 = vst [vmem:[#allocation90_spill] sm:$0xff] %v4687_v23  ;;  %v1357_v5 = vmul.f32 %v6031_v24, %v6024_v11  ;;  %v1741_v57 = vmul.f32 %v5991_v63, %v6025_v41  ;;  %v1749_v44 = vmul.f32 %v5991_v63, %v6027_v61  ;;  %v1399_v36 = vmul.f32 %v3272_v17, %v4694_v60 }
 0x152   : > { %v1401_v34 = vmul.f32 %v5857_v42, %v4694_v60  ;;  %v1398_v10 = vmul.f32 %v5858_v49, %v4694_v60  ;;  %v1400_v62 = vmul.f32 %v5903_v40, %v4694_v60  ;;  %v1995_v13 = vmax.f32 %v1867_v19, 0.0  ;;  %v6039_v60 = vld [vmem:[#allocation35_spill] sm:$0xff] }
 0x153   : > { %v2003_v38 = vmax.f32 %v1875_v39, 0.0  ;;  %v1093_v2 = vadd.f32 %v965_v16, %v6032_v33  ;;  %v1477_v20 = vadd.f32 %v1349_v59, %v6033_v47  ;;  %v4715_v23 = vadd.f32 %v1399_v36, %v4595_v46  ;;  %v4730_v47 = vpop.permute.xlu1 %636  ;;  %v6036_v46 = vld [vmem:[#allocation31_spill] sm:$0xff] }
 0x154   : > { %v4718_v50 = vadd.f32 %v1401_v34, %v4597_v31  ;;  %v4721_v55 = vadd.f32 %v1398_v10, %v4599_v18  ;;  %v4724_v63 = vadd.f32 %v1400_v62, %v4603_v35  ;;  %v962_v16 = vmul.f32 %v5992_v30, %v6010_v9  ;;  %6035 = vst [vmem:[#allocation60_spill] sm:$0xff] %v4730_v47  ;;  %v6037_v10 = vld [vmem:[#allocation111_spill] sm:$0xff]  ;;  %v6048_v30 = vld [vmem:[#allocation78_spill] sm:$0xff] }
 0x155   : > { %v4726_v24 = vpack.c.bf16 %v2003_v38, %v1995_v13  ;;  %v1485_v19 = vadd.f32 %v1357_v5, %v1093_v2  ;;  %v1869_v39 = vadd.f32 %v1741_v57, %v1477_v20  ;;  %v1346_v59 = vmul.f32 %v6036_v46, %v6022_v21  ;;  %v6038_v13 = vld [vmem:[#allocation123_spill] sm:$0xff] }
 0x156   : > { %v1354_v31 = vmul.f32 %v6036_v46, %v6024_v11  ;;  %v1738_v18 = vmul.f32 %v5941_v56, %v6025_v41  ;;  %v1746_v35 = vmul.f32 %v5941_v56, %v6027_v61  ;;  %v751_v20 = vadd.f32 %v4730_v47, %v4638_v54 }
 0x157   : > { %6034 = vst [vmem:[#allocation59_spill] sm:$0xff] %v4726_v24  ;;  %v753_v2 = vadd.f32 %v4730_v47, %v4642_v52  ;;  %v750_v5 = vadd.f32 %v4730_v47, %v4646_v0  ;;  %v752_v57 = vadd.f32 %v4730_v47, %v544_v51  ;;  %v1877_v36 = vadd.f32 %v1749_v44, %v1485_v19 }
 0x158   : > { %v1997_v34 = vmax.f32 %v1869_v39, 0.0  ;;  %v1090_v62 = vadd.f32 %v962_v16, %v6037_v10  ;;  %v1474_v38 = vadd.f32 %v1346_v59, %v6038_v13  ;;  %v964_v33 = vmul.f32 %v6004_v37, %v6010_v9  ;;  %v4759_v39 = vpop.permute.xlu1 %831  ;;  %v6041_v16 = vld [vmem:[#allocation112_spill] sm:$0xff]  ;;  %v6043_v13 = vld [vmem:[#allocation49_spill] sm:$0xff]  ;;  %v6045_v37 = vld [vmem:[#allocation70_spill] sm:$0xff] }
 0x159   : > { %v1348_v54 = vmul.f32 %v6039_v60, %v6022_v21  ;;  %v1356_v52 = vmul.f32 %v6039_v60, %v6024_v11  ;;  %v1740_v0 = vmul.f32 %v6005_v53, %v6025_v41  ;;  %v2005_v24 = vmax.f32 %v1877_v36, 0.0  ;;  %6040 = vst [vmem:[#allocation62_spill] sm:$0xff] %v4759_v39  ;;  %v6042_v9 = vld [vmem:[#allocation124_spill] sm:$0xff]  ;;  %v6044_v21 = vld [vmem:[#allocation6_spill] sm:$0xff] }
 0x15a   : > { %v1482_v51 = vadd.f32 %v1354_v31, %v1090_v62  ;;  %v1866_v44 = vadd.f32 %v1738_v18, %v1474_v38  ;;  %v1748_v19 = vmul.f32 %v6005_v53, %v6027_v61  ;;  %v1092_v59 = vadd.f32 %v964_v33, %v6041_v16 }
 0x15b   : > { %v1476_v10 = vadd.f32 %v1348_v54, %v6042_v9  ;;  %v499_v47 = vmul.f32 %v6044_v21, %v6043_v13  ;;  %v507_v11 = vmul.f32 %v6044_v21, %v6045_v37  ;;  %v1015_v41 = vmul.f32 %v3235_v12, %v4759_v39 }
 0x15c   : > { %v1017_v31 = vmul.f32 %v3246_v27, %v4759_v39  ;;  %v1014_v61 = vmul.f32 %v3249_v14, %v4759_v39  ;;  %v1016_v18 = vmul.f32 %v5996_v15, %v4759_v39  ;;  %v4775_v36 = vpack.c.bf16 %v2005_v24, %v1997_v34  ;;  %v4785_v53 = vpop.permute.xlu1 %835 }
 0x15d   : > { %v1874_v62 = vadd.f32 %v1746_v35, %v1482_v51  ;;  %v1994_v38 = vmax.f32 %v1866_v44, 0.0  ;;  %v1484_v33 = vadd.f32 %v1356_v52, %v1092_v59  ;;  %v4777_v54 = vadd.f32 %v1015_v41, %v751_v20  ;;  %6047 = vst [vmem:[#allocation65_spill] sm:$0xff] %v4785_v53  ;;  %v6050_v52 = vld [vmem:[#allocation91_spill] sm:$0xff] }
 0x15e   : > { %6046 = vst [vmem:[#allocation61_spill] sm:$0xff] %v4775_v36  ;;  %v4779_v16 = vadd.f32 %v1017_v31, %v753_v2  ;;  %v4781_v9 = vadd.f32 %v1014_v61, %v750_v5  ;;  %v4783_v21 = vadd.f32 %v1016_v18, %v752_v57  ;;  %v1868_v56 = vadd.f32 %v1740_v0, %v1476_v10  ;;  %v6057_v31 = vld [vmem:[#allocation28_spill] sm:$0xff]  ;;  %v6058_v61 = vld [vmem:[#allocation50_spill] sm:$0xff] }
 0x15f   : > { %v2002_v60 = vmax.f32 %v1874_v62, 0.0  ;;  %v1876_v46 = vadd.f32 %v1748_v19, %v1484_v33  ;;  %v707_v39 = vadd.f32 %v6048_v30, %v499_v47  ;;  %v1023_v24 = vmul.f32 %v3235_v12, %v4785_v53  ;;  %v6059_v62 = vld [vmem:[#allocation9_spill] sm:$0xff] }
 0x160   : > { %v1025_v35 = vmul.f32 %v3246_v27, %v4785_v53  ;;  %v1022_v20 = vmul.f32 %v3249_v14, %v4785_v53  ;;  %v1024_v2 = vmul.f32 %v5996_v15, %v4785_v53  ;;  %v1996_v57 = vmax.f32 %v1868_v56, 0.0  ;;  %v4819_v41 = vpop.permute.xlu1 %1611 }
 0x161   : > { %v4796_v5 = vpack.c.bf16 %v2002_v60, %v1994_v38  ;;  %v2004_v34 = vmax.f32 %v1876_v46, 0.0  ;;  %v715_v0 = vadd.f32 %v6050_v52, %v507_v11  ;;  %v4800_v47 = vadd.f32 %v1023_v24, %v4679_v8  ;;  %v6052_v60 = vld [vmem:[#allocation48_spill] sm:$0xff]  ;;  %v6053_v46 = vld [vmem:[#allocation67_spill] sm:$0xff]  ;;  %6055 = vst [vmem:[#allocation23_spill] sm:$0xff] %v4819_v41 }
 0x162   : > { %v4803_v51 = vadd.f32 %v1025_v35, %v4682_v3  ;;  %v4806_v44 = vadd.f32 %v1022_v20, %v4685_v22  ;;  %v4809_v19 = vadd.f32 %v1024_v2, %v4690_v6  ;;  %v971_v56 = vmul.f32 %v6011_v4, %v6052_v60  ;;  %v6054_v11 = vld [vmem:[#allocation15_spill] sm:$0xff]  ;;  %v6056_v3 = vld [vmem:[#allocation41_spill] sm:$0xff] }
 0x163   : > { %6049 = vst [vmem:[#allocation95_spill] sm:$0xff] %v4796_v5  ;;  %v4811_v59 = vpack.c.bf16 %v2004_v34, %v1996_v57  ;;  %v979_v10 = vmul.f32 %v6011_v4, %v6053_v46  ;;  %v1363_v8 = vmul.f32 %v6023_v32, %v6054_v11  ;;  %v1371_v22 = vmul.f32 %v6023_v32, %v6056_v3 }
 0x164   : > { %v1755_v6 = vmul.f32 %v5926_v29, %v6057_v31  ;;  %v1763_v18 = vmul.f32 %v5926_v29, %v6058_v61  ;;  %v501_v38 = vmul.f32 %v6059_v62, %v6043_v13  ;;  %v1791_v33 = vmul.f32 %v6006_v7, %v4819_v41 }
 0x165   : > { %6051 = vst [vmem:[#allocation47_spill] sm:$0xff] %v4811_v59  ;;  %v1793_v24 = vmul.f32 %v6007_v1, %v4819_v41  ;;  %v1790_v35 = vmul.f32 %v6008_v43, %v4819_v41  ;;  %v1792_v20 = vmul.f32 %v5848_v48, %v4819_v41  ;;  %v1099_v2 = vadd.f32 %v971_v56, %v707_v39 }
 0x166   : > { %v1107_v57 = vadd.f32 %v979_v10, %v715_v0  ;;  %v509_v34 = vmul.f32 %v6059_v62, %v6045_v37  ;;  %v709_v53 = vadd.f32 %v6048_v30, %v501_v38  ;;  %v1919_v59 = vadd.f32 %v1791_v33, %v4715_v23  ;;  %v4847_v0 = vpop.permute.xlu1 %362 }
 0x167   : > { %v1921_v5 = vadd.f32 %v1793_v24, %v4718_v50  ;;  %v1918_v36 = vadd.f32 %v1790_v35, %v4721_v55  ;;  %v1920_v29 = vadd.f32 %v1792_v20, %v4724_v63  ;;  %v1491_v32 = vadd.f32 %v1363_v8, %v1099_v2  ;;  %6060 = vst [vmem:[#allocation38_spill] sm:$0xff] %v4847_v0  ;;  %v6061_v8 = vld [vmem:[#allocation93_spill] sm:$0xff]  ;;  %v6063_v24 = vld [vmem:[#allocation74_spill] sm:$0xff]  ;;  %v6067_v20 = vld [vmem:[#allocation84_spill] sm:$0xff] }
 0x168   : > { %v1499_v4 = vadd.f32 %v1371_v22, %v1107_v57  ;;  %v717_v43 = vadd.f32 %v6050_v52, %v509_v34  ;;  %v973_v39 = vmul.f32 %v5990_v25, %v6052_v60  ;;  %v2047_v56 = vmax.f32 %v1919_v59, 0.0  ;;  %v6069_v57 = vld [vmem:[#allocation114_spill] sm:$0xff] }
 0x169   : > { %v2049_v10 = vmax.f32 %v1921_v5, 0.0  ;;  %v2046_v38 = vmax.f32 %v1918_v36, 0.0  ;;  %v2048_v41 = vmax.f32 %v1920_v29, 0.0  ;;  %v559_v50 = vmul.f32 %v5893_v28, %v4847_v0  ;;  %v6065_v36 = vld [vmem:[#allocation75_spill] sm:$0xff] }
 0x16a   : > { %v561_v55 = vmul.f32 %v5897_v45, %v4847_v0  ;;  %v558_v63 = vmul.f32 %v5900_v26, %v4847_v0  ;;  %v560_v23 = vmul.f32 %v5767_v58, %v4847_v0  ;;  %v6062_v22 = vmax.f32 %v6061_v8, 0.0 }
 0x16b   : > { %v6064_v59 = vmax.f32 %v6063_v24, 0.0  ;;  %v6066_v29 = vmax.f32 %v6065_v36, 0.0  ;;  %v6068_v28 = vmax.f32 %v6067_v20, 0.0  ;;  %v767_v45 = vadd.f32 %v6069_v57, %v559_v50  ;;  %v6071_v50 = vld [vmem:[#allocation16_spill] sm:$0xff] }
 0x16c   : > { %v2528_v33 = vpack.c.bf16 %v2047_v56, %v6062_v22  ;;  %v769_v34 = vadd.f32 %v6069_v57, %v561_v55  ;;  %v766_v26 = vadd.f32 %v6069_v57, %v558_v63  ;;  %v768_v58 = vadd.f32 %v6069_v57, %v560_v23  ;;  %v2087_v56 = vld [vmem:[%s5467_s4] sm:$0xf]  ;;  %v6073_v22 = vld [vmem:[#allocation24_spill] sm:$0xff] }
 0x16d   : > { %v2560_v5 = vpack.c.bf16 %v2049_v10, %v6064_v59  ;;  %v2530_v35 = vpack.c.bf16 %v2046_v38, %v6066_v29  ;;  %v2562_v2 = vpack.c.bf16 %v2048_v41, %v6068_v28  ;;  %v1883_v10 = vadd.f32 %v1755_v6, %v1491_v32  ;;  %v4874_v41 = vpop.permute.xlu1 %1223  ;;  %v6072_v63 = vld [vmem:[#allocation17_spill] sm:$0xff]  ;;  %2090 = vperm.xlu0 %2755, %v2087_v56  }
 0x16e   : > { %2529 = vmatprep.subr.bf16.mxu0 %v2528_v33  ;;  %v1891_v8 = vadd.f32 %v1763_v18, %v1499_v4  ;;  %v981_v38 = vmul.f32 %v5990_v25, %v6053_v46  ;;  %6070 = vst [vmem:[#allocation42_spill] sm:$0xff] %v4874_v41  ;;  %v4877_v55 = vadd.f32 %v6071_v50, %v767_v45  ;;  %v6074_v33 = vld [vmem:[#allocation126_spill] sm:$0xff] }
 0x16f   : > { %2561 = vmatprep.subr.bf16.mxu1 %v2560_v5  ;;  %2531 = vmatpush1.bf16.msra.mxu0 %v2530_v35  ;;  %v4880_v23 = vadd.f32 %v6072_v63, %v769_v34  ;;  %v4883_v24 = vadd.f32 %v6073_v22, %v766_v26  ;;  %v1407_v32 = vmul.f32 %v3272_v17, %v4874_v41  ;;  %v2011_v5 = vmax.f32 %v1883_v10, 0.0  ;;  %v6078_v10 = vld [vmem:[#allocation33_spill] sm:$0xff] }
 0x170   : > { %2563 = vmatpush1.bf16.msra.mxu1 %v2562_v2  ;;  %v1409_v4 = vmul.f32 %v5857_v42, %v4874_v41  ;;  %v1406_v6 = vmul.f32 %v5858_v49, %v4874_v41  ;;  %v1408_v18 = vmul.f32 %v5903_v40, %v4874_v41  ;;  %v4894_v59 = vadd.f32 %v6074_v33, %v768_v58  ;;  %v6077_v58 = vld [vmem:[#allocation30_spill] sm:$0xff] }
 0x171   : > { %v2019_v36 = vmax.f32 %v1891_v8, 0.0  ;;  %v1101_v29 = vadd.f32 %v973_v39, %v709_v53  ;;  %v4897_v35 = vadd.f32 %v1407_v32, %v4777_v54  ;;  %v4908_v45 = vpop.permute.xlu1 %1227  ;;  %v1109_v26 = vadd.f32 %v981_v38, %v717_v43 }
 0x172   : > { %v4900_v20 = vadd.f32 %v1409_v4, %v4779_v16  ;;  %v4903_v28 = vadd.f32 %v1406_v6, %v4781_v9  ;;  %v4906_v2 = vadd.f32 %v1408_v18, %v4783_v21  ;;  %6075 = vst [vmem:[#allocation43_spill] sm:$0xff] %v4908_v45  ;;  %v1365_v53 = vmul.f32 %v6077_v58, %v6054_v11  ;;  %v6079_v18 = vld [vmem:[#allocation10_spill] sm:$0xff] }
 0x173   : > { %v4910_v34 = vpack.c.bf16 %v2019_v36, %v2011_v5  ;;  %v1373_v54 = vmul.f32 %v6077_v58, %v6056_v3  ;;  %v1415_v16 = vmul.f32 %v3272_v17, %v4908_v45  ;;  %v1417_v9 = vmul.f32 %v5857_v42, %v4908_v45 }
 0x174   : > { %v1414_v21 = vmul.f32 %v5858_v49, %v4908_v45  ;;  %v1416_v39 = vmul.f32 %v5903_v40, %v4908_v45  ;;  %v1493_v56 = vadd.f32 %v1365_v53, %v1101_v29  ;;  %v1757_v8 = vmul.f32 %v6078_v10, %v6057_v31  ;;  %v6081_v29 = vld [vmem:[#allocation81_spill] sm:$0xff] }
 0x175   : > { %6076 = vst [vmem:[#allocation99_spill] sm:$0xff] %v4910_v34  ;;  %v1501_v43 = vadd.f32 %v1373_v54, %v1109_v26  ;;  %v1765_v38 = vmul.f32 %v6078_v10, %v6058_v61  ;;  %v1543_v50 = vadd.f32 %v1415_v16, %v4800_v47  ;;  %v1545_v63 = vadd.f32 %v1417_v9, %v4803_v51  ;;  %v4936_v36 = vpop.permute.xlu1 %651  ;;  %v6082_v47 = vld [vmem:[#allocation82_spill] sm:$0xff]  ;;  %v6085_v16 = vld [vmem:[#allocation115_spill] sm:$0xff] }
 0x176   : > { %v1542_v22 = vadd.f32 %v1414_v21, %v4806_v44  ;;  %v1544_v32 = vadd.f32 %v1416_v39, %v4809_v19  ;;  %v1885_v4 = vadd.f32 %v1757_v8, %v1493_v56  ;;  %v498_v33 = vmul.f32 %v6079_v18, %v6043_v13  ;;  %6080 = vst [vmem:[#allocation101_spill] sm:$0xff] %v4936_v36  ;;  %v6083_v51 = vld [vmem:[#allocation86_spill] sm:$0xff]  ;;  %v6084_v19 = vld [vmem:[#allocation21_spill] sm:$0xff]  ;;  %v6086_v21 = vld [vmem:[#allocation116_spill] sm:$0xff] }
 0x177   : > { %v1893_v6 = vadd.f32 %v1765_v38, %v1501_v43  ;;  %v506_v5 = vmul.f32 %v6079_v18, %v6045_v37  ;;  %v4939_v26 = vadd.f32 %v6081_v29, %v1543_v50  ;;  %v4942_v53 = vadd.f32 %v6082_v47, %v1545_v63  ;;  %v6087_v56 = vld [vmem:[#allocation117_spill] sm:$0xff]  ;;  %v6088_v8 = vld [vmem:[#allocation118_spill] sm:$0xff] }
 0x178   : > { %v4945_v44 = vadd.f32 %v6083_v51, %v1542_v22  ;;  %v4948_v54 = vadd.f32 %v6084_v19, %v1544_v32  ;;  %v775_v9 = vadd.f32 %v4936_v36, %v6085_v16  ;;  %v777_v39 = vadd.f32 %v4936_v36, %v6086_v21  ;;  %v6089_v16 = vld [vmem:[#allocation8_spill] sm:$0xff] }
 0x179   : > { %v774_v43 = vadd.f32 %v4936_v36, %v6087_v56  ;;  %v776_v38 = vadd.f32 %v4936_v36, %v6088_v8  ;;  %v2013_v29 = vmax.f32 %v1885_v4, 0.0  ;;  %v2021_v47 = vmax.f32 %v1893_v6, 0.0  ;;  %v6090_v8 = vld [vmem:[#allocation31_spill] sm:$0xff]  ;;  %v6093_v6 = vld [vmem:[#allocation34_spill] sm:$0xff]  ;;  %v6094_v32 = vld [vmem:[#allocation12_spill] sm:$0xff] }
 0x17a   : > { %v706_v51 = vadd.f32 %v6048_v30, %v498_v33  ;;  %v714_v19 = vadd.f32 %v6050_v52, %v506_v5  ;;  %v970_v21 = vmul.f32 %v6089_v16, %v6052_v60  ;;  %v978_v56 = vmul.f32 %v6089_v16, %v6053_v46  ;;  %v4972_v63 = vpop.permute.xlu1 %843 }
 0x17b   : > { %v1362_v50 = vmul.f32 %v6090_v8, %v6054_v11  ;;  %v1370_v22 = vmul.f32 %v6090_v8, %v6056_v3  ;;  %6091 = vst [vmem:[#allocation102_spill] sm:$0xff] %v4972_v63  ;;  %v4974_v4 = vpack.c.bf16 %v2021_v47, %v2013_v29  ;;  %v1754_v33 = vmul.f32 %v6093_v6, %v6057_v31 }
 0x17c   : > { %v1762_v5 = vmul.f32 %v6093_v6, %v6058_v61  ;;  %v500_v36 = vmul.f32 %v6094_v32, %v6043_v13  ;;  %v1039_v57 = vmul.f32 %v3235_v12, %v4972_v63  ;;  %v1041_v0 = vmul.f32 %v3246_v27, %v4972_v63 }
 0x17d   : > { %6092 = vst [vmem:[#allocation103_spill] sm:$0xff] %v4974_v4  ;;  %v1038_v45 = vmul.f32 %v3249_v14, %v4972_v63  ;;  %v1040_v29 = vmul.f32 %v5996_v15, %v4972_v63  ;;  %v1098_v47 = vadd.f32 %v970_v21, %v706_v51  ;;  %v1106_v41 = vadd.f32 %v978_v56, %v714_v19  ;;  %v6095_v15 = vld [vmem:[#allocation11_spill] sm:$0xff] }
 0x17e   : > { %v508_v4 = vmul.f32 %v6094_v32, %v6045_v37  ;;  %v708_v34 = vadd.f32 %v6048_v30, %v500_v36  ;;  %v4993_v13 = vadd.f32 %v1039_v57, %v775_v9  ;;  %v4995_v6 = vadd.f32 %v1041_v0, %v777_v39  ;;  %v6097_v37 = vld [vmem:[#allocation35_spill] sm:$0xff] }
 0x17f   : > { %v4997_v12 = vadd.f32 %v1038_v45, %v774_v43  ;;  %v4999_v27 = vadd.f32 %v1040_v29, %v776_v38  ;;  %v1490_v8 = vadd.f32 %v1362_v50, %v1098_v47  ;;  %v1498_v14 = vadd.f32 %v1370_v22, %v1106_v41  ;;  %v5004_v19 = vpop.permute.xlu1 %1615  ;;  %v6098_v45 = vld [vmem:[#allocation39_spill] sm:$0xff] }
 0x180   : > { %v716_v16 = vadd.f32 %v6050_v52, %v508_v4  ;;  %v972_v51 = vmul.f32 %v6095_v15, %v6052_v60  ;;  %6096 = vst [vmem:[#allocation105_spill] sm:$0xff] %v5004_v19  ;;  %v980_v30 = vmul.f32 %v6095_v15, %v6053_v46  ;;  %v1364_v0 = vmul.f32 %v6097_v37, %v6054_v11  ;;  %v6099_v41 = vld [vmem:[#allocation27_spill] sm:$0xff] }
 0x181   : > { %v1372_v57 = vmul.f32 %v6097_v37, %v6056_v3  ;;  %v1756_v36 = vmul.f32 %v6098_v45, %v6057_v31  ;;  %v1799_v52 = vmul.f32 %v6006_v7, %v5004_v19  ;;  %v1801_v60 = vmul.f32 %v6007_v1, %v5004_v19 }
 0x182   : > { %v1798_v9 = vmul.f32 %v6099_v41, %v5004_v19  ;;  %v1800_v46 = vmul.f32 %v5848_v48, %v5004_v19  ;;  %v1882_v39 = vadd.f32 %v1754_v33, %v1490_v8  ;;  %v1890_v11 = vadd.f32 %v1762_v5, %v1498_v14 }
 0x183   : > { %v1100_v43 = vadd.f32 %v972_v51, %v708_v34  ;;  %v1108_v38 = vadd.f32 %v980_v30, %v716_v16  ;;  %v1927_v3 = vadd.f32 %v1799_v52, %v4897_v35  ;;  %v1929_v31 = vadd.f32 %v1801_v60, %v4900_v20  ;;  %v6100_v16 = vld [vmem:[#allocation72_spill] sm:$0xff] }
 0x184   : > { %v1926_v50 = vadd.f32 %v1798_v9, %v4903_v28  ;;  %v1928_v22 = vadd.f32 %v1800_v46, %v4906_v2  ;;  %v2010_v21 = vmax.f32 %v1882_v39, 0.0  ;;  %v2018_v56 = vmax.f32 %v1890_v11, 0.0  ;;  %v6101_v28 = vld [vmem:[#allocation6_spill] sm:$0xff] }
 0x185   : > { %v1492_v4 = vadd.f32 %v1364_v0, %v1100_v43  ;;  %v1500_v29 = vadd.f32 %v1372_v57, %v1108_v38  ;;  %v2055_v47 = vmax.f32 %v1927_v3, 0.0  ;;  %v2057_v63 = vmax.f32 %v1929_v31, 0.0 }
 0x186   : > { %v2054_v37 = vmax.f32 %v1926_v50, 0.0  ;;  %v2056_v19 = vmax.f32 %v1928_v22, 0.0  ;;  %v5026_v8 = vpop.permute.xlu1 %1231  ;;  %v5028_v34 = vpack.c.bf16 %v2018_v56, %v2010_v21  ;;  %v1764_v35 = vmul.f32 %v6098_v45, %v6058_v61  ;;  %v6108_v50 = vld [vmem:[#allocation44_spill] sm:$0xff] }
 0x187   : > { %v1884_v20 = vadd.f32 %v1756_v36, %v1492_v4  ;;  %v515_v33 = vmul.f32 %v6101_v28, %v6100_v16  ;;  %v6102_v2 = vmax.f32 %v4939_v26, 0.0  ;;  %v6103_v14 = vmax.f32 %v4942_v53, 0.0 }
 0x188   : > { %v6104_v30 = vmax.f32 %v4945_v44, 0.0  ;;  %v6105_v57 = vmax.f32 %v4948_v54, 0.0  ;;  %v1423_v60 = vmul.f32 %v3272_v17, %v5026_v8  ;;  %v1425_v61 = vmul.f32 %v5857_v42, %v5026_v8  ;;  %v6106_v44 = vld [vmem:[#allocation22_spill] sm:$0xff]  ;;  %v6107_v54 = vld [vmem:[#allocation64_spill] sm:$0xff] }
 0x189   : > { %v2532_v5 = vpack.c.bf16 %v6102_v2, %v2055_v47  ;;  %v2564_v51 = vpack.c.bf16 %v6103_v14, %v2057_v63  ;;  %v1422_v36 = vmul.f32 %v5858_v49, %v5026_v8  ;;  %v1424_v26 = vmul.f32 %v5903_v40, %v5026_v8 }
 0x18a   : > { %v2534_v0 = vpack.c.bf16 %v6104_v30, %v2054_v37  ;;  %v2566_v52 = vpack.c.bf16 %v6105_v57, %v2056_v19  ;;  %v1892_v53 = vadd.f32 %v1764_v35, %v1500_v29  ;;  %v523_v63 = vmul.f32 %v6101_v28, %v6106_v44  ;;  %v5053_v37 = vpop.permute.xlu1 %1235 }
 0x18b   : > { %2533 = vmatprep.subr.bf16.mxu0 %v2532_v5  ;;  %2565 = vmatprep.subr.bf16.mxu1 %v2564_v51  ;;  %v723_v19 = vadd.f32 %v6107_v54, %v515_v33  ;;  %v1551_v9 = vadd.f32 %v1423_v60, %v4877_v55  ;;  %v1553_v46 = vadd.f32 %v1425_v61, %v4880_v23  ;;  %v2012_v11 = vmax.f32 %v1884_v20, 0.0  ;;  %v6109_v55 = vld [vmem:[#allocation18_spill] sm:$0xff]  ;;  %v6110_v23 = vld [vmem:[#allocation125_spill] sm:$0xff]  ;;  %v6113_v51 = vld [vmem:[#allocation119_spill] sm:$0xff] }
 0x18c   : > { %2535 = vmatpush1.bf16.msra.mxu0 %v2534_v0  ;;  %2567 = vmatpush1.bf16.msra.mxu1 %v2566_v52  ;;  %v1550_v39 = vadd.f32 %v1422_v36, %v4883_v24  ;;  %v1431_v43 = vmul.f32 %v3272_v17, %v5053_v37  ;;  %v1433_v38 = vmul.f32 %v5857_v42, %v5053_v37  ;;  %v2020_v2 = vmax.f32 %v1892_v53, 0.0  ;;  %v6112_v5 = vld [vmem:[#allocation85_spill] sm:$0xff] }
 0x18d   : > { %v1430_v3 = vmul.f32 %v5858_v49, %v5053_v37  ;;  %v1432_v31 = vmul.f32 %v5903_v40, %v5053_v37  ;;  %v1943_v22 = vadd.f32 %v6108_v50, %v1551_v9  ;;  %v1945_v21 = vadd.f32 %v6109_v55, %v1553_v46  ;;  %v6111_v40 = vld [vmem:[#allocation127_spill] sm:$0xff]  ;;  %v6116_v46 = vld [vmem:[#allocation73_spill] sm:$0xff] }
 0x18e   : > { %v1942_v56 = vadd.f32 %v6110_v23, %v1550_v39  ;;  %v1552_v24 = vadd.f32 %v1424_v26, %v4894_v59  ;;  %v1559_v4 = vadd.f32 %v1431_v43, %v4993_v13  ;;  %v1561_v17 = vadd.f32 %v1433_v38, %v4995_v6  ;;  %v6114_v59 = vld [vmem:[#allocation5_spill] sm:$0xff]  ;;  %v6118_v43 = vld [vmem:[#allocation83_spill] sm:$0xff] }
 0x18f   : > { %v1558_v42 = vadd.f32 %v1430_v3, %v4997_v12  ;;  %v1560_v29 = vadd.f32 %v1432_v31, %v4999_v27  ;;  %v2071_v49 = vmax.f32 %v1943_v22, 0.0  ;;  %v2073_v47 = vmax.f32 %v1945_v21, 0.0  ;;  %v5075_v33 = vpop.permute.xlu1 %1627  ;;  %v6115_v13 = vld [vmem:[#allocation13_spill] sm:$0xff]  ;;  %v6119_v38 = vld [vmem:[#allocation87_spill] sm:$0xff] }
 0x190   : > { %v2070_v35 = vmax.f32 %v1942_v56, 0.0  ;;  %v1944_v20 = vadd.f32 %v6111_v40, %v1552_v24  ;;  %v731_v14 = vadd.f32 %v6112_v5, %v523_v63  ;;  %v987_v30 = vmul.f32 %v6114_v59, %v6113_v51  ;;  %v6121_v31 = vld [vmem:[#allocation71_spill] sm:$0xff] }
 0x191   : > { %v995_v6 = vmul.f32 %v6114_v59, %v6115_v13  ;;  %v1823_v12 = vmul.f32 %v6006_v7, %v5075_v33  ;;  %v1825_v27 = vmul.f32 %v6007_v1, %v5075_v33  ;;  %v1822_v0 = vmul.f32 %v6099_v41, %v5075_v33  ;;  %v6117_v7 = vld [vmem:[#allocation29_spill] sm:$0xff]  ;;  %v6120_v41 = vld [vmem:[#allocation32_spill] sm:$0xff] }
 0x192   : > { %v1824_v57 = vmul.f32 %v5848_v48, %v5075_v33  ;;  %v2072_v52 = vmax.f32 %v1944_v20, 0.0  ;;  %v5090_v60 = vpack.c.bf16 %v2020_v2, %v2012_v11  ;;  %v1115_v61 = vadd.f32 %v987_v30, %v723_v19 }
 0x193   : > { %v1123_v36 = vadd.f32 %v995_v6, %v731_v14  ;;  %v1951_v26 = vadd.f32 %v1823_v12, %v1559_v4  ;;  %v1953_v53 = vadd.f32 %v1825_v27, %v1561_v17  ;;  %v1950_v63 = vadd.f32 %v1822_v0, %v1558_v42  ;;  %v6122_v0 = vld [vmem:[#allocation68_spill] sm:$0xff] }
 0x194   : > { %v1952_v9 = vadd.f32 %v1824_v57, %v1560_v29  ;;  %v1379_v39 = vmul.f32 %v6117_v7, %v6116_v46  ;;  %v1387_v1 = vmul.f32 %v6117_v7, %v6118_v43  ;;  %v1771_v3 = vmul.f32 %v6120_v41, %v6119_v38  ;;  %v6123_v57 = vld [vmem:[#allocation51_spill] sm:$0xff] }
 0x195   : > { %v1779_v48 = vmul.f32 %v6120_v41, %v6121_v31  ;;  %v2079_v11 = vmax.f32 %v1951_v26, 0.0  ;;  %v2081_v50 = vmax.f32 %v1953_v53, 0.0  ;;  %v2078_v19 = vmax.f32 %v1950_v63, 0.0 }
 0x196   : > { %v2080_v22 = vmax.f32 %v1952_v9, 0.0  ;;  %v1507_v55 = vadd.f32 %v1379_v39, %v1115_v61  ;;  %v1515_v21 = vadd.f32 %v1387_v1, %v1123_v36  ;;  %v517_v23 = vmul.f32 %v6059_v62, %v6100_v16  ;;  %v6124_v9 = vld [vmem:[#allocation8_spill] sm:$0xff] }
 0x197   : > { %v525_v56 = vmul.f32 %v6059_v62, %v6106_v44  ;;  %v2536_v24 = vpack.c.bf16 %v2079_v11, %v2071_v49  ;;  %v2568_v4 = vpack.c.bf16 %v2081_v50, %v2073_v47  ;;  %v2538_v17 = vpack.c.bf16 %v2078_v19, %v2070_v35  ;;  %v5115_v47 = vld [vmem:[%s5466_s3] sm:$0xf]  ;;  %v6125_v11 = vld [vmem:[#allocation56_spill] sm:$0xff]  ;;  %v6126_v50 = vld [vmem:[#allocation94_spill] sm:$0xff] }
 0x198   : > { %v2570_v42 = vpack.c.bf16 %v2080_v22, %v2072_v52  ;;  %v1899_v29 = vadd.f32 %v1771_v3, %v1507_v55  ;;  %v1907_v40 = vadd.f32 %v1779_v48, %v1515_v21  ;;  %v725_v20 = vadd.f32 %v6107_v54, %v517_v23  ;;  %v6127_v55 = vld [vmem:[#allocation31_spill] sm:$0xff]  ;;  %v6128_v23 = vld [vmem:[#allocation76_spill] sm:$0xff] }
 0x199   : > { %v733_v2 = vadd.f32 %v6112_v5, %v525_v56  ;;  %2537 = vmatprep.subr.bf16.mxu0 %v2536_v24  ;;  %2569 = vmatprep.subr.bf16.mxu1 %v2568_v4  ;;  %v989_v14 = vmul.f32 %v5990_v25, %v6113_v51  ;;  %v997_v30 = vmul.f32 %v5990_v25, %v6115_v13  ;;  %v6129_v56 = vld [vmem:[#allocation79_spill] sm:$0xff] }
 0x19a   : > { %v1381_v49 = vmul.f32 %v6077_v58, %v6116_v46  ;;  %2539 = vmatpush1.bf16.msra.mxu0 %v2538_v17  ;;  %2571 = vmatpush1.bf16.msra.mxu1 %v2570_v42  ;;  %v2027_v35 = vmax.f32 %v1899_v29, 0.0  ;;  %v2035_v6 = vmax.f32 %v1907_v40, 0.0  ;;  %v1389_v12 = vmul.f32 %v6077_v58, %v6118_v43  ;;  %v6130_v40 = vld [vmem:[#allocation34_spill] sm:$0xff] }
 0x19b   : > { %v1773_v27 = vmul.f32 %v6078_v10, %v6119_v38  ;;  %2573 = vmatprep.subr.bf16.mxu0 %v6122_v0  ;;  %2605 = vmatprep.subr.bf16.mxu1 %v6123_v57  ;;  %v1117_v52 = vadd.f32 %v989_v14, %v725_v20  ;;  %v1125_v61 = vadd.f32 %v997_v30, %v733_v2  ;;  %v6131_v14 = vmov 0.0  }
 0x19c   : > { %v1781_v36 = vmul.f32 %v6078_v10, %v6121_v31  ;;  %v5125_v26 = vpack.c.bf16 %v2035_v6, %v2027_v35  ;;  %v514_v53 = vmul.f32 %v6079_v18, %v6100_v16  ;;  %v522_v63 = vmul.f32 %v6079_v18, %v6106_v44 }
 0x19d   : > { %v986_v39 = vmul.f32 %v6124_v9, %v6113_v51  ;;  %2158 = vmatmul.mubr.f32.vlgmr.msra.gmra.mrb[0].mxu0 %v5115_v47  ;;  %2229 = vmatmul.mubr.f32.vlgmr.msra.gmra.mrb[0].mxu1 %v5115_v47  ;;  %v1509_v1 = vadd.f32 %v1381_v49, %v1117_v52  ;;  %v1517_v3 = vadd.f32 %v1389_v12, %v1125_v61  ;;  %v6132_v12 = vld [vmem:[#allocation80_spill] sm:$0xff]  ;;  %v6134_v61 = vld [vmem:[#allocation59_spill] sm:$0xff] }
 0x19e   : > { %v994_v48 = vmul.f32 %v6124_v9, %v6115_v13  ;;  %2575 = vmatpush1.bf16.msra.mxu0 %v6125_v11  ;;  %2607 = vmatpush1.bf16.msra.mxu1 %v6126_v50  ;;  %v722_v19 = vadd.f32 %v6107_v54, %v514_v53  ;;  %v730_v22 = vadd.f32 %v6112_v5, %v522_v63 }
 0x19f   : > { %v1378_v21 = vmul.f32 %v6127_v55, %v6116_v46  ;;  %2577 = vmatprep.subr.bf16.mxu0 %v6128_v23  ;;  %2609 = vmatprep.subr.bf16.mxu1 %v6129_v56  ;;  %v1901_v24 = vadd.f32 %v1773_v27, %v1509_v1  ;;  %v1909_v4 = vadd.f32 %v1781_v36, %v1517_v3  ;;  %v6133_v27 = vld [vmem:[#allocation90_spill] sm:$0xff]  ;;  %v6135_v36 = vld [vmem:[#allocation61_spill] sm:$0xff]  ;;  %v6136_v3 = vld [vmem:[#allocation35_spill] sm:$0xff] }
 0x1a0   : > { %v1386_v17 = vmul.f32 %v6127_v55, %v6118_v43  ;;  %v1114_v42 = vadd.f32 %v986_v39, %v722_v19  ;;  %v1122_v29 = vadd.f32 %v994_v48, %v730_v22  ;;  %v1770_v20 = vmul.f32 %v6130_v40, %v6119_v38  ;;  %2299 = vmatprep.mubr.f32.mxu0 %v6131_v14  ;;  %v6137_v19 = vld [vmem:[#allocation95_spill] sm:$0xff]  ;;  %v6139_v23 = vld [vmem:[#allocation69_spill] sm:$0xff] }
 0x1a1   : > { %v1778_v2 = vmul.f32 %v6130_v40, %v6121_v31  ;;  %v2029_v30 = vmax.f32 %v1901_v24, 0.0  ;;  %v2037_v49 = vmax.f32 %v1909_v4, 0.0  ;;  %v516_v35 = vmul.f32 %v6094_v32, %v6100_v16  ;;  %2370 = vmatprep.mubr.f32.mxu1 %v6131_v14  ;;  %v6140_v56 = vld [vmem:[#allocation99_spill] sm:$0xff]  ;;  %v6142_v4 = vld [vmem:[#allocation14_spill] sm:$0xff]  ;;  %v6145_v14 = vld [vmem:[#allocation92_spill] sm:$0xff] }
 0x1a2   : > { %v524_v6 = vmul.f32 %v6094_v32, %v6106_v44  ;;  %2579 = vmatpush1.bf16.msra.mxu0 %v6132_v12  ;;  %2611 = vmatpush1.bf16.msra.mxu1 %v6133_v27  ;;  %v1506_v0 = vadd.f32 %v1378_v21, %v1114_v42  ;;  %v1514_v57 = vadd.f32 %v1386_v17, %v1122_v29  ;;  %v6141_v24 = vld [vmem:[#allocation103_spill] sm:$0xff]  ;;  %v6143_v17 = vld [vmem:[#allocation52_spill] sm:$0xff] }
 0x1a3   : > { %v988_v52 = vmul.f32 %v6095_v15, %v6113_v51  ;;  %2581 = vmatprep.subr.bf16.mxu0 %v6134_v61  ;;  %2613 = vmatprep.subr.bf16.mxu1 %v6135_v36  ;;  %v2620_v53 = vpack.c.bf16 %v2037_v49, %v2029_v30  ;;  %v724_v16 = vadd.f32 %v6107_v54, %v516_v35  ;;  %v6146_v35 = vld [vmem:[#allocation46_spill] sm:$0xff]  ;;  %v6147_v12 = vld [vmem:[#allocation20_spill] sm:$0xff]  ;;  %v6149_v36 = vld [vmem:[#allocation37_spill] sm:$0xff] }
 0x1a4   : > { %v732_v44 = vadd.f32 %v6112_v5, %v524_v6  ;;  %v1898_v63 = vadd.f32 %v1770_v20, %v1506_v0  ;;  %v1906_v39 = vadd.f32 %v1778_v2, %v1514_v57  ;;  %v996_v1 = vmul.f32 %v6095_v15, %v6115_v13  ;;  %v6138_v5 = vld [vmem:[#allocation47_spill] sm:$0xff]  ;;  %v6144_v20 = vld [vmem:[#allocation97_spill] sm:$0xff]  ;;  %v6148_v0 = vld [vmem:[#allocation58_spill] sm:$0xff] }
 0x1a5   : > { %v1380_v48 = vmul.f32 %v6136_v3, %v6116_v46  ;;  %v1116_v11 = vadd.f32 %v988_v52, %v724_v16  ;;  %v1388_v51 = vmul.f32 %v6136_v3, %v6118_v43  ;;  %v1772_v50 = vmul.f32 %v6098_v45, %v6119_v38 }
 0x1a6   : > { %v1780_v54 = vmul.f32 %v6098_v45, %v6121_v31  ;;  %2583 = vmatpush1.bf16.msra.mxu0 %v6137_v19  ;;  %2615 = vmatpush1.bf16.msra.mxu1 %v6138_v5  ;;  %v2026_v22 = vmax.f32 %v1898_v63, 0.0  ;;  %v2034_v21 = vmax.f32 %v1906_v39, 0.0  ;;  %v1124_v13 = vadd.f32 %v996_v1, %v732_v44  ;;  %v6150_v39 = vld [vmem:[#allocation23_spill] sm:$0xff] }
 0x1a7   : > { %v531_v46 = vmul.f32 %v6101_v28, %v6139_v23  ;;  %2585 = vmatprep.subr.bf16.mxu0 %v6140_v56  ;;  %2617 = vmatprep.subr.bf16.mxu1 %v6141_v24  ;;  %v1508_v43 = vadd.f32 %v1380_v48, %v1116_v11  ;;  %v539_v38 = vmul.f32 %v6101_v28, %v6142_v4 }
 0x1a8   : > { %v1003_v31 = vmul.f32 %v6114_v59, %v6143_v17  ;;  %v2590_v42 = vpack.c.bf16 %v2034_v21, %v2026_v22  ;;  %v1516_v29 = vadd.f32 %v1388_v51, %v1124_v13  ;;  %v1011_v30 = vmul.f32 %v6114_v59, %v6145_v14 }
 0x1a9   : > { %v739_v2 = vadd.f32 %v6144_v20, %v531_v46  ;;  %v1900_v49 = vadd.f32 %v1772_v50, %v1508_v43  ;;  %v747_v6 = vadd.f32 %v6146_v35, %v539_v38  ;;  %v1395_v27 = vmul.f32 %v6117_v7, %v6147_v12 }
 0x1aa   : > { %v1403_v57 = vmul.f32 %v6117_v7, %v6148_v0  ;;  %2587 = vmatpush1.bf16.msra.mxu0 %v5028_v34  ;;  %2619 = vmatpush1.bf16.msra.mxu1 %v5090_v60  ;;  %v1908_v52 = vadd.f32 %v1780_v54, %v1516_v29  ;;  %v1787_v16 = vmul.f32 %v6120_v41, %v6149_v36 }
 0x1ab   : > { %v1131_v61 = vadd.f32 %v1003_v31, %v739_v2  ;;  %2589 = vmatprep.subr.bf16.mxu0 %v5125_v26  ;;  %2621 = vmatprep.subr.bf16.mxu1 %v2620_v53  ;;  %v2028_v44 = vmax.f32 %v1900_v49, 0.0  ;;  %v1139_v63 = vadd.f32 %v1011_v30, %v747_v6  ;;  %v1795_v1 = vmul.f32 %v6120_v41, %v6150_v39 }
 0x1ac   : > { %v533_v48 = vmul.f32 %v6059_v62, %v6139_v23  ;;  %v2036_v11 = vmax.f32 %v1908_v52, 0.0  ;;  %v541_v60 = vmul.f32 %v6059_v62, %v6142_v4  ;;  %v1005_v51 = vmul.f32 %v5990_v25, %v6143_v17 }
 0x1ad   : > { %v1523_v34 = vadd.f32 %v1395_v27, %v1131_v61  ;;  %v1531_v50 = vadd.f32 %v1403_v57, %v1139_v63  ;;  %v1013_v53 = vmul.f32 %v5990_v25, %v6145_v14  ;;  %v1397_v54 = vmul.f32 %v6077_v58, %v6147_v12 }
 0x1ae   : > { %v741_v26 = vadd.f32 %v6144_v20, %v533_v48  ;;  %2591 = vmatpush1.bf16.msra.mxu0 %v2590_v42  ;;  %v2622_v19 = vpack.c.bf16 %v2036_v11, %v2028_v44  ;;  %v749_v22 = vadd.f32 %v6146_v35, %v541_v60  ;;  %v1405_v21 = vmul.f32 %v6077_v58, %v6148_v0 }
 0x1af   : > { %v1915_v5 = vadd.f32 %v1787_v16, %v1523_v34  ;;  %v1923_v13 = vadd.f32 %v1795_v1, %v1531_v50  ;;  %v1789_v56 = vmul.f32 %v6078_v10, %v6149_v36  ;;  %v1797_v24 = vmul.f32 %v6078_v10, %v6150_v39 }
 0x1b0   : > { %v1133_v46 = vadd.f32 %v1005_v51, %v741_v26  ;;  %2623 = vmatpush1.bf16.msra.mxu1 %v2622_v19  ;;  %v1141_v38 = vadd.f32 %v1013_v53, %v749_v22  ;;  %v530_v31 = vmul.f32 %v6079_v18, %v6139_v23  ;;  %v538_v42 = vmul.f32 %v6079_v18, %v6142_v4 }
 0x1b1   : > { %v2043_v43 = vmax.f32 %v1915_v5, 0.0  ;;  %v2051_v29 = vmax.f32 %v1923_v13, 0.0  ;;  %v1002_v30 = vmul.f32 %v6124_v9, %v6143_v17  ;;  %v1010_v49 = vmul.f32 %v6124_v9, %v6145_v14 }
 0x1b2   : > { %v1525_v2 = vadd.f32 %v1397_v54, %v1133_v46  ;;  %v1533_v6 = vadd.f32 %v1405_v21, %v1141_v38  ;;  %v738_v27 = vadd.f32 %v6144_v20, %v530_v31  ;;  %v746_v57 = vadd.f32 %v6146_v35, %v538_v42  ;;  %v6152_v31 = vld [vmem:[#allocation88_spill] sm:$0xff]  ;;  %v6153_v42 = vld [vmem:[#allocation62_spill] sm:$0xff] }
 0x1b3   : > { %v1394_v52 = vmul.f32 %v6127_v55, %v6147_v12  ;;  %v2592_v61 = vpack.c.bf16 %v2051_v29, %v2043_v43  ;;  %v1402_v44 = vmul.f32 %v6127_v55, %v6148_v0  ;;  %v1786_v63 = vmul.f32 %v6130_v40, %v6149_v36 }
 0x1b4   : > { %v1917_v16 = vadd.f32 %v1789_v56, %v1525_v2  ;;  %v1925_v1 = vadd.f32 %v1797_v24, %v1533_v6  ;;  %v1130_v48 = vadd.f32 %v1002_v30, %v738_v27  ;;  %v1138_v11 = vadd.f32 %v1010_v49, %v746_v57  ;;  %v6155_v6 = vld [vmem:[#allocation65_spill] sm:$0xff]  ;;  %v6156_v57 = vld [vmem:[#allocation104_spill] sm:$0xff] }
 0x1b5   : > { %v1794_v34 = vmul.f32 %v6130_v40, %v6150_v39  ;;  %2593 = vmatprep.subr.bf16.mxu0 %v2592_v61  ;;  %v532_v51 = vmul.f32 %v6094_v32, %v6139_v23  ;;  %v540_v50 = vmul.f32 %v6094_v32, %v6142_v4  ;;  %v1004_v26 = vmul.f32 %v6095_v15, %v6143_v17  ;;  %v6157_v61 = vld [vmem:[#allocation42_spill] sm:$0xff] }
 0x1b6   : > { %v2045_v60 = vmax.f32 %v1917_v16, 0.0  ;;  %v2053_v53 = vmax.f32 %v1925_v1, 0.0  ;;  %v1522_v54 = vadd.f32 %v1394_v52, %v1130_v48  ;;  %v1530_v19 = vadd.f32 %v1402_v44, %v1138_v11  ;;  %v6158_v44 = vld [vmem:[#allocation43_spill] sm:$0xff] }
 0x1b7   : > { %v1012_v5 = vmul.f32 %v6095_v15, %v6145_v14  ;;  %v740_v22 = vadd.f32 %v6144_v20, %v532_v51  ;;  %v748_v21 = vadd.f32 %v6146_v35, %v540_v50  ;;  %v1396_v13 = vmul.f32 %v6136_v3, %v6147_v12  ;;  %v6151_v20 = vld [vmem:[#allocation77_spill] sm:$0xff]  ;;  %v6160_v50 = vld [vmem:[#allocation40_spill] sm:$0xff] }
 0x1b8   : > { %v1404_v23 = vmul.f32 %v6136_v3, %v6148_v0  ;;  %v2624_v4 = vpack.c.bf16 %v2053_v53, %v2045_v60  ;;  %v1914_v46 = vadd.f32 %v1786_v63, %v1522_v54  ;;  %v1922_v56 = vadd.f32 %v1794_v34, %v1530_v19  ;;  %v6159_v34 = vld [vmem:[#allocation105_spill] sm:$0xff] }
 0x1b9   : > { %v1788_v17 = vmul.f32 %v6098_v45, %v6149_v36  ;;  %v1132_v24 = vadd.f32 %v1004_v26, %v740_v22  ;;  %v1140_v43 = vadd.f32 %v1012_v5, %v748_v21  ;;  %v1796_v14 = vmul.f32 %v6098_v45, %v6150_v39  ;;  %v6154_v36 = vld [vmem:[#allocation60_spill] sm:$0xff] }
 0x1ba   : > { %v547_v35 = vmul.f32 %v6101_v28, %v6151_v20  ;;  %2625 = vmatprep.subr.bf16.mxu1 %v2624_v4  ;;  %v2042_v38 = vmax.f32 %v1914_v46, 0.0  ;;  %v2050_v12 = vmax.f32 %v1922_v56, 0.0  ;;  %v555_v0 = vmul.f32 %v6101_v28, %v6152_v31 }
 0x1bb   : > { %v1019_v29 = vmul.f32 %v6114_v59, %v6153_v42  ;;  %v1524_v2 = vadd.f32 %v1396_v13, %v1132_v24  ;;  %v1532_v30 = vadd.f32 %v1404_v23, %v1140_v43  ;;  %v1027_v27 = vmul.f32 %v6114_v59, %v6155_v6 }
 0x1bc   : > { %v755_v49 = vadd.f32 %v6154_v36, %v547_v35  ;;  %v2594_v39 = vpack.c.bf16 %v2050_v12, %v2042_v38  ;;  %v763_v52 = vadd.f32 %v6156_v57, %v555_v0  ;;  %v1411_v16 = vmul.f32 %v6117_v7, %v6157_v61 }
 0x1bd   : > { %v1419_v63 = vmul.f32 %v6117_v7, %v6158_v44  ;;  %v1916_v1 = vadd.f32 %v1788_v17, %v1524_v2  ;;  %v1924_v48 = vadd.f32 %v1796_v14, %v1532_v30  ;;  %v1803_v60 = vmul.f32 %v6120_v41, %v6159_v34 }
 0x1be   : > { %v1147_v11 = vadd.f32 %v1019_v29, %v755_v49  ;;  %2595 = vmatpush1.bf16.msra.mxu0 %v2594_v39  ;;  %v1155_v51 = vadd.f32 %v1027_v27, %v763_v52  ;;  %v1811_v26 = vmul.f32 %v6120_v41, %v6160_v50  ;;  %v549_v53 = vmul.f32 %v6059_v62, %v6151_v20 }
 0x1bf   : > { %v557_v54 = vmul.f32 %v6059_v62, %v6152_v31  ;;  %v2044_v19 = vmax.f32 %v1916_v1, 0.0  ;;  %v2052_v5 = vmax.f32 %v1924_v48, 0.0  ;;  %v1021_v21 = vmul.f32 %v5990_v25, %v6153_v42 }
 0x1c0   : > { %v1539_v22 = vadd.f32 %v1411_v16, %v1147_v11  ;;  %v1547_v13 = vadd.f32 %v1419_v63, %v1155_v51  ;;  %v757_v23 = vadd.f32 %v6154_v36, %v549_v53  ;;  %v1029_v46 = vmul.f32 %v5990_v25, %v6155_v6 }
 0x1c1   : > { %v765_v4 = vadd.f32 %v6156_v57, %v557_v54  ;;  %v2626_v56 = vpack.c.bf16 %v2052_v5, %v2044_v19  ;;  %v1413_v24 = vmul.f32 %v6077_v58, %v6157_v61  ;;  %v1421_v43 = vmul.f32 %v6077_v58, %v6158_v44 }
 0x1c2   : > { %v1931_v17 = vadd.f32 %v1803_v60, %v1539_v22  ;;  %v1939_v14 = vadd.f32 %v1811_v26, %v1547_v13  ;;  %v1149_v35 = vadd.f32 %v1021_v21, %v757_v23  ;;  %v1805_v12 = vmul.f32 %v6078_v10, %v6159_v34 }
 0x1c3   : > { %v1157_v38 = vadd.f32 %v1029_v46, %v765_v4  ;;  %2627 = vmatpush1.bf16.msra.mxu1 %v2626_v56  ;;  %v1813_v29 = vmul.f32 %v6078_v10, %v6160_v50  ;;  %v546_v2 = vmul.f32 %v6079_v18, %v6151_v20  ;;  %v554_v30 = vmul.f32 %v6079_v18, %v6152_v31 }
 0x1c4   : > { %v2059_v0 = vmax.f32 %v1931_v17, 0.0  ;;  %v2067_v49 = vmax.f32 %v1939_v14, 0.0  ;;  %v1541_v27 = vadd.f32 %v1413_v24, %v1149_v35  ;;  %v1018_v52 = vmul.f32 %v6124_v9, %v6153_v42 }
 0x1c5   : > { %v1549_v39 = vadd.f32 %v1421_v43, %v1157_v38  ;;  %v754_v16 = vadd.f32 %v6154_v36, %v546_v2  ;;  %v762_v63 = vadd.f32 %v6156_v57, %v554_v30  ;;  %v1026_v1 = vmul.f32 %v6124_v9, %v6155_v6 }
 0x1c6   : > { %v1410_v48 = vmul.f32 %v6127_v55, %v6157_v61  ;;  %v2596_v11 = vpack.c.bf16 %v2067_v49, %v2059_v0  ;;  %v1933_v60 = vadd.f32 %v1805_v12, %v1541_v27  ;;  %v1418_v26 = vmul.f32 %v6127_v55, %v6158_v44  ;;  %v6163_v49 = vld [vmem:[#allocation54_spill] sm:$0xff] }
 0x1c7   : > { %v1941_v51 = vadd.f32 %v1813_v29, %v1549_v39  ;;  %v1146_v53 = vadd.f32 %v1018_v52, %v754_v16  ;;  %v1154_v54 = vadd.f32 %v1026_v1, %v762_v63  ;;  %v1802_v19 = vmul.f32 %v6130_v40, %v6159_v34  ;;  %v6165_v16 = vld [vmem:[#allocation102_spill] sm:$0xff] }
 0x1c8   : > { %v1810_v5 = vmul.f32 %v6130_v40, %v6160_v50  ;;  %2597 = vmatprep.subr.bf16.mxu0 %v2596_v11  ;;  %v2061_v22 = vmax.f32 %v1933_v60, 0.0  ;;  %v548_v13 = vmul.f32 %v6094_v32, %v6151_v20  ;;  %v556_v23 = vmul.f32 %v6094_v32, %v6152_v31 }
 0x1c9   : > { %v2069_v21 = vmax.f32 %v1941_v51, 0.0  ;;  %v1538_v4 = vadd.f32 %v1410_v48, %v1146_v53  ;;  %v1546_v46 = vadd.f32 %v1418_v26, %v1154_v54  ;;  %v1020_v56 = vmul.f32 %v6095_v15, %v6153_v42  ;;  %v6167_v53 = vld [vmem:[#allocation63_spill] sm:$0xff] }
 0x1ca   : > { %v1028_v17 = vmul.f32 %v6095_v15, %v6155_v6  ;;  %v756_v43 = vadd.f32 %v6154_v36, %v548_v13  ;;  %v764_v14 = vadd.f32 %v6156_v57, %v556_v23  ;;  %v1412_v35 = vmul.f32 %v6136_v3, %v6157_v61  ;;  %v6161_v36 = vld [vmem:[#allocation38_spill] sm:$0xff]  ;;  %v6162_v61 = vld [vmem:[#allocation109_spill] sm:$0xff] }
 0x1cb   : > { %v2628_v24 = vpack.c.bf16 %v2069_v21, %v2061_v22  ;;  %v1930_v20 = vadd.f32 %v1802_v19, %v1538_v4  ;;  %v1938_v38 = vadd.f32 %v1810_v5, %v1546_v46  ;;  %v1420_v31 = vmul.f32 %v6136_v3, %v6158_v44 }
 0x1cc   : > { %v1804_v12 = vmul.f32 %v6098_v45, %v6159_v34  ;;  %v1148_v42 = vadd.f32 %v1020_v56, %v756_v43  ;;  %v1156_v0 = vadd.f32 %v1028_v17, %v764_v14  ;;  %v1812_v6 = vmul.f32 %v6098_v45, %v6160_v50  ;;  %v6164_v34 = vld [vmem:[#allocation114_spill] sm:$0xff]  ;;  %v6166_v50 = vld [vmem:[#allocation101_spill] sm:$0xff] }
 0x1cd   : > { %2629 = vmatprep.subr.bf16.mxu1 %v2628_v24  ;;  %v563_v57 = vmul.f32 %v6101_v28, %v6161_v36  ;;  %v2058_v29 = vmax.f32 %v1930_v20, 0.0  ;;  %v2066_v2 = vmax.f32 %v1938_v38, 0.0  ;;  %v571_v30 = vmul.f32 %v6101_v28, %v6162_v61 }
 0x1ce   : > { %v1035_v44 = vmul.f32 %v6114_v59, %v6163_v49  ;;  %v1540_v27 = vadd.f32 %v1412_v35, %v1148_v42  ;;  %v1548_v39 = vadd.f32 %v1420_v31, %v1156_v0  ;;  %v1043_v63 = vmul.f32 %v6114_v59, %v6165_v16 }
 0x1cf   : > { %v771_v52 = vadd.f32 %v6164_v34, %v563_v57  ;;  %v2598_v1 = vpack.c.bf16 %v2066_v2, %v2058_v29  ;;  %v779_v48 = vadd.f32 %v6166_v50, %v571_v30  ;;  %v1427_v11 = vmul.f32 %v6117_v7, %v5026_v8 }
 0x1d0   : > { %v1435_v60 = vmul.f32 %v6117_v7, %v5053_v37  ;;  %v1932_v28 = vadd.f32 %v1804_v12, %v1540_v27  ;;  %v1940_v51 = vadd.f32 %v1812_v6, %v1548_v39  ;;  %v1819_v54 = vmul.f32 %v6120_v41, %v6167_v53 }
 0x1d1   : > { %v1163_v26 = vadd.f32 %v1035_v44, %v771_v52  ;;  %2599 = vmatpush1.bf16.msra.mxu0 %v2598_v1  ;;  %v1171_v19 = vadd.f32 %v1043_v63, %v779_v48  ;;  %v1827_v59 = vmul.f32 %v6120_v41, %v5075_v33  ;;  %v565_v5 = vmul.f32 %v6059_v62, %v6161_v36 }
 0x1d2   : > { %v573_v22 = vmul.f32 %v6059_v62, %v6162_v61  ;;  %v2060_v21 = vmax.f32 %v1932_v28, 0.0  ;;  %v2068_v13 = vmax.f32 %v1940_v51, 0.0  ;;  %v1037_v23 = vmul.f32 %v5990_v25, %v6163_v49 }
 0x1d3   : > { %v1555_v7 = vadd.f32 %v1427_v11, %v1163_v26  ;;  %v1563_v4 = vadd.f32 %v1435_v60, %v1171_v19  ;;  %v773_v46 = vadd.f32 %v6164_v34, %v565_v5  ;;  %v1045_v41 = vmul.f32 %v5990_v25, %v6165_v16 }
 0x1d4   : > { %v781_v56 = vadd.f32 %v6166_v50, %v573_v22  ;;  %v2630_v17 = vpack.c.bf16 %v2068_v13, %v2060_v21  ;;  %v1429_v43 = vmul.f32 %v6077_v58, %v5026_v8  ;;  %v1437_v62 = vmul.f32 %v6077_v58, %v5053_v37 }
 0x1d5   : > { %v1947_v24 = vadd.f32 %v1819_v54, %v1555_v7  ;;  %v1955_v14 = vadd.f32 %v1827_v59, %v1563_v4  ;;  %v1165_v35 = vadd.f32 %v1037_v23, %v773_v46  ;;  %v1821_v38 = vmul.f32 %v6078_v10, %v6167_v53 }
 0x1d6   : > { %v1173_v20 = vadd.f32 %v1045_v41, %v781_v56  ;;  %2631 = vmatpush1.bf16.msra.mxu1 %v2630_v17  ;;  %v1829_v12 = vmul.f32 %v6078_v10, %v5075_v33  ;;  %v562_v25 = vmul.f32 %v6079_v18, %v6161_v36  ;;  %v570_v42 = vmul.f32 %v6079_v18, %v6162_v61 }
 0x1d7   : > { %v2075_v31 = vmax.f32 %v1947_v24, 0.0  ;;  %v2083_v0 = vmax.f32 %v1955_v14, 0.0  ;;  %v1557_v6 = vadd.f32 %v1429_v43, %v1165_v35  ;;  %v1034_v57 = vmul.f32 %v6124_v9, %v6163_v49 }
 0x1d8   : > { %v1565_v58 = vadd.f32 %v1437_v62, %v1173_v20  ;;  %v770_v29 = vadd.f32 %v6164_v34, %v562_v25  ;;  %v778_v2 = vadd.f32 %v6166_v50, %v570_v42  ;;  %v1042_v30 = vmul.f32 %v6124_v9, %v6165_v16 }
 0x1d9   : > { %v1426_v10 = vmul.f32 %v6127_v55, %v5026_v8  ;;  %v2600_v44 = vpack.c.bf16 %v2083_v0, %v2075_v31  ;;  %v1949_v27 = vadd.f32 %v1821_v38, %v1557_v6  ;;  %v1434_v18 = vmul.f32 %v6127_v55, %v5053_v37 }
 0x1da   : > { %v1957_v39 = vadd.f32 %v1829_v12, %v1565_v58  ;;  %v1162_v52 = vadd.f32 %v1034_v57, %v770_v29  ;;  %v1170_v63 = vadd.f32 %v1042_v30, %v778_v2  ;;  %v1818_v1 = vmul.f32 %v6130_v40, %v6167_v53 }
 0x1db   : > { %v1826_v48 = vmul.f32 %v6130_v40, %v5075_v33  ;;  %2601 = vmatprep.subr.bf16.mxu0 %v2600_v44  ;;  %v2077_v11 = vmax.f32 %v1949_v27, 0.0  ;;  %v564_v60 = vmul.f32 %v6094_v32, %v6161_v36  ;;  %v572_v28 = vmul.f32 %v6094_v32, %v6162_v61 }
 0x1dc   : > { %v2085_v9 = vmax.f32 %v1957_v39, 0.0  ;;  %v1554_v51 = vadd.f32 %v1426_v10, %v1162_v52  ;;  %v1562_v26 = vadd.f32 %v1434_v18, %v1170_v63  ;;  %v1036_v55 = vmul.f32 %v6095_v15, %v6163_v49 }
 0x1dd   : > { %v1044_v54 = vmul.f32 %v6095_v15, %v6165_v16  ;;  %v772_v40 = vadd.f32 %v6164_v34, %v564_v60  ;;  %v780_v59 = vadd.f32 %v6166_v50, %v572_v28  ;;  %v1428_v5 = vmul.f32 %v6136_v3, %v5026_v8 }
 0x1de   : > { %v2632_v19 = vpack.c.bf16 %v2085_v9, %v2077_v11  ;;  %v1946_v36 = vadd.f32 %v1818_v1, %v1554_v51  ;;  %v1954_v22 = vadd.f32 %v1826_v48, %v1562_v26  ;;  %v1436_v32 = vmul.f32 %v6136_v3, %v5053_v37 }
 0x1df   : > { %v1164_v61 = vadd.f32 %v1036_v55, %v772_v40  ;;  %v1172_v21 = vadd.f32 %v1044_v54, %v780_v59  ;;  %v1828_v49 = vmul.f32 %v6098_v45, %v5075_v33  ;;  %v1820_v8 = vmul.f32 %v6098_v45, %v6167_v53 }
 0x1e0   : > { %2633 = vmatprep.subr.bf16.mxu1 %v2632_v19  ;;  %v2074_v15 = vmax.f32 %v1946_v36, 0.0  ;;  %v2082_v16 = vmax.f32 %v1954_v22, 0.0 }
 0x1e1   : > { %v1556_v34 = vadd.f32 %v1428_v5, %v1164_v61  ;;  %v1564_v13 = vadd.f32 %v1436_v32, %v1172_v21 }
 0x1e2   : > { %v2602_v50 = vpack.c.bf16 %v2082_v16, %v2074_v15 }
 0x1e3   : > { %v1948_v7 = vadd.f32 %v1820_v8, %v1556_v34  ;;  %v1956_v23 = vadd.f32 %v1828_v49, %v1564_v13 }
 0x1e4   : > { %2603 = vmatpush1.bf16.msra.mxu0 %v2602_v50 }
 0x1e5   : > { %v2076_v37 = vmax.f32 %v1948_v7, 0.0  ;;  %v2084_v3 = vmax.f32 %v1956_v23, 0.0 }
 0x1e7   : > { %v2634_v4 = vpack.c.bf16 %v2084_v3, %v2076_v37  ;;  %2300 = vmatmul.mubr.f32.vlgmr.msra.gmra.mrb[2].mxu0 %v5115_v47 }
 0x1e9   : > { %2635 = vmatpush1.bf16.msra.mxu1 %v2634_v4 }
 0x1ec   : > { %2371 = vmatmul.mubr.f32.vlgmr.msra.gmra.mrb[2].mxu1 %v5115_v47  ;;  %v2091_v33 = vpop.permute.xlu0 %2090 }
 0x270   : > { %v2159_v46 = vpop.f32.mrb[0].mxu0  ;;  %v2230_v56 = vpop.f32.mrb[0].mxu1 }
 0x271   : > { %v2160_v45 = vadd.f32 %v2159_v46, %v2091_v33  ;;  %v2161_v53 = vpop.f32.mrb[1].mxu0  ;;  %v2231_v41 = vadd.f32 %v2230_v56, %v2091_v33  ;;  %v2232_v17 = vpop.f32.mrb[1].mxu1 }
 0x272   : > { %v2162_v24 = vadd.f32 %v2161_v53, %v2091_v33  ;;  %v2233_v43 = vadd.f32 %v2232_v17, %v2091_v33 }
 0x274   : > { %v2385_v62 = vcombine.low %v2160_v45, %v2162_v24  ;;  %v2386_v14 = vcombine.low %v2231_v41, %v2233_v43 }
 0x276   : > { %2393 = vst [vmem:[%s242_s12] sm:$0xff] %v2385_v62  ;;  %2394 = vst [vmem:[%s242_s12 + $0x8] sm:$0xff] %v2386_v14 }
 0x2ba   : > { %v2301_v47 = vpop.f32.mrb[2].mxu0 }
 0x2bb   : > { %v2302_v35 = vadd.f32 %v2301_v47, %v2091_v33  ;;  %v2303_v20 = vpop.f32.mrb[3].mxu0 }
 0x2bc   : > { %v2304_v38 = vadd.f32 %v2303_v20, %v2091_v33 }
 0x2be   : > { %v2387_v31 = vcombine.low %v2302_v35, %v2304_v38 }
 0x2bf   : > { %v2372_v12 = vpop.f32.mrb[2].mxu1 }
 0x2c0   : > { %v2373_v25 = vadd.f32 %v2372_v12, %v2091_v33  ;;  %2395 = vst [vmem:[%s242_s12 + $0x10] sm:$0xff] %v2387_v31  ;;  %v2374_v42 = vpop.f32.mrb[3].mxu1 }
 0x2c1   : > { %v2375_v0 = vadd.f32 %v2374_v42, %v2091_v33 }
 0x2c3   : > { %v2388_v6 = vcombine.low %v2373_v25, %v2375_v0 }
 0x2c5   : > { %2396 = vst [vmem:[%s242_s12 + $0x18] sm:$0xff] %v2388_v6 }
 0x2c6   : > { %2771 = shalt.err (!%p2768_p7)
}
 0x2c7   : > { %s2772_s9 = scalar_lea.hbm %s5408_s27, 512  ;;  %s2776_s15 = scalar_lea.hbm %s5468_s5, 4096 }
 0x2c8   : > { %p2773_p9 = scmp.ne.s32.totalorder %s5408_s27, %s2772_s9  ;;  %p2777_p12 = scmp.lt.u32.totalorder %s5408_s27, %s5468_s5 }
 0x2c9   : > { %p2778_p13 = scmp.lt.u32.totalorder %s2776_s15, %s2772_s9  ;;  %p2780_p1 = scmp.lt.u32.totalorder %s2772_s9, %s5408_s27 }
 0x2ca   : > { %p2774_p10 = pnand %p2773_p9, %p2941_p3 }
 0x2cb   : > { %p2779_p0 = por %p2778_p13, %p2777_p12 }
 0x2cc   : > { %p2775_p11 = pneg %p2774_p10 }
 0x2cd   : > { %p2781_p2 = por %p2780_p1, %p2779_p0 }
 0x2cf   : > { %p2782_p4 = pnand %p2781_p2, %p2775_p11 }
 0x2d1   : > { %2785 = shalt.err (!%p2782_p4)
}
 0x2d2   : > { %2636 = dma.vmem_to_hbm [thread:$0]  (%p2941_p3), %s5410_s17, 512, %s5408_s27, %s2398_s22  }
 0x2d3 PF: > { %p2642_p5 = scmp.ge.s32.totalorder %s2852_s25, 2  ;;  %s2426_s21 = sand.u32 1, %s2824_s18  }
 0x2d4   : > { %s2427_s14 = scalar_lea.sflag [#allocation3], %s2426_s21 }
 0x2d5   : > { %p2639_p6 = pnand %p2642_p5, %p2950_p8 }
 0x2d7   : > { %2819 = dma.done.wait (!%p2639_p6), %s2427_s14, 512  }
 0x2d8   : > { %2821 = vsyncadd (!%p2639_p6), %s2427_s14, 4294966784  ;;  %s18_s25 = sadd.s32 1, %s2852_s25   ;;  %s6168_s18 = smov %s2828_s19 }
 0x2d9   : > { %p15_p7 = scmp.ge.s32.totalorder %s18_s25, 10   ;;  %s6169_s19 = smov %s2832_s20 }
 0x2da   : > { %s6170_s20 = smov %s2959_s11  ;;  %s6171_s21 = smov %s2844_s23 }
 0x2db   : > { %s6172_s22 = smov %s2848_s24  ;;  %s6173_s23 = smov %s6176_s28 }
 0x2dc   : > { %s6174_s24 = smov %s6180_s29  ;;  %17 = sbr.rel (!%p15_p7) target bundleno = 5 (0x5), region = 75 }
 0x2e3   :  { %2432 = vsyncpa [#allocation3], 1 }
 0x2e4   :  { %2434 = vsyncpa [#allocation3 + $0x1], 1 }

</bundles_post_ra>
